<compile_context>
chip_gen: v7x
topology: tpu7x:2x2x1
jax: 0.10.0
libtpu: 0.0.40
codegen_flags: <defaults>
</compile_context>

<pallas_src>
import jax
import jax.numpy as jnp
from jax import lax
from jax.experimental import pallas as pl
from jax.experimental.pallas import tpu as pltpu


# (fan_in, fan_out) per layer — PyTorch nn.Linear stores W as [out, in].
LAYER_DIMS = ((2, 16), (16, 8), (8, 4), (4, 2), (2, 1))

_CHUNK_ROWS = 16                    # sublane rows per inner-loop chunk (2 vregs/activation)
_CHUNK = _CHUNK_ROWS * 128          # 2048 batch elements per chunk


def _packing_offsets():
    """Static offsets of each layer's (W, b) inside the packed 1-D parameter buffer."""
    offsets = []
    cur = 0
    for fan_in, fan_out in LAYER_DIMS:
        w_off = cur
        b_off = cur + fan_in * fan_out
        cur = b_off + fan_out
        offsets.append((w_off, b_off))
    return tuple(offsets), cur


_OFFSETS, _N_PARAMS = _packing_offsets()              # 233 floats total
_PACKED_SIZE = ((_N_PARAMS + 127) // 128) * 128       # pad to 256


def mlp_kernel(p_ref, x_ref, o_ref):
    """p_ref: (PACKED,) f32 SMEM; x_ref: (2, TR, 128) f32; o_ref: (TR, 128) f32."""
    n_chunks = x_ref.shape[1] // _CHUNK_ROWS          # static
    (w1, b1), (w2, b2), (w3, b3), (w4, b4), (w5, b5) = _OFFSETS

    def chunk_body(c, carry):
        r0 = pl.multiple_of(c * _CHUNK_ROWS, _CHUNK_ROWS)
        # Dense (16, 128) slabs — full vregs on the VALU.
        x0 = x_ref[0, pl.ds(r0, _CHUNK_ROWS), :]
        x1 = x_ref[1, pl.ds(r0, _CHUNK_ROWS), :]

        # ---- Layer 1 (2->16) fused into Layer 2 (16->8) accumulation ----
        # Each hidden-1 activation is produced, consumed by all 8 layer-2
        # accumulators, and dropped immediately: peak live set ~11 slabs.
        acc2 = [jnp.full((_CHUNK_ROWS, 128), p_ref[b2 + o], jnp.float32)
                for o in range(8)]
        for j in range(16):
            h1 = jnp.maximum(
                p_ref[w1 + 2 * j] * x0
                + p_ref[w1 + 2 * j + 1] * x1
                + p_ref[b1 + j],
                0.0)                                   # ReLU after layer 1
            for o in range(8):
                acc2[o] = acc2[o] + p_ref[w2 + 16 * o + j] * h1
        h2 = [jnp.maximum(a, 0.0) for a in acc2]       # ReLU after layer 2

        # ---- Layer 3 (8->4) ----
        h3 = []
        for o in range(4):
            a = p_ref[w3 + 8 * o] * h2[0]
            for i in range(1, 8):
                a = a + p_ref[w3 + 8 * o + i] * h2[i]
            h3.append(jnp.maximum(a + p_ref[b3 + o], 0.0))

        # ---- Layer 4 (4->2) ----
        h4 = []
        for o in range(2):
            a = p_ref[w4 + 4 * o] * h3[0]
            for i in range(1, 4):
                a = a + p_ref[w4 + 4 * o + i] * h3[i]
            h4.append(jnp.maximum(a + p_ref[b4 + o], 0.0))

        # ---- Layer 5 (2->1) + exact sigmoid ----
        logit = p_ref[w5] * h4[0] + p_ref[w5 + 1] * h4[1] + p_ref[b5]
        sig = 1.0 / (1.0 + jnp.exp(-logit))            # exp -> EUP; exact f32 form
        o_ref[pl.ds(r0, _CHUNK_ROWS), :] = sig.astype(o_ref.dtype)
        return carry

    # fori_loop (not a Python for) bounds live ranges and keeps code size small.
    lax.fori_loop(0, n_chunks, chunk_body, 0)


def pack_params(params):
    """Flatten PyTorch-layout (W:[out,in], b:[out]) pairs into one padded f32 vector."""
    flat = []
    for w, b in params:
        flat.append(jnp.ravel(w.astype(jnp.float32)))   # row-major: idx = o*fan_in + i
        flat.append(jnp.ravel(b.astype(jnp.float32)))
    packed = jnp.concatenate(flat)
    return jnp.pad(packed, (0, _PACKED_SIZE - packed.shape[0]))


def simple_classifier_forward(x, params, block_b=131072):
    """x: [B, 2] float32; params: list of (W, b) pairs in PyTorch Linear layout."""
    B = x.shape[0]
    packed = pack_params(params)

    # Chunks of 2048 batch elements (16 sublane rows x 128 lanes).
    n_chunks = pl.cdiv(B, _CHUNK)
    # Chunks per grid tile: target block_b batch rows, but keep >=2 grid steps when
    # there are >=2 chunks of work so v7x's two TensorCores both get a share.
    tile_chunks = max(1, block_b // _CHUNK)
    if n_chunks >= 2:
        tile_chunks = min(tile_chunks, (n_chunks + 1) // 2)
    tile_chunks = min(tile_chunks, n_chunks)
    grid = pl.cdiv(n_chunks, tile_chunks)
    b_pad = grid * tile_chunks * _CHUNK
    rows = b_pad // 128
    tr = tile_chunks * _CHUNK_ROWS                     # rows per grid tile (mult. of 8)

    # Feature-major, sublane/lane-dense layout: (2, rows, 128), batch = row*128 + lane.
    # TODO(synk): if the producer can emit x feature-major directly, this transpose+pad
    # HBM pass disappears; kept here for a self-contained wrapper.
    x_t = x.astype(jnp.float32).T                      # (2, B)
    if b_pad != B:
        x_t = jnp.pad(x_t, ((0, 0), (0, b_pad - B)))
    x_t = x_t.reshape(2, rows, 128)

    out = pl.pallas_call(
        mlp_kernel,
        out_shape=jax.ShapeDtypeStruct((rows, 128), jnp.float32),
        grid=(grid,),
        in_specs=[
            # Whole packed-parameter vector (1 KiB), DMA'd once, resident in SMEM
            # across the entire grid (invariant operand).
            pl.BlockSpec(memory_space=pltpu.MemorySpace.SMEM),
            # Batch tile of the packed input: features x (rows, 128) dense slab.
            pl.BlockSpec((2, tr, 128), lambda i: (0, i, 0)),
        ],
        out_specs=pl.BlockSpec((tr, 128), lambda i: (i, 0)),
        compiler_params=pltpu.CompilerParams(
            dimension_semantics=("parallel",),         # shard batch across TCs on v7x
        ),
    )(packed, x_t)

    return out.reshape(b_pad)[:B].reshape(B, 1)


def init_params(key):
    """Deterministic init matching nn.Linear shapes (W: [out, in], b: [out])."""
    params = []
    for fan_in, fan_out in LAYER_DIMS:
        key, kw, kb = jax.random.split(key, 3)
        bound = 1.0 / (fan_in ** 0.5)  # PyTorch default uniform bound
        w = jax.random.uniform(kw, (fan_out, fan_in), jnp.float32, -bound, bound)
        b = jax.random.uniform(kb, (fan_out,), jnp.float32, -bound, bound)
        params.append((w, b))
    return params


def reference_forward(x, params):
    h = x.astype(jnp.float32)
    for i, (w, b) in enumerate(params):
        h = h @ w.T + b
        if i < len(params) - 1:
            h = jnp.maximum(h, 0.0)
    return jax.nn.sigmoid(h)


if __name__ == "__main__":
    key = jax.random.PRNGKey(0)
    key, kx, kx2 = jax.random.split(key, 3)
    params = init_params(key)

    # Small batch (single tile, single chunk).
    B = 8
    x = jax.random.normal(kx, (B, 2), jnp.float32)
    out = jax.block_until_ready(simple_classifier_forward(x, params))
    ref = reference_forward(x, params)
    assert out.shape == (B, 1)
    assert jnp.allclose(out, ref, atol=1e-5, rtol=1e-5), (out, ref)

    # Larger batch exercising the multi-tile grid + inner chunk loop + padding path.
    B2 = 5000
    x2 = jax.random.normal(kx2, (B2, 2), jnp.float32)
    out2 = jax.block_until_ready(simple_classifier_forward(x2, params))
    ref2 = reference_forward(x2, params)
    assert out2.shape == (B2, 1)
    assert jnp.allclose(out2, ref2, atol=1e-5, rtol=1e-5)

    print("KERNEL_OK")
</pallas_src>

<mosaic_0001>
module attributes {stable_mosaic.version = 11 : i64} {
  func.func @mlp_kernel(%arg0: i32, %arg1: memref<256xf32, #tpu.memory_space<smem>>, %arg2: memref<2x16x128xf32, #tpu.memory_space<vmem>>, %arg3: memref<16x128xf32, #tpu.memory_space<vmem>>) attributes {dimension_semantics = [#tpu.dimension_semantics<parallel>], iteration_bounds = array<i64: 1>, scalar_prefetch = 0 : i64, scratch_operands = 0 : i64, tpu.core_type = #tpu.core_type<tc>, window_params = [{transform_indices = @transform_0, window_bounds = array<i64: 256>}, {transform_indices = @transform_1, window_bounds = array<i64: 2, 16, 128>}, {transform_indices = @transform_2, window_bounds = array<i64: 16, 128>}]} {
    %c0_i32 = arith.constant 0 : i32
    %c16_i32 = arith.constant 16 : i32
    %0 = arith.muli %c0_i32, %c16_i32 : i32
    %1 = tpu.assume_multiple %0, 16 : i32
    %c0 = arith.constant 0 : index
    %2 = arith.index_cast %1 : i32 to index
    %c0_0 = arith.constant 0 : index
    %3 = vector.load %arg2[%c0, %2, %c0_0] : memref<2x16x128xf32, #tpu.memory_space<vmem>>, vector<1x16x128xf32>
    %4 = vector.shape_cast %3 : vector<1x16x128xf32> to vector<16x128xf32>
    %c1 = arith.constant 1 : index
    %5 = arith.index_cast %1 : i32 to index
    %c0_1 = arith.constant 0 : index
    %6 = vector.load %arg2[%c1, %5, %c0_1] : memref<2x16x128xf32, #tpu.memory_space<vmem>>, vector<1x16x128xf32>
    %7 = vector.shape_cast %6 : vector<1x16x128xf32> to vector<16x128xf32>
    %c176 = arith.constant 176 : index
    %8 = memref.load %arg1[%c176] : memref<256xf32, #tpu.memory_space<smem>>
    %9 = vector.broadcast %8 : f32 to vector<16x128xf32>
    %c177 = arith.constant 177 : index
    %10 = memref.load %arg1[%c177] : memref<256xf32, #tpu.memory_space<smem>>
    %11 = vector.broadcast %10 : f32 to vector<16x128xf32>
    %c178 = arith.constant 178 : index
    %12 = memref.load %arg1[%c178] : memref<256xf32, #tpu.memory_space<smem>>
    %13 = vector.broadcast %12 : f32 to vector<16x128xf32>
    %c179 = arith.constant 179 : index
    %14 = memref.load %arg1[%c179] : memref<256xf32, #tpu.memory_space<smem>>
    %15 = vector.broadcast %14 : f32 to vector<16x128xf32>
    %c180 = arith.constant 180 : index
    %16 = memref.load %arg1[%c180] : memref<256xf32, #tpu.memory_space<smem>>
    %17 = vector.broadcast %16 : f32 to vector<16x128xf32>
    %c181 = arith.constant 181 : index
    %18 = memref.load %arg1[%c181] : memref<256xf32, #tpu.memory_space<smem>>
    %19 = vector.broadcast %18 : f32 to vector<16x128xf32>
    %c182 = arith.constant 182 : index
    %20 = memref.load %arg1[%c182] : memref<256xf32, #tpu.memory_space<smem>>
    %21 = vector.broadcast %20 : f32 to vector<16x128xf32>
    %c183 = arith.constant 183 : index
    %22 = memref.load %arg1[%c183] : memref<256xf32, #tpu.memory_space<smem>>
    %23 = vector.broadcast %22 : f32 to vector<16x128xf32>
    %c0_2 = arith.constant 0 : index
    %24 = memref.load %arg1[%c0_2] : memref<256xf32, #tpu.memory_space<smem>>
    %25 = vector.broadcast %24 : f32 to vector<16x128xf32>
    %26 = arith.mulf %25, %4 : vector<16x128xf32>
    %c1_3 = arith.constant 1 : index
    %27 = memref.load %arg1[%c1_3] : memref<256xf32, #tpu.memory_space<smem>>
    %28 = vector.broadcast %27 : f32 to vector<16x128xf32>
    %29 = arith.mulf %28, %7 : vector<16x128xf32>
    %30 = arith.addf %26, %29 : vector<16x128xf32>
    %c32 = arith.constant 32 : index
    %31 = memref.load %arg1[%c32] : memref<256xf32, #tpu.memory_space<smem>>
    %32 = vector.broadcast %31 : f32 to vector<16x128xf32>
    %33 = arith.addf %30, %32 : vector<16x128xf32>
    %cst = arith.constant 0.000000e+00 : f32
    %34 = vector.broadcast %cst : f32 to vector<16x128xf32>
    %35 = arith.maximumf %33, %34 : vector<16x128xf32>
    %c48 = arith.constant 48 : index
    %36 = memref.load %arg1[%c48] : memref<256xf32, #tpu.memory_space<smem>>
    %37 = vector.broadcast %36 : f32 to vector<16x128xf32>
    %38 = arith.mulf %37, %35 : vector<16x128xf32>
    %39 = arith.addf %9, %38 : vector<16x128xf32>
    %c64 = arith.constant 64 : index
    %40 = memref.load %arg1[%c64] : memref<256xf32, #tpu.memory_space<smem>>
    %41 = vector.broadcast %40 : f32 to vector<16x128xf32>
    %42 = arith.mulf %41, %35 : vector<16x128xf32>
    %43 = arith.addf %11, %42 : vector<16x128xf32>
    %c80 = arith.constant 80 : index
    %44 = memref.load %arg1[%c80] : memref<256xf32, #tpu.memory_space<smem>>
    %45 = vector.broadcast %44 : f32 to vector<16x128xf32>
    %46 = arith.mulf %45, %35 : vector<16x128xf32>
    %47 = arith.addf %13, %46 : vector<16x128xf32>
    %c96 = arith.constant 96 : index
    %48 = memref.load %arg1[%c96] : memref<256xf32, #tpu.memory_space<smem>>
    %49 = vector.broadcast %48 : f32 to vector<16x128xf32>
    %50 = arith.mulf %49, %35 : vector<16x128xf32>
    %51 = arith.addf %15, %50 : vector<16x128xf32>
    %c112 = arith.constant 112 : index
    %52 = memref.load %arg1[%c112] : memref<256xf32, #tpu.memory_space<smem>>
    %53 = vector.broadcast %52 : f32 to vector<16x128xf32>
    %54 = arith.mulf %53, %35 : vector<16x128xf32>
    %55 = arith.addf %17, %54 : vector<16x128xf32>
    %c128 = arith.constant 128 : index
    %56 = memref.load %arg1[%c128] : memref<256xf32, #tpu.memory_space<smem>>
    %57 = vector.broadcast %56 : f32 to vector<16x128xf32>
    %58 = arith.mulf %57, %35 : vector<16x128xf32>
    %59 = arith.addf %19, %58 : vector<16x128xf32>
    %c144 = arith.constant 144 : index
    %60 = memref.load %arg1[%c144] : memref<256xf32, #tpu.memory_space<smem>>
    %61 = vector.broadcast %60 : f32 to vector<16x128xf32>
    %62 = arith.mulf %61, %35 : vector<16x128xf32>
    %63 = arith.addf %21, %62 : vector<16x128xf32>
    %c160 = arith.constant 160 : index
    %64 = memref.load %arg1[%c160] : memref<256xf32, #tpu.memory_space<smem>>
    %65 = vector.broadcast %64 : f32 to vector<16x128xf32>
    %66 = arith.mulf %65, %35 : vector<16x128xf32>
    %67 = arith.addf %23, %66 : vector<16x128xf32>
    %c2 = arith.constant 2 : index
    %68 = memref.load %arg1[%c2] : memref<256xf32, #tpu.memory_space<smem>>
    %69 = vector.broadcast %68 : f32 to vector<16x128xf32>
    %70 = arith.mulf %69, %4 : vector<16x128xf32>
    %c3 = arith.constant 3 : index
    %71 = memref.load %arg1[%c3] : memref<256xf32, #tpu.memory_space<smem>>
    %72 = vector.broadcast %71 : f32 to vector<16x128xf32>
    %73 = arith.mulf %72, %7 : vector<16x128xf32>
    %74 = arith.addf %70, %73 : vector<16x128xf32>
    %c33 = arith.constant 33 : index
    %75 = memref.load %arg1[%c33] : memref<256xf32, #tpu.memory_space<smem>>
    %76 = vector.broadcast %75 : f32 to vector<16x128xf32>
    %77 = arith.addf %74, %76 : vector<16x128xf32>
    %cst_4 = arith.constant 0.000000e+00 : f32
    %78 = vector.broadcast %cst_4 : f32 to vector<16x128xf32>
    %79 = arith.maximumf %77, %78 : vector<16x128xf32>
    %c49 = arith.constant 49 : index
    %80 = memref.load %arg1[%c49] : memref<256xf32, #tpu.memory_space<smem>>
    %81 = vector.broadcast %80 : f32 to vector<16x128xf32>
    %82 = arith.mulf %81, %79 : vector<16x128xf32>
    %83 = arith.addf %39, %82 : vector<16x128xf32>
    %c65 = arith.constant 65 : index
    %84 = memref.load %arg1[%c65] : memref<256xf32, #tpu.memory_space<smem>>
    %85 = vector.broadcast %84 : f32 to vector<16x128xf32>
    %86 = arith.mulf %85, %79 : vector<16x128xf32>
    %87 = arith.addf %43, %86 : vector<16x128xf32>
    %c81 = arith.constant 81 : index
    %88 = memref.load %arg1[%c81] : memref<256xf32, #tpu.memory_space<smem>>
    %89 = vector.broadcast %88 : f32 to vector<16x128xf32>
    %90 = arith.mulf %89, %79 : vector<16x128xf32>
    %91 = arith.addf %47, %90 : vector<16x128xf32>
    %c97 = arith.constant 97 : index
    %92 = memref.load %arg1[%c97] : memref<256xf32, #tpu.memory_space<smem>>
    %93 = vector.broadcast %92 : f32 to vector<16x128xf32>
    %94 = arith.mulf %93, %79 : vector<16x128xf32>
    %95 = arith.addf %51, %94 : vector<16x128xf32>
    %c113 = arith.constant 113 : index
    %96 = memref.load %arg1[%c113] : memref<256xf32, #tpu.memory_space<smem>>
    %97 = vector.broadcast %96 : f32 to vector<16x128xf32>
    %98 = arith.mulf %97, %79 : vector<16x128xf32>
    %99 = arith.addf %55, %98 : vector<16x128xf32>
    %c129 = arith.constant 129 : index
    %100 = memref.load %arg1[%c129] : memref<256xf32, #tpu.memory_space<smem>>
    %101 = vector.broadcast %100 : f32 to vector<16x128xf32>
    %102 = arith.mulf %101, %79 : vector<16x128xf32>
    %103 = arith.addf %59, %102 : vector<16x128xf32>
    %c145 = arith.constant 145 : index
    %104 = memref.load %arg1[%c145] : memref<256xf32, #tpu.memory_space<smem>>
    %105 = vector.broadcast %104 : f32 to vector<16x128xf32>
    %106 = arith.mulf %105, %79 : vector<16x128xf32>
    %107 = arith.addf %63, %106 : vector<16x128xf32>
    %c161 = arith.constant 161 : index
    %108 = memref.load %arg1[%c161] : memref<256xf32, #tpu.memory_space<smem>>
    %109 = vector.broadcast %108 : f32 to vector<16x128xf32>
    %110 = arith.mulf %109, %79 : vector<16x128xf32>
    %111 = arith.addf %67, %110 : vector<16x128xf32>
    %c4 = arith.constant 4 : index
    %112 = memref.load %arg1[%c4] : memref<256xf32, #tpu.memory_space<smem>>
    %113 = vector.broadcast %112 : f32 to vector<16x128xf32>
    %114 = arith.mulf %113, %4 : vector<16x128xf32>
    %c5 = arith.constant 5 : index
    %115 = memref.load %arg1[%c5] : memref<256xf32, #tpu.memory_space<smem>>
    %116 = vector.broadcast %115 : f32 to vector<16x128xf32>
    %117 = arith.mulf %116, %7 : vector<16x128xf32>
    %118 = arith.addf %114, %117 : vector<16x128xf32>
    %c34 = arith.constant 34 : index
    %119 = memref.load %arg1[%c34] : memref<256xf32, #tpu.memory_space<smem>>
    %120 = vector.broadcast %119 : f32 to vector<16x128xf32>
    %121 = arith.addf %118, %120 : vector<16x128xf32>
    %cst_5 = arith.constant 0.000000e+00 : f32
    %122 = vector.broadcast %cst_5 : f32 to vector<16x128xf32>
    %123 = arith.maximumf %121, %122 : vector<16x128xf32>
    %c50 = arith.constant 50 : index
    %124 = memref.load %arg1[%c50] : memref<256xf32, #tpu.memory_space<smem>>
    %125 = vector.broadcast %124 : f32 to vector<16x128xf32>
    %126 = arith.mulf %125, %123 : vector<16x128xf32>
    %127 = arith.addf %83, %126 : vector<16x128xf32>
    %c66 = arith.constant 66 : index
    %128 = memref.load %arg1[%c66] : memref<256xf32, #tpu.memory_space<smem>>
    %129 = vector.broadcast %128 : f32 to vector<16x128xf32>
    %130 = arith.mulf %129, %123 : vector<16x128xf32>
    %131 = arith.addf %87, %130 : vector<16x128xf32>
    %c82 = arith.constant 82 : index
    %132 = memref.load %arg1[%c82] : memref<256xf32, #tpu.memory_space<smem>>
    %133 = vector.broadcast %132 : f32 to vector<16x128xf32>
    %134 = arith.mulf %133, %123 : vector<16x128xf32>
    %135 = arith.addf %91, %134 : vector<16x128xf32>
    %c98 = arith.constant 98 : index
    %136 = memref.load %arg1[%c98] : memref<256xf32, #tpu.memory_space<smem>>
    %137 = vector.broadcast %136 : f32 to vector<16x128xf32>
    %138 = arith.mulf %137, %123 : vector<16x128xf32>
    %139 = arith.addf %95, %138 : vector<16x128xf32>
    %c114 = arith.constant 114 : index
    %140 = memref.load %arg1[%c114] : memref<256xf32, #tpu.memory_space<smem>>
    %141 = vector.broadcast %140 : f32 to vector<16x128xf32>
    %142 = arith.mulf %141, %123 : vector<16x128xf32>
    %143 = arith.addf %99, %142 : vector<16x128xf32>
    %c130 = arith.constant 130 : index
    %144 = memref.load %arg1[%c130] : memref<256xf32, #tpu.memory_space<smem>>
    %145 = vector.broadcast %144 : f32 to vector<16x128xf32>
    %146 = arith.mulf %145, %123 : vector<16x128xf32>
    %147 = arith.addf %103, %146 : vector<16x128xf32>
    %c146 = arith.constant 146 : index
    %148 = memref.load %arg1[%c146] : memref<256xf32, #tpu.memory_space<smem>>
    %149 = vector.broadcast %148 : f32 to vector<16x128xf32>
    %150 = arith.mulf %149, %123 : vector<16x128xf32>
    %151 = arith.addf %107, %150 : vector<16x128xf32>
    %c162 = arith.constant 162 : index
    %152 = memref.load %arg1[%c162] : memref<256xf32, #tpu.memory_space<smem>>
    %153 = vector.broadcast %152 : f32 to vector<16x128xf32>
    %154 = arith.mulf %153, %123 : vector<16x128xf32>
    %155 = arith.addf %111, %154 : vector<16x128xf32>
    %c6 = arith.constant 6 : index
    %156 = memref.load %arg1[%c6] : memref<256xf32, #tpu.memory_space<smem>>
    %157 = vector.broadcast %156 : f32 to vector<16x128xf32>
    %158 = arith.mulf %157, %4 : vector<16x128xf32>
    %c7 = arith.constant 7 : index
    %159 = memref.load %arg1[%c7] : memref<256xf32, #tpu.memory_space<smem>>
    %160 = vector.broadcast %159 : f32 to vector<16x128xf32>
    %161 = arith.mulf %160, %7 : vector<16x128xf32>
    %162 = arith.addf %158, %161 : vector<16x128xf32>
    %c35 = arith.constant 35 : index
    %163 = memref.load %arg1[%c35] : memref<256xf32, #tpu.memory_space<smem>>
    %164 = vector.broadcast %163 : f32 to vector<16x128xf32>
    %165 = arith.addf %162, %164 : vector<16x128xf32>
    %cst_6 = arith.constant 0.000000e+00 : f32
    %166 = vector.broadcast %cst_6 : f32 to vector<16x128xf32>
    %167 = arith.maximumf %165, %166 : vector<16x128xf32>
    %c51 = arith.constant 51 : index
    %168 = memref.load %arg1[%c51] : memref<256xf32, #tpu.memory_space<smem>>
    %169 = vector.broadcast %168 : f32 to vector<16x128xf32>
    %170 = arith.mulf %169, %167 : vector<16x128xf32>
    %171 = arith.addf %127, %170 : vector<16x128xf32>
    %c67 = arith.constant 67 : index
    %172 = memref.load %arg1[%c67] : memref<256xf32, #tpu.memory_space<smem>>
    %173 = vector.broadcast %172 : f32 to vector<16x128xf32>
    %174 = arith.mulf %173, %167 : vector<16x128xf32>
    %175 = arith.addf %131, %174 : vector<16x128xf32>
    %c83 = arith.constant 83 : index
    %176 = memref.load %arg1[%c83] : memref<256xf32, #tpu.memory_space<smem>>
    %177 = vector.broadcast %176 : f32 to vector<16x128xf32>
    %178 = arith.mulf %177, %167 : vector<16x128xf32>
    %179 = arith.addf %135, %178 : vector<16x128xf32>
    %c99 = arith.constant 99 : index
    %180 = memref.load %arg1[%c99] : memref<256xf32, #tpu.memory_space<smem>>
    %181 = vector.broadcast %180 : f32 to vector<16x128xf32>
    %182 = arith.mulf %181, %167 : vector<16x128xf32>
    %183 = arith.addf %139, %182 : vector<16x128xf32>
    %c115 = arith.constant 115 : index
    %184 = memref.load %arg1[%c115] : memref<256xf32, #tpu.memory_space<smem>>
    %185 = vector.broadcast %184 : f32 to vector<16x128xf32>
    %186 = arith.mulf %185, %167 : vector<16x128xf32>
    %187 = arith.addf %143, %186 : vector<16x128xf32>
    %c131 = arith.constant 131 : index
    %188 = memref.load %arg1[%c131] : memref<256xf32, #tpu.memory_space<smem>>
    %189 = vector.broadcast %188 : f32 to vector<16x128xf32>
    %190 = arith.mulf %189, %167 : vector<16x128xf32>
    %191 = arith.addf %147, %190 : vector<16x128xf32>
    %c147 = arith.constant 147 : index
    %192 = memref.load %arg1[%c147] : memref<256xf32, #tpu.memory_space<smem>>
    %193 = vector.broadcast %192 : f32 to vector<16x128xf32>
    %194 = arith.mulf %193, %167 : vector<16x128xf32>
    %195 = arith.addf %151, %194 : vector<16x128xf32>
    %c163 = arith.constant 163 : index
    %196 = memref.load %arg1[%c163] : memref<256xf32, #tpu.memory_space<smem>>
    %197 = vector.broadcast %196 : f32 to vector<16x128xf32>
    %198 = arith.mulf %197, %167 : vector<16x128xf32>
    %199 = arith.addf %155, %198 : vector<16x128xf32>
    %c8 = arith.constant 8 : index
    %200 = memref.load %arg1[%c8] : memref<256xf32, #tpu.memory_space<smem>>
    %201 = vector.broadcast %200 : f32 to vector<16x128xf32>
    %202 = arith.mulf %201, %4 : vector<16x128xf32>
    %c9 = arith.constant 9 : index
    %203 = memref.load %arg1[%c9] : memref<256xf32, #tpu.memory_space<smem>>
    %204 = vector.broadcast %203 : f32 to vector<16x128xf32>
    %205 = arith.mulf %204, %7 : vector<16x128xf32>
    %206 = arith.addf %202, %205 : vector<16x128xf32>
    %c36 = arith.constant 36 : index
    %207 = memref.load %arg1[%c36] : memref<256xf32, #tpu.memory_space<smem>>
    %208 = vector.broadcast %207 : f32 to vector<16x128xf32>
    %209 = arith.addf %206, %208 : vector<16x128xf32>
    %cst_7 = arith.constant 0.000000e+00 : f32
    %210 = vector.broadcast %cst_7 : f32 to vector<16x128xf32>
    %211 = arith.maximumf %209, %210 : vector<16x128xf32>
    %c52 = arith.constant 52 : index
    %212 = memref.load %arg1[%c52] : memref<256xf32, #tpu.memory_space<smem>>
    %213 = vector.broadcast %212 : f32 to vector<16x128xf32>
    %214 = arith.mulf %213, %211 : vector<16x128xf32>
    %215 = arith.addf %171, %214 : vector<16x128xf32>
    %c68 = arith.constant 68 : index
    %216 = memref.load %arg1[%c68] : memref<256xf32, #tpu.memory_space<smem>>
    %217 = vector.broadcast %216 : f32 to vector<16x128xf32>
    %218 = arith.mulf %217, %211 : vector<16x128xf32>
    %219 = arith.addf %175, %218 : vector<16x128xf32>
    %c84 = arith.constant 84 : index
    %220 = memref.load %arg1[%c84] : memref<256xf32, #tpu.memory_space<smem>>
    %221 = vector.broadcast %220 : f32 to vector<16x128xf32>
    %222 = arith.mulf %221, %211 : vector<16x128xf32>
    %223 = arith.addf %179, %222 : vector<16x128xf32>
    %c100 = arith.constant 100 : index
    %224 = memref.load %arg1[%c100] : memref<256xf32, #tpu.memory_space<smem>>
    %225 = vector.broadcast %224 : f32 to vector<16x128xf32>
    %226 = arith.mulf %225, %211 : vector<16x128xf32>
    %227 = arith.addf %183, %226 : vector<16x128xf32>
    %c116 = arith.constant 116 : index
    %228 = memref.load %arg1[%c116] : memref<256xf32, #tpu.memory_space<smem>>
    %229 = vector.broadcast %228 : f32 to vector<16x128xf32>
    %230 = arith.mulf %229, %211 : vector<16x128xf32>
    %231 = arith.addf %187, %230 : vector<16x128xf32>
    %c132 = arith.constant 132 : index
    %232 = memref.load %arg1[%c132] : memref<256xf32, #tpu.memory_space<smem>>
    %233 = vector.broadcast %232 : f32 to vector<16x128xf32>
    %234 = arith.mulf %233, %211 : vector<16x128xf32>
    %235 = arith.addf %191, %234 : vector<16x128xf32>
    %c148 = arith.constant 148 : index
    %236 = memref.load %arg1[%c148] : memref<256xf32, #tpu.memory_space<smem>>
    %237 = vector.broadcast %236 : f32 to vector<16x128xf32>
    %238 = arith.mulf %237, %211 : vector<16x128xf32>
    %239 = arith.addf %195, %238 : vector<16x128xf32>
    %c164 = arith.constant 164 : index
    %240 = memref.load %arg1[%c164] : memref<256xf32, #tpu.memory_space<smem>>
    %241 = vector.broadcast %240 : f32 to vector<16x128xf32>
    %242 = arith.mulf %241, %211 : vector<16x128xf32>
    %243 = arith.addf %199, %242 : vector<16x128xf32>
    %c10 = arith.constant 10 : index
    %244 = memref.load %arg1[%c10] : memref<256xf32, #tpu.memory_space<smem>>
    %245 = vector.broadcast %244 : f32 to vector<16x128xf32>
    %246 = arith.mulf %245, %4 : vector<16x128xf32>
    %c11 = arith.constant 11 : index
    %247 = memref.load %arg1[%c11] : memref<256xf32, #tpu.memory_space<smem>>
    %248 = vector.broadcast %247 : f32 to vector<16x128xf32>
    %249 = arith.mulf %248, %7 : vector<16x128xf32>
    %250 = arith.addf %246, %249 : vector<16x128xf32>
    %c37 = arith.constant 37 : index
    %251 = memref.load %arg1[%c37] : memref<256xf32, #tpu.memory_space<smem>>
    %252 = vector.broadcast %251 : f32 to vector<16x128xf32>
    %253 = arith.addf %250, %252 : vector<16x128xf32>
    %cst_8 = arith.constant 0.000000e+00 : f32
    %254 = vector.broadcast %cst_8 : f32 to vector<16x128xf32>
    %255 = arith.maximumf %253, %254 : vector<16x128xf32>
    %c53 = arith.constant 53 : index
    %256 = memref.load %arg1[%c53] : memref<256xf32, #tpu.memory_space<smem>>
    %257 = vector.broadcast %256 : f32 to vector<16x128xf32>
    %258 = arith.mulf %257, %255 : vector<16x128xf32>
    %259 = arith.addf %215, %258 : vector<16x128xf32>
    %c69 = arith.constant 69 : index
    %260 = memref.load %arg1[%c69] : memref<256xf32, #tpu.memory_space<smem>>
    %261 = vector.broadcast %260 : f32 to vector<16x128xf32>
    %262 = arith.mulf %261, %255 : vector<16x128xf32>
    %263 = arith.addf %219, %262 : vector<16x128xf32>
    %c85 = arith.constant 85 : index
    %264 = memref.load %arg1[%c85] : memref<256xf32, #tpu.memory_space<smem>>
    %265 = vector.broadcast %264 : f32 to vector<16x128xf32>
    %266 = arith.mulf %265, %255 : vector<16x128xf32>
    %267 = arith.addf %223, %266 : vector<16x128xf32>
    %c101 = arith.constant 101 : index
    %268 = memref.load %arg1[%c101] : memref<256xf32, #tpu.memory_space<smem>>
    %269 = vector.broadcast %268 : f32 to vector<16x128xf32>
    %270 = arith.mulf %269, %255 : vector<16x128xf32>
    %271 = arith.addf %227, %270 : vector<16x128xf32>
    %c117 = arith.constant 117 : index
    %272 = memref.load %arg1[%c117] : memref<256xf32, #tpu.memory_space<smem>>
    %273 = vector.broadcast %272 : f32 to vector<16x128xf32>
    %274 = arith.mulf %273, %255 : vector<16x128xf32>
    %275 = arith.addf %231, %274 : vector<16x128xf32>
    %c133 = arith.constant 133 : index
    %276 = memref.load %arg1[%c133] : memref<256xf32, #tpu.memory_space<smem>>
    %277 = vector.broadcast %276 : f32 to vector<16x128xf32>
    %278 = arith.mulf %277, %255 : vector<16x128xf32>
    %279 = arith.addf %235, %278 : vector<16x128xf32>
    %c149 = arith.constant 149 : index
    %280 = memref.load %arg1[%c149] : memref<256xf32, #tpu.memory_space<smem>>
    %281 = vector.broadcast %280 : f32 to vector<16x128xf32>
    %282 = arith.mulf %281, %255 : vector<16x128xf32>
    %283 = arith.addf %239, %282 : vector<16x128xf32>
    %c165 = arith.constant 165 : index
    %284 = memref.load %arg1[%c165] : memref<256xf32, #tpu.memory_space<smem>>
    %285 = vector.broadcast %284 : f32 to vector<16x128xf32>
    %286 = arith.mulf %285, %255 : vector<16x128xf32>
    %287 = arith.addf %243, %286 : vector<16x128xf32>
    %c12 = arith.constant 12 : index
    %288 = memref.load %arg1[%c12] : memref<256xf32, #tpu.memory_space<smem>>
    %289 = vector.broadcast %288 : f32 to vector<16x128xf32>
    %290 = arith.mulf %289, %4 : vector<16x128xf32>
    %c13 = arith.constant 13 : index
    %291 = memref.load %arg1[%c13] : memref<256xf32, #tpu.memory_space<smem>>
    %292 = vector.broadcast %291 : f32 to vector<16x128xf32>
    %293 = arith.mulf %292, %7 : vector<16x128xf32>
    %294 = arith.addf %290, %293 : vector<16x128xf32>
    %c38 = arith.constant 38 : index
    %295 = memref.load %arg1[%c38] : memref<256xf32, #tpu.memory_space<smem>>
    %296 = vector.broadcast %295 : f32 to vector<16x128xf32>
    %297 = arith.addf %294, %296 : vector<16x128xf32>
    %cst_9 = arith.constant 0.000000e+00 : f32
    %298 = vector.broadcast %cst_9 : f32 to vector<16x128xf32>
    %299 = arith.maximumf %297, %298 : vector<16x128xf32>
    %c54 = arith.constant 54 : index
    %300 = memref.load %arg1[%c54] : memref<256xf32, #tpu.memory_space<smem>>
    %301 = vector.broadcast %300 : f32 to vector<16x128xf32>
    %302 = arith.mulf %301, %299 : vector<16x128xf32>
    %303 = arith.addf %259, %302 : vector<16x128xf32>
    %c70 = arith.constant 70 : index
    %304 = memref.load %arg1[%c70] : memref<256xf32, #tpu.memory_space<smem>>
    %305 = vector.broadcast %304 : f32 to vector<16x128xf32>
    %306 = arith.mulf %305, %299 : vector<16x128xf32>
    %307 = arith.addf %263, %306 : vector<16x128xf32>
    %c86 = arith.constant 86 : index
    %308 = memref.load %arg1[%c86] : memref<256xf32, #tpu.memory_space<smem>>
    %309 = vector.broadcast %308 : f32 to vector<16x128xf32>
    %310 = arith.mulf %309, %299 : vector<16x128xf32>
    %311 = arith.addf %267, %310 : vector<16x128xf32>
    %c102 = arith.constant 102 : index
    %312 = memref.load %arg1[%c102] : memref<256xf32, #tpu.memory_space<smem>>
    %313 = vector.broadcast %312 : f32 to vector<16x128xf32>
    %314 = arith.mulf %313, %299 : vector<16x128xf32>
    %315 = arith.addf %271, %314 : vector<16x128xf32>
    %c118 = arith.constant 118 : index
    %316 = memref.load %arg1[%c118] : memref<256xf32, #tpu.memory_space<smem>>
    %317 = vector.broadcast %316 : f32 to vector<16x128xf32>
    %318 = arith.mulf %317, %299 : vector<16x128xf32>
    %319 = arith.addf %275, %318 : vector<16x128xf32>
    %c134 = arith.constant 134 : index
    %320 = memref.load %arg1[%c134] : memref<256xf32, #tpu.memory_space<smem>>
    %321 = vector.broadcast %320 : f32 to vector<16x128xf32>
    %322 = arith.mulf %321, %299 : vector<16x128xf32>
    %323 = arith.addf %279, %322 : vector<16x128xf32>
    %c150 = arith.constant 150 : index
    %324 = memref.load %arg1[%c150] : memref<256xf32, #tpu.memory_space<smem>>
    %325 = vector.broadcast %324 : f32 to vector<16x128xf32>
    %326 = arith.mulf %325, %299 : vector<16x128xf32>
    %327 = arith.addf %283, %326 : vector<16x128xf32>
    %c166 = arith.constant 166 : index
    %328 = memref.load %arg1[%c166] : memref<256xf32, #tpu.memory_space<smem>>
    %329 = vector.broadcast %328 : f32 to vector<16x128xf32>
    %330 = arith.mulf %329, %299 : vector<16x128xf32>
    %331 = arith.addf %287, %330 : vector<16x128xf32>
    %c14 = arith.constant 14 : index
    %332 = memref.load %arg1[%c14] : memref<256xf32, #tpu.memory_space<smem>>
    %333 = vector.broadcast %332 : f32 to vector<16x128xf32>
    %334 = arith.mulf %333, %4 : vector<16x128xf32>
    %c15 = arith.constant 15 : index
    %335 = memref.load %arg1[%c15] : memref<256xf32, #tpu.memory_space<smem>>
    %336 = vector.broadcast %335 : f32 to vector<16x128xf32>
    %337 = arith.mulf %336, %7 : vector<16x128xf32>
    %338 = arith.addf %334, %337 : vector<16x128xf32>
    %c39 = arith.constant 39 : index
    %339 = memref.load %arg1[%c39] : memref<256xf32, #tpu.memory_space<smem>>
    %340 = vector.broadcast %339 : f32 to vector<16x128xf32>
    %341 = arith.addf %338, %340 : vector<16x128xf32>
    %cst_10 = arith.constant 0.000000e+00 : f32
    %342 = vector.broadcast %cst_10 : f32 to vector<16x128xf32>
    %343 = arith.maximumf %341, %342 : vector<16x128xf32>
    %c55 = arith.constant 55 : index
    %344 = memref.load %arg1[%c55] : memref<256xf32, #tpu.memory_space<smem>>
    %345 = vector.broadcast %344 : f32 to vector<16x128xf32>
    %346 = arith.mulf %345, %343 : vector<16x128xf32>
    %347 = arith.addf %303, %346 : vector<16x128xf32>
    %c71 = arith.constant 71 : index
    %348 = memref.load %arg1[%c71] : memref<256xf32, #tpu.memory_space<smem>>
    %349 = vector.broadcast %348 : f32 to vector<16x128xf32>
    %350 = arith.mulf %349, %343 : vector<16x128xf32>
    %351 = arith.addf %307, %350 : vector<16x128xf32>
    %c87 = arith.constant 87 : index
    %352 = memref.load %arg1[%c87] : memref<256xf32, #tpu.memory_space<smem>>
    %353 = vector.broadcast %352 : f32 to vector<16x128xf32>
    %354 = arith.mulf %353, %343 : vector<16x128xf32>
    %355 = arith.addf %311, %354 : vector<16x128xf32>
    %c103 = arith.constant 103 : index
    %356 = memref.load %arg1[%c103] : memref<256xf32, #tpu.memory_space<smem>>
    %357 = vector.broadcast %356 : f32 to vector<16x128xf32>
    %358 = arith.mulf %357, %343 : vector<16x128xf32>
    %359 = arith.addf %315, %358 : vector<16x128xf32>
    %c119 = arith.constant 119 : index
    %360 = memref.load %arg1[%c119] : memref<256xf32, #tpu.memory_space<smem>>
    %361 = vector.broadcast %360 : f32 to vector<16x128xf32>
    %362 = arith.mulf %361, %343 : vector<16x128xf32>
    %363 = arith.addf %319, %362 : vector<16x128xf32>
    %c135 = arith.constant 135 : index
    %364 = memref.load %arg1[%c135] : memref<256xf32, #tpu.memory_space<smem>>
    %365 = vector.broadcast %364 : f32 to vector<16x128xf32>
    %366 = arith.mulf %365, %343 : vector<16x128xf32>
    %367 = arith.addf %323, %366 : vector<16x128xf32>
    %c151 = arith.constant 151 : index
    %368 = memref.load %arg1[%c151] : memref<256xf32, #tpu.memory_space<smem>>
    %369 = vector.broadcast %368 : f32 to vector<16x128xf32>
    %370 = arith.mulf %369, %343 : vector<16x128xf32>
    %371 = arith.addf %327, %370 : vector<16x128xf32>
    %c167 = arith.constant 167 : index
    %372 = memref.load %arg1[%c167] : memref<256xf32, #tpu.memory_space<smem>>
    %373 = vector.broadcast %372 : f32 to vector<16x128xf32>
    %374 = arith.mulf %373, %343 : vector<16x128xf32>
    %375 = arith.addf %331, %374 : vector<16x128xf32>
    %c16 = arith.constant 16 : index
    %376 = memref.load %arg1[%c16] : memref<256xf32, #tpu.memory_space<smem>>
    %377 = vector.broadcast %376 : f32 to vector<16x128xf32>
    %378 = arith.mulf %377, %4 : vector<16x128xf32>
    %c17 = arith.constant 17 : index
    %379 = memref.load %arg1[%c17] : memref<256xf32, #tpu.memory_space<smem>>
    %380 = vector.broadcast %379 : f32 to vector<16x128xf32>
    %381 = arith.mulf %380, %7 : vector<16x128xf32>
    %382 = arith.addf %378, %381 : vector<16x128xf32>
    %c40 = arith.constant 40 : index
    %383 = memref.load %arg1[%c40] : memref<256xf32, #tpu.memory_space<smem>>
    %384 = vector.broadcast %383 : f32 to vector<16x128xf32>
    %385 = arith.addf %382, %384 : vector<16x128xf32>
    %cst_11 = arith.constant 0.000000e+00 : f32
    %386 = vector.broadcast %cst_11 : f32 to vector<16x128xf32>
    %387 = arith.maximumf %385, %386 : vector<16x128xf32>
    %c56 = arith.constant 56 : index
    %388 = memref.load %arg1[%c56] : memref<256xf32, #tpu.memory_space<smem>>
    %389 = vector.broadcast %388 : f32 to vector<16x128xf32>
    %390 = arith.mulf %389, %387 : vector<16x128xf32>
    %391 = arith.addf %347, %390 : vector<16x128xf32>
    %c72 = arith.constant 72 : index
    %392 = memref.load %arg1[%c72] : memref<256xf32, #tpu.memory_space<smem>>
    %393 = vector.broadcast %392 : f32 to vector<16x128xf32>
    %394 = arith.mulf %393, %387 : vector<16x128xf32>
    %395 = arith.addf %351, %394 : vector<16x128xf32>
    %c88 = arith.constant 88 : index
    %396 = memref.load %arg1[%c88] : memref<256xf32, #tpu.memory_space<smem>>
    %397 = vector.broadcast %396 : f32 to vector<16x128xf32>
    %398 = arith.mulf %397, %387 : vector<16x128xf32>
    %399 = arith.addf %355, %398 : vector<16x128xf32>
    %c104 = arith.constant 104 : index
    %400 = memref.load %arg1[%c104] : memref<256xf32, #tpu.memory_space<smem>>
    %401 = vector.broadcast %400 : f32 to vector<16x128xf32>
    %402 = arith.mulf %401, %387 : vector<16x128xf32>
    %403 = arith.addf %359, %402 : vector<16x128xf32>
    %c120 = arith.constant 120 : index
    %404 = memref.load %arg1[%c120] : memref<256xf32, #tpu.memory_space<smem>>
    %405 = vector.broadcast %404 : f32 to vector<16x128xf32>
    %406 = arith.mulf %405, %387 : vector<16x128xf32>
    %407 = arith.addf %363, %406 : vector<16x128xf32>
    %c136 = arith.constant 136 : index
    %408 = memref.load %arg1[%c136] : memref<256xf32, #tpu.memory_space<smem>>
    %409 = vector.broadcast %408 : f32 to vector<16x128xf32>
    %410 = arith.mulf %409, %387 : vector<16x128xf32>
    %411 = arith.addf %367, %410 : vector<16x128xf32>
    %c152 = arith.constant 152 : index
    %412 = memref.load %arg1[%c152] : memref<256xf32, #tpu.memory_space<smem>>
    %413 = vector.broadcast %412 : f32 to vector<16x128xf32>
    %414 = arith.mulf %413, %387 : vector<16x128xf32>
    %415 = arith.addf %371, %414 : vector<16x128xf32>
    %c168 = arith.constant 168 : index
    %416 = memref.load %arg1[%c168] : memref<256xf32, #tpu.memory_space<smem>>
    %417 = vector.broadcast %416 : f32 to vector<16x128xf32>
    %418 = arith.mulf %417, %387 : vector<16x128xf32>
    %419 = arith.addf %375, %418 : vector<16x128xf32>
    %c18 = arith.constant 18 : index
    %420 = memref.load %arg1[%c18] : memref<256xf32, #tpu.memory_space<smem>>
    %421 = vector.broadcast %420 : f32 to vector<16x128xf32>
    %422 = arith.mulf %421, %4 : vector<16x128xf32>
    %c19 = arith.constant 19 : index
    %423 = memref.load %arg1[%c19] : memref<256xf32, #tpu.memory_space<smem>>
    %424 = vector.broadcast %423 : f32 to vector<16x128xf32>
    %425 = arith.mulf %424, %7 : vector<16x128xf32>
    %426 = arith.addf %422, %425 : vector<16x128xf32>
    %c41 = arith.constant 41 : index
    %427 = memref.load %arg1[%c41] : memref<256xf32, #tpu.memory_space<smem>>
    %428 = vector.broadcast %427 : f32 to vector<16x128xf32>
    %429 = arith.addf %426, %428 : vector<16x128xf32>
    %cst_12 = arith.constant 0.000000e+00 : f32
    %430 = vector.broadcast %cst_12 : f32 to vector<16x128xf32>
    %431 = arith.maximumf %429, %430 : vector<16x128xf32>
    %c57 = arith.constant 57 : index
    %432 = memref.load %arg1[%c57] : memref<256xf32, #tpu.memory_space<smem>>
    %433 = vector.broadcast %432 : f32 to vector<16x128xf32>
    %434 = arith.mulf %433, %431 : vector<16x128xf32>
    %435 = arith.addf %391, %434 : vector<16x128xf32>
    %c73 = arith.constant 73 : index
    %436 = memref.load %arg1[%c73] : memref<256xf32, #tpu.memory_space<smem>>
    %437 = vector.broadcast %436 : f32 to vector<16x128xf32>
    %438 = arith.mulf %437, %431 : vector<16x128xf32>
    %439 = arith.addf %395, %438 : vector<16x128xf32>
    %c89 = arith.constant 89 : index
    %440 = memref.load %arg1[%c89] : memref<256xf32, #tpu.memory_space<smem>>
    %441 = vector.broadcast %440 : f32 to vector<16x128xf32>
    %442 = arith.mulf %441, %431 : vector<16x128xf32>
    %443 = arith.addf %399, %442 : vector<16x128xf32>
    %c105 = arith.constant 105 : index
    %444 = memref.load %arg1[%c105] : memref<256xf32, #tpu.memory_space<smem>>
    %445 = vector.broadcast %444 : f32 to vector<16x128xf32>
    %446 = arith.mulf %445, %431 : vector<16x128xf32>
    %447 = arith.addf %403, %446 : vector<16x128xf32>
    %c121 = arith.constant 121 : index
    %448 = memref.load %arg1[%c121] : memref<256xf32, #tpu.memory_space<smem>>
    %449 = vector.broadcast %448 : f32 to vector<16x128xf32>
    %450 = arith.mulf %449, %431 : vector<16x128xf32>
    %451 = arith.addf %407, %450 : vector<16x128xf32>
    %c137 = arith.constant 137 : index
    %452 = memref.load %arg1[%c137] : memref<256xf32, #tpu.memory_space<smem>>
    %453 = vector.broadcast %452 : f32 to vector<16x128xf32>
    %454 = arith.mulf %453, %431 : vector<16x128xf32>
    %455 = arith.addf %411, %454 : vector<16x128xf32>
    %c153 = arith.constant 153 : index
    %456 = memref.load %arg1[%c153] : memref<256xf32, #tpu.memory_space<smem>>
    %457 = vector.broadcast %456 : f32 to vector<16x128xf32>
    %458 = arith.mulf %457, %431 : vector<16x128xf32>
    %459 = arith.addf %415, %458 : vector<16x128xf32>
    %c169 = arith.constant 169 : index
    %460 = memref.load %arg1[%c169] : memref<256xf32, #tpu.memory_space<smem>>
    %461 = vector.broadcast %460 : f32 to vector<16x128xf32>
    %462 = arith.mulf %461, %431 : vector<16x128xf32>
    %463 = arith.addf %419, %462 : vector<16x128xf32>
    %c20 = arith.constant 20 : index
    %464 = memref.load %arg1[%c20] : memref<256xf32, #tpu.memory_space<smem>>
    %465 = vector.broadcast %464 : f32 to vector<16x128xf32>
    %466 = arith.mulf %465, %4 : vector<16x128xf32>
    %c21 = arith.constant 21 : index
    %467 = memref.load %arg1[%c21] : memref<256xf32, #tpu.memory_space<smem>>
    %468 = vector.broadcast %467 : f32 to vector<16x128xf32>
    %469 = arith.mulf %468, %7 : vector<16x128xf32>
    %470 = arith.addf %466, %469 : vector<16x128xf32>
    %c42 = arith.constant 42 : index
    %471 = memref.load %arg1[%c42] : memref<256xf32, #tpu.memory_space<smem>>
    %472 = vector.broadcast %471 : f32 to vector<16x128xf32>
    %473 = arith.addf %470, %472 : vector<16x128xf32>
    %cst_13 = arith.constant 0.000000e+00 : f32
    %474 = vector.broadcast %cst_13 : f32 to vector<16x128xf32>
    %475 = arith.maximumf %473, %474 : vector<16x128xf32>
    %c58 = arith.constant 58 : index
    %476 = memref.load %arg1[%c58] : memref<256xf32, #tpu.memory_space<smem>>
    %477 = vector.broadcast %476 : f32 to vector<16x128xf32>
    %478 = arith.mulf %477, %475 : vector<16x128xf32>
    %479 = arith.addf %435, %478 : vector<16x128xf32>
    %c74 = arith.constant 74 : index
    %480 = memref.load %arg1[%c74] : memref<256xf32, #tpu.memory_space<smem>>
    %481 = vector.broadcast %480 : f32 to vector<16x128xf32>
    %482 = arith.mulf %481, %475 : vector<16x128xf32>
    %483 = arith.addf %439, %482 : vector<16x128xf32>
    %c90 = arith.constant 90 : index
    %484 = memref.load %arg1[%c90] : memref<256xf32, #tpu.memory_space<smem>>
    %485 = vector.broadcast %484 : f32 to vector<16x128xf32>
    %486 = arith.mulf %485, %475 : vector<16x128xf32>
    %487 = arith.addf %443, %486 : vector<16x128xf32>
    %c106 = arith.constant 106 : index
    %488 = memref.load %arg1[%c106] : memref<256xf32, #tpu.memory_space<smem>>
    %489 = vector.broadcast %488 : f32 to vector<16x128xf32>
    %490 = arith.mulf %489, %475 : vector<16x128xf32>
    %491 = arith.addf %447, %490 : vector<16x128xf32>
    %c122 = arith.constant 122 : index
    %492 = memref.load %arg1[%c122] : memref<256xf32, #tpu.memory_space<smem>>
    %493 = vector.broadcast %492 : f32 to vector<16x128xf32>
    %494 = arith.mulf %493, %475 : vector<16x128xf32>
    %495 = arith.addf %451, %494 : vector<16x128xf32>
    %c138 = arith.constant 138 : index
    %496 = memref.load %arg1[%c138] : memref<256xf32, #tpu.memory_space<smem>>
    %497 = vector.broadcast %496 : f32 to vector<16x128xf32>
    %498 = arith.mulf %497, %475 : vector<16x128xf32>
    %499 = arith.addf %455, %498 : vector<16x128xf32>
    %c154 = arith.constant 154 : index
    %500 = memref.load %arg1[%c154] : memref<256xf32, #tpu.memory_space<smem>>
    %501 = vector.broadcast %500 : f32 to vector<16x128xf32>
    %502 = arith.mulf %501, %475 : vector<16x128xf32>
    %503 = arith.addf %459, %502 : vector<16x128xf32>
    %c170 = arith.constant 170 : index
    %504 = memref.load %arg1[%c170] : memref<256xf32, #tpu.memory_space<smem>>
    %505 = vector.broadcast %504 : f32 to vector<16x128xf32>
    %506 = arith.mulf %505, %475 : vector<16x128xf32>
    %507 = arith.addf %463, %506 : vector<16x128xf32>
    %c22 = arith.constant 22 : index
    %508 = memref.load %arg1[%c22] : memref<256xf32, #tpu.memory_space<smem>>
    %509 = vector.broadcast %508 : f32 to vector<16x128xf32>
    %510 = arith.mulf %509, %4 : vector<16x128xf32>
    %c23 = arith.constant 23 : index
    %511 = memref.load %arg1[%c23] : memref<256xf32, #tpu.memory_space<smem>>
    %512 = vector.broadcast %511 : f32 to vector<16x128xf32>
    %513 = arith.mulf %512, %7 : vector<16x128xf32>
    %514 = arith.addf %510, %513 : vector<16x128xf32>
    %c43 = arith.constant 43 : index
    %515 = memref.load %arg1[%c43] : memref<256xf32, #tpu.memory_space<smem>>
    %516 = vector.broadcast %515 : f32 to vector<16x128xf32>
    %517 = arith.addf %514, %516 : vector<16x128xf32>
    %cst_14 = arith.constant 0.000000e+00 : f32
    %518 = vector.broadcast %cst_14 : f32 to vector<16x128xf32>
    %519 = arith.maximumf %517, %518 : vector<16x128xf32>
    %c59 = arith.constant 59 : index
    %520 = memref.load %arg1[%c59] : memref<256xf32, #tpu.memory_space<smem>>
    %521 = vector.broadcast %520 : f32 to vector<16x128xf32>
    %522 = arith.mulf %521, %519 : vector<16x128xf32>
    %523 = arith.addf %479, %522 : vector<16x128xf32>
    %c75 = arith.constant 75 : index
    %524 = memref.load %arg1[%c75] : memref<256xf32, #tpu.memory_space<smem>>
    %525 = vector.broadcast %524 : f32 to vector<16x128xf32>
    %526 = arith.mulf %525, %519 : vector<16x128xf32>
    %527 = arith.addf %483, %526 : vector<16x128xf32>
    %c91 = arith.constant 91 : index
    %528 = memref.load %arg1[%c91] : memref<256xf32, #tpu.memory_space<smem>>
    %529 = vector.broadcast %528 : f32 to vector<16x128xf32>
    %530 = arith.mulf %529, %519 : vector<16x128xf32>
    %531 = arith.addf %487, %530 : vector<16x128xf32>
    %c107 = arith.constant 107 : index
    %532 = memref.load %arg1[%c107] : memref<256xf32, #tpu.memory_space<smem>>
    %533 = vector.broadcast %532 : f32 to vector<16x128xf32>
    %534 = arith.mulf %533, %519 : vector<16x128xf32>
    %535 = arith.addf %491, %534 : vector<16x128xf32>
    %c123 = arith.constant 123 : index
    %536 = memref.load %arg1[%c123] : memref<256xf32, #tpu.memory_space<smem>>
    %537 = vector.broadcast %536 : f32 to vector<16x128xf32>
    %538 = arith.mulf %537, %519 : vector<16x128xf32>
    %539 = arith.addf %495, %538 : vector<16x128xf32>
    %c139 = arith.constant 139 : index
    %540 = memref.load %arg1[%c139] : memref<256xf32, #tpu.memory_space<smem>>
    %541 = vector.broadcast %540 : f32 to vector<16x128xf32>
    %542 = arith.mulf %541, %519 : vector<16x128xf32>
    %543 = arith.addf %499, %542 : vector<16x128xf32>
    %c155 = arith.constant 155 : index
    %544 = memref.load %arg1[%c155] : memref<256xf32, #tpu.memory_space<smem>>
    %545 = vector.broadcast %544 : f32 to vector<16x128xf32>
    %546 = arith.mulf %545, %519 : vector<16x128xf32>
    %547 = arith.addf %503, %546 : vector<16x128xf32>
    %c171 = arith.constant 171 : index
    %548 = memref.load %arg1[%c171] : memref<256xf32, #tpu.memory_space<smem>>
    %549 = vector.broadcast %548 : f32 to vector<16x128xf32>
    %550 = arith.mulf %549, %519 : vector<16x128xf32>
    %551 = arith.addf %507, %550 : vector<16x128xf32>
    %c24 = arith.constant 24 : index
    %552 = memref.load %arg1[%c24] : memref<256xf32, #tpu.memory_space<smem>>
    %553 = vector.broadcast %552 : f32 to vector<16x128xf32>
    %554 = arith.mulf %553, %4 : vector<16x128xf32>
    %c25 = arith.constant 25 : index
    %555 = memref.load %arg1[%c25] : memref<256xf32, #tpu.memory_space<smem>>
    %556 = vector.broadcast %555 : f32 to vector<16x128xf32>
    %557 = arith.mulf %556, %7 : vector<16x128xf32>
    %558 = arith.addf %554, %557 : vector<16x128xf32>
    %c44 = arith.constant 44 : index
    %559 = memref.load %arg1[%c44] : memref<256xf32, #tpu.memory_space<smem>>
    %560 = vector.broadcast %559 : f32 to vector<16x128xf32>
    %561 = arith.addf %558, %560 : vector<16x128xf32>
    %cst_15 = arith.constant 0.000000e+00 : f32
    %562 = vector.broadcast %cst_15 : f32 to vector<16x128xf32>
    %563 = arith.maximumf %561, %562 : vector<16x128xf32>
    %c60 = arith.constant 60 : index
    %564 = memref.load %arg1[%c60] : memref<256xf32, #tpu.memory_space<smem>>
    %565 = vector.broadcast %564 : f32 to vector<16x128xf32>
    %566 = arith.mulf %565, %563 : vector<16x128xf32>
    %567 = arith.addf %523, %566 : vector<16x128xf32>
    %c76 = arith.constant 76 : index
    %568 = memref.load %arg1[%c76] : memref<256xf32, #tpu.memory_space<smem>>
    %569 = vector.broadcast %568 : f32 to vector<16x128xf32>
    %570 = arith.mulf %569, %563 : vector<16x128xf32>
    %571 = arith.addf %527, %570 : vector<16x128xf32>
    %c92 = arith.constant 92 : index
    %572 = memref.load %arg1[%c92] : memref<256xf32, #tpu.memory_space<smem>>
    %573 = vector.broadcast %572 : f32 to vector<16x128xf32>
    %574 = arith.mulf %573, %563 : vector<16x128xf32>
    %575 = arith.addf %531, %574 : vector<16x128xf32>
    %c108 = arith.constant 108 : index
    %576 = memref.load %arg1[%c108] : memref<256xf32, #tpu.memory_space<smem>>
    %577 = vector.broadcast %576 : f32 to vector<16x128xf32>
    %578 = arith.mulf %577, %563 : vector<16x128xf32>
    %579 = arith.addf %535, %578 : vector<16x128xf32>
    %c124 = arith.constant 124 : index
    %580 = memref.load %arg1[%c124] : memref<256xf32, #tpu.memory_space<smem>>
    %581 = vector.broadcast %580 : f32 to vector<16x128xf32>
    %582 = arith.mulf %581, %563 : vector<16x128xf32>
    %583 = arith.addf %539, %582 : vector<16x128xf32>
    %c140 = arith.constant 140 : index
    %584 = memref.load %arg1[%c140] : memref<256xf32, #tpu.memory_space<smem>>
    %585 = vector.broadcast %584 : f32 to vector<16x128xf32>
    %586 = arith.mulf %585, %563 : vector<16x128xf32>
    %587 = arith.addf %543, %586 : vector<16x128xf32>
    %c156 = arith.constant 156 : index
    %588 = memref.load %arg1[%c156] : memref<256xf32, #tpu.memory_space<smem>>
    %589 = vector.broadcast %588 : f32 to vector<16x128xf32>
    %590 = arith.mulf %589, %563 : vector<16x128xf32>
    %591 = arith.addf %547, %590 : vector<16x128xf32>
    %c172 = arith.constant 172 : index
    %592 = memref.load %arg1[%c172] : memref<256xf32, #tpu.memory_space<smem>>
    %593 = vector.broadcast %592 : f32 to vector<16x128xf32>
    %594 = arith.mulf %593, %563 : vector<16x128xf32>
    %595 = arith.addf %551, %594 : vector<16x128xf32>
    %c26 = arith.constant 26 : index
    %596 = memref.load %arg1[%c26] : memref<256xf32, #tpu.memory_space<smem>>
    %597 = vector.broadcast %596 : f32 to vector<16x128xf32>
    %598 = arith.mulf %597, %4 : vector<16x128xf32>
    %c27 = arith.constant 27 : index
    %599 = memref.load %arg1[%c27] : memref<256xf32, #tpu.memory_space<smem>>
    %600 = vector.broadcast %599 : f32 to vector<16x128xf32>
    %601 = arith.mulf %600, %7 : vector<16x128xf32>
    %602 = arith.addf %598, %601 : vector<16x128xf32>
    %c45 = arith.constant 45 : index
    %603 = memref.load %arg1[%c45] : memref<256xf32, #tpu.memory_space<smem>>
    %604 = vector.broadcast %603 : f32 to vector<16x128xf32>
    %605 = arith.addf %602, %604 : vector<16x128xf32>
    %cst_16 = arith.constant 0.000000e+00 : f32
    %606 = vector.broadcast %cst_16 : f32 to vector<16x128xf32>
    %607 = arith.maximumf %605, %606 : vector<16x128xf32>
    %c61 = arith.constant 61 : index
    %608 = memref.load %arg1[%c61] : memref<256xf32, #tpu.memory_space<smem>>
    %609 = vector.broadcast %608 : f32 to vector<16x128xf32>
    %610 = arith.mulf %609, %607 : vector<16x128xf32>
    %611 = arith.addf %567, %610 : vector<16x128xf32>
    %c77 = arith.constant 77 : index
    %612 = memref.load %arg1[%c77] : memref<256xf32, #tpu.memory_space<smem>>
    %613 = vector.broadcast %612 : f32 to vector<16x128xf32>
    %614 = arith.mulf %613, %607 : vector<16x128xf32>
    %615 = arith.addf %571, %614 : vector<16x128xf32>
    %c93 = arith.constant 93 : index
    %616 = memref.load %arg1[%c93] : memref<256xf32, #tpu.memory_space<smem>>
    %617 = vector.broadcast %616 : f32 to vector<16x128xf32>
    %618 = arith.mulf %617, %607 : vector<16x128xf32>
    %619 = arith.addf %575, %618 : vector<16x128xf32>
    %c109 = arith.constant 109 : index
    %620 = memref.load %arg1[%c109] : memref<256xf32, #tpu.memory_space<smem>>
    %621 = vector.broadcast %620 : f32 to vector<16x128xf32>
    %622 = arith.mulf %621, %607 : vector<16x128xf32>
    %623 = arith.addf %579, %622 : vector<16x128xf32>
    %c125 = arith.constant 125 : index
    %624 = memref.load %arg1[%c125] : memref<256xf32, #tpu.memory_space<smem>>
    %625 = vector.broadcast %624 : f32 to vector<16x128xf32>
    %626 = arith.mulf %625, %607 : vector<16x128xf32>
    %627 = arith.addf %583, %626 : vector<16x128xf32>
    %c141 = arith.constant 141 : index
    %628 = memref.load %arg1[%c141] : memref<256xf32, #tpu.memory_space<smem>>
    %629 = vector.broadcast %628 : f32 to vector<16x128xf32>
    %630 = arith.mulf %629, %607 : vector<16x128xf32>
    %631 = arith.addf %587, %630 : vector<16x128xf32>
    %c157 = arith.constant 157 : index
    %632 = memref.load %arg1[%c157] : memref<256xf32, #tpu.memory_space<smem>>
    %633 = vector.broadcast %632 : f32 to vector<16x128xf32>
    %634 = arith.mulf %633, %607 : vector<16x128xf32>
    %635 = arith.addf %591, %634 : vector<16x128xf32>
    %c173 = arith.constant 173 : index
    %636 = memref.load %arg1[%c173] : memref<256xf32, #tpu.memory_space<smem>>
    %637 = vector.broadcast %636 : f32 to vector<16x128xf32>
    %638 = arith.mulf %637, %607 : vector<16x128xf32>
    %639 = arith.addf %595, %638 : vector<16x128xf32>
    %c28 = arith.constant 28 : index
    %640 = memref.load %arg1[%c28] : memref<256xf32, #tpu.memory_space<smem>>
    %641 = vector.broadcast %640 : f32 to vector<16x128xf32>
    %642 = arith.mulf %641, %4 : vector<16x128xf32>
    %c29 = arith.constant 29 : index
    %643 = memref.load %arg1[%c29] : memref<256xf32, #tpu.memory_space<smem>>
    %644 = vector.broadcast %643 : f32 to vector<16x128xf32>
    %645 = arith.mulf %644, %7 : vector<16x128xf32>
    %646 = arith.addf %642, %645 : vector<16x128xf32>
    %c46 = arith.constant 46 : index
    %647 = memref.load %arg1[%c46] : memref<256xf32, #tpu.memory_space<smem>>
    %648 = vector.broadcast %647 : f32 to vector<16x128xf32>
    %649 = arith.addf %646, %648 : vector<16x128xf32>
    %cst_17 = arith.constant 0.000000e+00 : f32
    %650 = vector.broadcast %cst_17 : f32 to vector<16x128xf32>
    %651 = arith.maximumf %649, %650 : vector<16x128xf32>
    %c62 = arith.constant 62 : index
    %652 = memref.load %arg1[%c62] : memref<256xf32, #tpu.memory_space<smem>>
    %653 = vector.broadcast %652 : f32 to vector<16x128xf32>
    %654 = arith.mulf %653, %651 : vector<16x128xf32>
    %655 = arith.addf %611, %654 : vector<16x128xf32>
    %c78 = arith.constant 78 : index
    %656 = memref.load %arg1[%c78] : memref<256xf32, #tpu.memory_space<smem>>
    %657 = vector.broadcast %656 : f32 to vector<16x128xf32>
    %658 = arith.mulf %657, %651 : vector<16x128xf32>
    %659 = arith.addf %615, %658 : vector<16x128xf32>
    %c94 = arith.constant 94 : index
    %660 = memref.load %arg1[%c94] : memref<256xf32, #tpu.memory_space<smem>>
    %661 = vector.broadcast %660 : f32 to vector<16x128xf32>
    %662 = arith.mulf %661, %651 : vector<16x128xf32>
    %663 = arith.addf %619, %662 : vector<16x128xf32>
    %c110 = arith.constant 110 : index
    %664 = memref.load %arg1[%c110] : memref<256xf32, #tpu.memory_space<smem>>
    %665 = vector.broadcast %664 : f32 to vector<16x128xf32>
    %666 = arith.mulf %665, %651 : vector<16x128xf32>
    %667 = arith.addf %623, %666 : vector<16x128xf32>
    %c126 = arith.constant 126 : index
    %668 = memref.load %arg1[%c126] : memref<256xf32, #tpu.memory_space<smem>>
    %669 = vector.broadcast %668 : f32 to vector<16x128xf32>
    %670 = arith.mulf %669, %651 : vector<16x128xf32>
    %671 = arith.addf %627, %670 : vector<16x128xf32>
    %c142 = arith.constant 142 : index
    %672 = memref.load %arg1[%c142] : memref<256xf32, #tpu.memory_space<smem>>
    %673 = vector.broadcast %672 : f32 to vector<16x128xf32>
    %674 = arith.mulf %673, %651 : vector<16x128xf32>
    %675 = arith.addf %631, %674 : vector<16x128xf32>
    %c158 = arith.constant 158 : index
    %676 = memref.load %arg1[%c158] : memref<256xf32, #tpu.memory_space<smem>>
    %677 = vector.broadcast %676 : f32 to vector<16x128xf32>
    %678 = arith.mulf %677, %651 : vector<16x128xf32>
    %679 = arith.addf %635, %678 : vector<16x128xf32>
    %c174 = arith.constant 174 : index
    %680 = memref.load %arg1[%c174] : memref<256xf32, #tpu.memory_space<smem>>
    %681 = vector.broadcast %680 : f32 to vector<16x128xf32>
    %682 = arith.mulf %681, %651 : vector<16x128xf32>
    %683 = arith.addf %639, %682 : vector<16x128xf32>
    %c30 = arith.constant 30 : index
    %684 = memref.load %arg1[%c30] : memref<256xf32, #tpu.memory_space<smem>>
    %685 = vector.broadcast %684 : f32 to vector<16x128xf32>
    %686 = arith.mulf %685, %4 : vector<16x128xf32>
    %c31 = arith.constant 31 : index
    %687 = memref.load %arg1[%c31] : memref<256xf32, #tpu.memory_space<smem>>
    %688 = vector.broadcast %687 : f32 to vector<16x128xf32>
    %689 = arith.mulf %688, %7 : vector<16x128xf32>
    %690 = arith.addf %686, %689 : vector<16x128xf32>
    %c47 = arith.constant 47 : index
    %691 = memref.load %arg1[%c47] : memref<256xf32, #tpu.memory_space<smem>>
    %692 = vector.broadcast %691 : f32 to vector<16x128xf32>
    %693 = arith.addf %690, %692 : vector<16x128xf32>
    %cst_18 = arith.constant 0.000000e+00 : f32
    %694 = vector.broadcast %cst_18 : f32 to vector<16x128xf32>
    %695 = arith.maximumf %693, %694 : vector<16x128xf32>
    %c63 = arith.constant 63 : index
    %696 = memref.load %arg1[%c63] : memref<256xf32, #tpu.memory_space<smem>>
    %697 = vector.broadcast %696 : f32 to vector<16x128xf32>
    %698 = arith.mulf %697, %695 : vector<16x128xf32>
    %699 = arith.addf %655, %698 : vector<16x128xf32>
    %c79 = arith.constant 79 : index
    %700 = memref.load %arg1[%c79] : memref<256xf32, #tpu.memory_space<smem>>
    %701 = vector.broadcast %700 : f32 to vector<16x128xf32>
    %702 = arith.mulf %701, %695 : vector<16x128xf32>
    %703 = arith.addf %659, %702 : vector<16x128xf32>
    %c95 = arith.constant 95 : index
    %704 = memref.load %arg1[%c95] : memref<256xf32, #tpu.memory_space<smem>>
    %705 = vector.broadcast %704 : f32 to vector<16x128xf32>
    %706 = arith.mulf %705, %695 : vector<16x128xf32>
    %707 = arith.addf %663, %706 : vector<16x128xf32>
    %c111 = arith.constant 111 : index
    %708 = memref.load %arg1[%c111] : memref<256xf32, #tpu.memory_space<smem>>
    %709 = vector.broadcast %708 : f32 to vector<16x128xf32>
    %710 = arith.mulf %709, %695 : vector<16x128xf32>
    %711 = arith.addf %667, %710 : vector<16x128xf32>
    %c127 = arith.constant 127 : index
    %712 = memref.load %arg1[%c127] : memref<256xf32, #tpu.memory_space<smem>>
    %713 = vector.broadcast %712 : f32 to vector<16x128xf32>
    %714 = arith.mulf %713, %695 : vector<16x128xf32>
    %715 = arith.addf %671, %714 : vector<16x128xf32>
    %c143 = arith.constant 143 : index
    %716 = memref.load %arg1[%c143] : memref<256xf32, #tpu.memory_space<smem>>
    %717 = vector.broadcast %716 : f32 to vector<16x128xf32>
    %718 = arith.mulf %717, %695 : vector<16x128xf32>
    %719 = arith.addf %675, %718 : vector<16x128xf32>
    %c159 = arith.constant 159 : index
    %720 = memref.load %arg1[%c159] : memref<256xf32, #tpu.memory_space<smem>>
    %721 = vector.broadcast %720 : f32 to vector<16x128xf32>
    %722 = arith.mulf %721, %695 : vector<16x128xf32>
    %723 = arith.addf %679, %722 : vector<16x128xf32>
    %c175 = arith.constant 175 : index
    %724 = memref.load %arg1[%c175] : memref<256xf32, #tpu.memory_space<smem>>
    %725 = vector.broadcast %724 : f32 to vector<16x128xf32>
    %726 = arith.mulf %725, %695 : vector<16x128xf32>
    %727 = arith.addf %683, %726 : vector<16x128xf32>
    %cst_19 = arith.constant 0.000000e+00 : f32
    %728 = vector.broadcast %cst_19 : f32 to vector<16x128xf32>
    %729 = arith.maximumf %699, %728 : vector<16x128xf32>
    %cst_20 = arith.constant 0.000000e+00 : f32
    %730 = vector.broadcast %cst_20 : f32 to vector<16x128xf32>
    %731 = arith.maximumf %703, %730 : vector<16x128xf32>
    %cst_21 = arith.constant 0.000000e+00 : f32
    %732 = vector.broadcast %cst_21 : f32 to vector<16x128xf32>
    %733 = arith.maximumf %707, %732 : vector<16x128xf32>
    %cst_22 = arith.constant 0.000000e+00 : f32
    %734 = vector.broadcast %cst_22 : f32 to vector<16x128xf32>
    %735 = arith.maximumf %711, %734 : vector<16x128xf32>
    %cst_23 = arith.constant 0.000000e+00 : f32
    %736 = vector.broadcast %cst_23 : f32 to vector<16x128xf32>
    %737 = arith.maximumf %715, %736 : vector<16x128xf32>
    %cst_24 = arith.constant 0.000000e+00 : f32
    %738 = vector.broadcast %cst_24 : f32 to vector<16x128xf32>
    %739 = arith.maximumf %719, %738 : vector<16x128xf32>
    %cst_25 = arith.constant 0.000000e+00 : f32
    %740 = vector.broadcast %cst_25 : f32 to vector<16x128xf32>
    %741 = arith.maximumf %723, %740 : vector<16x128xf32>
    %cst_26 = arith.constant 0.000000e+00 : f32
    %742 = vector.broadcast %cst_26 : f32 to vector<16x128xf32>
    %743 = arith.maximumf %727, %742 : vector<16x128xf32>
    %c184 = arith.constant 184 : index
    %744 = memref.load %arg1[%c184] : memref<256xf32, #tpu.memory_space<smem>>
    %745 = vector.broadcast %744 : f32 to vector<16x128xf32>
    %746 = arith.mulf %745, %729 : vector<16x128xf32>
    %c185 = arith.constant 185 : index
    %747 = memref.load %arg1[%c185] : memref<256xf32, #tpu.memory_space<smem>>
    %748 = vector.broadcast %747 : f32 to vector<16x128xf32>
    %749 = arith.mulf %748, %731 : vector<16x128xf32>
    %750 = arith.addf %746, %749 : vector<16x128xf32>
    %c186 = arith.constant 186 : index
    %751 = memref.load %arg1[%c186] : memref<256xf32, #tpu.memory_space<smem>>
    %752 = vector.broadcast %751 : f32 to vector<16x128xf32>
    %753 = arith.mulf %752, %733 : vector<16x128xf32>
    %754 = arith.addf %750, %753 : vector<16x128xf32>
    %c187 = arith.constant 187 : index
    %755 = memref.load %arg1[%c187] : memref<256xf32, #tpu.memory_space<smem>>
    %756 = vector.broadcast %755 : f32 to vector<16x128xf32>
    %757 = arith.mulf %756, %735 : vector<16x128xf32>
    %758 = arith.addf %754, %757 : vector<16x128xf32>
    %c188 = arith.constant 188 : index
    %759 = memref.load %arg1[%c188] : memref<256xf32, #tpu.memory_space<smem>>
    %760 = vector.broadcast %759 : f32 to vector<16x128xf32>
    %761 = arith.mulf %760, %737 : vector<16x128xf32>
    %762 = arith.addf %758, %761 : vector<16x128xf32>
    %c189 = arith.constant 189 : index
    %763 = memref.load %arg1[%c189] : memref<256xf32, #tpu.memory_space<smem>>
    %764 = vector.broadcast %763 : f32 to vector<16x128xf32>
    %765 = arith.mulf %764, %739 : vector<16x128xf32>
    %766 = arith.addf %762, %765 : vector<16x128xf32>
    %c190 = arith.constant 190 : index
    %767 = memref.load %arg1[%c190] : memref<256xf32, #tpu.memory_space<smem>>
    %768 = vector.broadcast %767 : f32 to vector<16x128xf32>
    %769 = arith.mulf %768, %741 : vector<16x128xf32>
    %770 = arith.addf %766, %769 : vector<16x128xf32>
    %c191 = arith.constant 191 : index
    %771 = memref.load %arg1[%c191] : memref<256xf32, #tpu.memory_space<smem>>
    %772 = vector.broadcast %771 : f32 to vector<16x128xf32>
    %773 = arith.mulf %772, %743 : vector<16x128xf32>
    %774 = arith.addf %770, %773 : vector<16x128xf32>
    %c216 = arith.constant 216 : index
    %775 = memref.load %arg1[%c216] : memref<256xf32, #tpu.memory_space<smem>>
    %776 = vector.broadcast %775 : f32 to vector<16x128xf32>
    %777 = arith.addf %774, %776 : vector<16x128xf32>
    %cst_27 = arith.constant 0.000000e+00 : f32
    %778 = vector.broadcast %cst_27 : f32 to vector<16x128xf32>
    %779 = arith.maximumf %777, %778 : vector<16x128xf32>
    %c192 = arith.constant 192 : index
    %780 = memref.load %arg1[%c192] : memref<256xf32, #tpu.memory_space<smem>>
    %781 = vector.broadcast %780 : f32 to vector<16x128xf32>
    %782 = arith.mulf %781, %729 : vector<16x128xf32>
    %c193 = arith.constant 193 : index
    %783 = memref.load %arg1[%c193] : memref<256xf32, #tpu.memory_space<smem>>
    %784 = vector.broadcast %783 : f32 to vector<16x128xf32>
    %785 = arith.mulf %784, %731 : vector<16x128xf32>
    %786 = arith.addf %782, %785 : vector<16x128xf32>
    %c194 = arith.constant 194 : index
    %787 = memref.load %arg1[%c194] : memref<256xf32, #tpu.memory_space<smem>>
    %788 = vector.broadcast %787 : f32 to vector<16x128xf32>
    %789 = arith.mulf %788, %733 : vector<16x128xf32>
    %790 = arith.addf %786, %789 : vector<16x128xf32>
    %c195 = arith.constant 195 : index
    %791 = memref.load %arg1[%c195] : memref<256xf32, #tpu.memory_space<smem>>
    %792 = vector.broadcast %791 : f32 to vector<16x128xf32>
    %793 = arith.mulf %792, %735 : vector<16x128xf32>
    %794 = arith.addf %790, %793 : vector<16x128xf32>
    %c196 = arith.constant 196 : index
    %795 = memref.load %arg1[%c196] : memref<256xf32, #tpu.memory_space<smem>>
    %796 = vector.broadcast %795 : f32 to vector<16x128xf32>
    %797 = arith.mulf %796, %737 : vector<16x128xf32>
    %798 = arith.addf %794, %797 : vector<16x128xf32>
    %c197 = arith.constant 197 : index
    %799 = memref.load %arg1[%c197] : memref<256xf32, #tpu.memory_space<smem>>
    %800 = vector.broadcast %799 : f32 to vector<16x128xf32>
    %801 = arith.mulf %800, %739 : vector<16x128xf32>
    %802 = arith.addf %798, %801 : vector<16x128xf32>
    %c198 = arith.constant 198 : index
    %803 = memref.load %arg1[%c198] : memref<256xf32, #tpu.memory_space<smem>>
    %804 = vector.broadcast %803 : f32 to vector<16x128xf32>
    %805 = arith.mulf %804, %741 : vector<16x128xf32>
    %806 = arith.addf %802, %805 : vector<16x128xf32>
    %c199 = arith.constant 199 : index
    %807 = memref.load %arg1[%c199] : memref<256xf32, #tpu.memory_space<smem>>
    %808 = vector.broadcast %807 : f32 to vector<16x128xf32>
    %809 = arith.mulf %808, %743 : vector<16x128xf32>
    %810 = arith.addf %806, %809 : vector<16x128xf32>
    %c217 = arith.constant 217 : index
    %811 = memref.load %arg1[%c217] : memref<256xf32, #tpu.memory_space<smem>>
    %812 = vector.broadcast %811 : f32 to vector<16x128xf32>
    %813 = arith.addf %810, %812 : vector<16x128xf32>
    %cst_28 = arith.constant 0.000000e+00 : f32
    %814 = vector.broadcast %cst_28 : f32 to vector<16x128xf32>
    %815 = arith.maximumf %813, %814 : vector<16x128xf32>
    %c200 = arith.constant 200 : index
    %816 = memref.load %arg1[%c200] : memref<256xf32, #tpu.memory_space<smem>>
    %817 = vector.broadcast %816 : f32 to vector<16x128xf32>
    %818 = arith.mulf %817, %729 : vector<16x128xf32>
    %c201 = arith.constant 201 : index
    %819 = memref.load %arg1[%c201] : memref<256xf32, #tpu.memory_space<smem>>
    %820 = vector.broadcast %819 : f32 to vector<16x128xf32>
    %821 = arith.mulf %820, %731 : vector<16x128xf32>
    %822 = arith.addf %818, %821 : vector<16x128xf32>
    %c202 = arith.constant 202 : index
    %823 = memref.load %arg1[%c202] : memref<256xf32, #tpu.memory_space<smem>>
    %824 = vector.broadcast %823 : f32 to vector<16x128xf32>
    %825 = arith.mulf %824, %733 : vector<16x128xf32>
    %826 = arith.addf %822, %825 : vector<16x128xf32>
    %c203 = arith.constant 203 : index
    %827 = memref.load %arg1[%c203] : memref<256xf32, #tpu.memory_space<smem>>
    %828 = vector.broadcast %827 : f32 to vector<16x128xf32>
    %829 = arith.mulf %828, %735 : vector<16x128xf32>
    %830 = arith.addf %826, %829 : vector<16x128xf32>
    %c204 = arith.constant 204 : index
    %831 = memref.load %arg1[%c204] : memref<256xf32, #tpu.memory_space<smem>>
    %832 = vector.broadcast %831 : f32 to vector<16x128xf32>
    %833 = arith.mulf %832, %737 : vector<16x128xf32>
    %834 = arith.addf %830, %833 : vector<16x128xf32>
    %c205 = arith.constant 205 : index
    %835 = memref.load %arg1[%c205] : memref<256xf32, #tpu.memory_space<smem>>
    %836 = vector.broadcast %835 : f32 to vector<16x128xf32>
    %837 = arith.mulf %836, %739 : vector<16x128xf32>
    %838 = arith.addf %834, %837 : vector<16x128xf32>
    %c206 = arith.constant 206 : index
    %839 = memref.load %arg1[%c206] : memref<256xf32, #tpu.memory_space<smem>>
    %840 = vector.broadcast %839 : f32 to vector<16x128xf32>
    %841 = arith.mulf %840, %741 : vector<16x128xf32>
    %842 = arith.addf %838, %841 : vector<16x128xf32>
    %c207 = arith.constant 207 : index
    %843 = memref.load %arg1[%c207] : memref<256xf32, #tpu.memory_space<smem>>
    %844 = vector.broadcast %843 : f32 to vector<16x128xf32>
    %845 = arith.mulf %844, %743 : vector<16x128xf32>
    %846 = arith.addf %842, %845 : vector<16x128xf32>
    %c218 = arith.constant 218 : index
    %847 = memref.load %arg1[%c218] : memref<256xf32, #tpu.memory_space<smem>>
    %848 = vector.broadcast %847 : f32 to vector<16x128xf32>
    %849 = arith.addf %846, %848 : vector<16x128xf32>
    %cst_29 = arith.constant 0.000000e+00 : f32
    %850 = vector.broadcast %cst_29 : f32 to vector<16x128xf32>
    %851 = arith.maximumf %849, %850 : vector<16x128xf32>
    %c208 = arith.constant 208 : index
    %852 = memref.load %arg1[%c208] : memref<256xf32, #tpu.memory_space<smem>>
    %853 = vector.broadcast %852 : f32 to vector<16x128xf32>
    %854 = arith.mulf %853, %729 : vector<16x128xf32>
    %c209 = arith.constant 209 : index
    %855 = memref.load %arg1[%c209] : memref<256xf32, #tpu.memory_space<smem>>
    %856 = vector.broadcast %855 : f32 to vector<16x128xf32>
    %857 = arith.mulf %856, %731 : vector<16x128xf32>
    %858 = arith.addf %854, %857 : vector<16x128xf32>
    %c210 = arith.constant 210 : index
    %859 = memref.load %arg1[%c210] : memref<256xf32, #tpu.memory_space<smem>>
    %860 = vector.broadcast %859 : f32 to vector<16x128xf32>
    %861 = arith.mulf %860, %733 : vector<16x128xf32>
    %862 = arith.addf %858, %861 : vector<16x128xf32>
    %c211 = arith.constant 211 : index
    %863 = memref.load %arg1[%c211] : memref<256xf32, #tpu.memory_space<smem>>
    %864 = vector.broadcast %863 : f32 to vector<16x128xf32>
    %865 = arith.mulf %864, %735 : vector<16x128xf32>
    %866 = arith.addf %862, %865 : vector<16x128xf32>
    %c212 = arith.constant 212 : index
    %867 = memref.load %arg1[%c212] : memref<256xf32, #tpu.memory_space<smem>>
    %868 = vector.broadcast %867 : f32 to vector<16x128xf32>
    %869 = arith.mulf %868, %737 : vector<16x128xf32>
    %870 = arith.addf %866, %869 : vector<16x128xf32>
    %c213 = arith.constant 213 : index
    %871 = memref.load %arg1[%c213] : memref<256xf32, #tpu.memory_space<smem>>
    %872 = vector.broadcast %871 : f32 to vector<16x128xf32>
    %873 = arith.mulf %872, %739 : vector<16x128xf32>
    %874 = arith.addf %870, %873 : vector<16x128xf32>
    %c214 = arith.constant 214 : index
    %875 = memref.load %arg1[%c214] : memref<256xf32, #tpu.memory_space<smem>>
    %876 = vector.broadcast %875 : f32 to vector<16x128xf32>
    %877 = arith.mulf %876, %741 : vector<16x128xf32>
    %878 = arith.addf %874, %877 : vector<16x128xf32>
    %c215 = arith.constant 215 : index
    %879 = memref.load %arg1[%c215] : memref<256xf32, #tpu.memory_space<smem>>
    %880 = vector.broadcast %879 : f32 to vector<16x128xf32>
    %881 = arith.mulf %880, %743 : vector<16x128xf32>
    %882 = arith.addf %878, %881 : vector<16x128xf32>
    %c219 = arith.constant 219 : index
    %883 = memref.load %arg1[%c219] : memref<256xf32, #tpu.memory_space<smem>>
    %884 = vector.broadcast %883 : f32 to vector<16x128xf32>
    %885 = arith.addf %882, %884 : vector<16x128xf32>
    %cst_30 = arith.constant 0.000000e+00 : f32
    %886 = vector.broadcast %cst_30 : f32 to vector<16x128xf32>
    %887 = arith.maximumf %885, %886 : vector<16x128xf32>
    %c220 = arith.constant 220 : index
    %888 = memref.load %arg1[%c220] : memref<256xf32, #tpu.memory_space<smem>>
    %889 = vector.broadcast %888 : f32 to vector<16x128xf32>
    %890 = arith.mulf %889, %779 : vector<16x128xf32>
    %c221 = arith.constant 221 : index
    %891 = memref.load %arg1[%c221] : memref<256xf32, #tpu.memory_space<smem>>
    %892 = vector.broadcast %891 : f32 to vector<16x128xf32>
    %893 = arith.mulf %892, %815 : vector<16x128xf32>
    %894 = arith.addf %890, %893 : vector<16x128xf32>
    %c222 = arith.constant 222 : index
    %895 = memref.load %arg1[%c222] : memref<256xf32, #tpu.memory_space<smem>>
    %896 = vector.broadcast %895 : f32 to vector<16x128xf32>
    %897 = arith.mulf %896, %851 : vector<16x128xf32>
    %898 = arith.addf %894, %897 : vector<16x128xf32>
    %c223 = arith.constant 223 : index
    %899 = memref.load %arg1[%c223] : memref<256xf32, #tpu.memory_space<smem>>
    %900 = vector.broadcast %899 : f32 to vector<16x128xf32>
    %901 = arith.mulf %900, %887 : vector<16x128xf32>
    %902 = arith.addf %898, %901 : vector<16x128xf32>
    %c228 = arith.constant 228 : index
    %903 = memref.load %arg1[%c228] : memref<256xf32, #tpu.memory_space<smem>>
    %904 = vector.broadcast %903 : f32 to vector<16x128xf32>
    %905 = arith.addf %902, %904 : vector<16x128xf32>
    %cst_31 = arith.constant 0.000000e+00 : f32
    %906 = vector.broadcast %cst_31 : f32 to vector<16x128xf32>
    %907 = arith.maximumf %905, %906 : vector<16x128xf32>
    %c224 = arith.constant 224 : index
    %908 = memref.load %arg1[%c224] : memref<256xf32, #tpu.memory_space<smem>>
    %909 = vector.broadcast %908 : f32 to vector<16x128xf32>
    %910 = arith.mulf %909, %779 : vector<16x128xf32>
    %c225 = arith.constant 225 : index
    %911 = memref.load %arg1[%c225] : memref<256xf32, #tpu.memory_space<smem>>
    %912 = vector.broadcast %911 : f32 to vector<16x128xf32>
    %913 = arith.mulf %912, %815 : vector<16x128xf32>
    %914 = arith.addf %910, %913 : vector<16x128xf32>
    %c226 = arith.constant 226 : index
    %915 = memref.load %arg1[%c226] : memref<256xf32, #tpu.memory_space<smem>>
    %916 = vector.broadcast %915 : f32 to vector<16x128xf32>
    %917 = arith.mulf %916, %851 : vector<16x128xf32>
    %918 = arith.addf %914, %917 : vector<16x128xf32>
    %c227 = arith.constant 227 : index
    %919 = memref.load %arg1[%c227] : memref<256xf32, #tpu.memory_space<smem>>
    %920 = vector.broadcast %919 : f32 to vector<16x128xf32>
    %921 = arith.mulf %920, %887 : vector<16x128xf32>
    %922 = arith.addf %918, %921 : vector<16x128xf32>
    %c229 = arith.constant 229 : index
    %923 = memref.load %arg1[%c229] : memref<256xf32, #tpu.memory_space<smem>>
    %924 = vector.broadcast %923 : f32 to vector<16x128xf32>
    %925 = arith.addf %922, %924 : vector<16x128xf32>
    %cst_32 = arith.constant 0.000000e+00 : f32
    %926 = vector.broadcast %cst_32 : f32 to vector<16x128xf32>
    %927 = arith.maximumf %925, %926 : vector<16x128xf32>
    %c230 = arith.constant 230 : index
    %928 = memref.load %arg1[%c230] : memref<256xf32, #tpu.memory_space<smem>>
    %929 = vector.broadcast %928 : f32 to vector<16x128xf32>
    %930 = arith.mulf %929, %907 : vector<16x128xf32>
    %c231 = arith.constant 231 : index
    %931 = memref.load %arg1[%c231] : memref<256xf32, #tpu.memory_space<smem>>
    %932 = vector.broadcast %931 : f32 to vector<16x128xf32>
    %933 = arith.mulf %932, %927 : vector<16x128xf32>
    %934 = arith.addf %930, %933 : vector<16x128xf32>
    %c232 = arith.constant 232 : index
    %935 = memref.load %arg1[%c232] : memref<256xf32, #tpu.memory_space<smem>>
    %936 = vector.broadcast %935 : f32 to vector<16x128xf32>
    %937 = arith.addf %934, %936 : vector<16x128xf32>
    %cst_33 = arith.constant 0.000000e+00 : f32
    %938 = vector.broadcast %cst_33 : f32 to vector<16x128xf32>
    %939 = arith.subf %938, %937 : vector<16x128xf32>
    %940 = math.exp %939 : vector<16x128xf32>
    %cst_34 = arith.constant 1.000000e+00 : f32
    %941 = vector.broadcast %cst_34 : f32 to vector<16x128xf32>
    %942 = arith.addf %941, %940 : vector<16x128xf32>
    %cst_35 = arith.constant 1.000000e+00 : f32
    %943 = vector.broadcast %cst_35 : f32 to vector<16x128xf32>
    %944 = arith.divf %943, %942 : vector<16x128xf32>
    %945 = arith.index_cast %1 : i32 to index
    %c0_36 = arith.constant 0 : index
    %946 = vector.load %arg3[%945, %c0_36] : memref<16x128xf32, #tpu.memory_space<vmem>>, vector<16x128xf32>
    tpu.vector_store %arg3[%945, %c0_36], %944 {strides = array<i32>} : memref<16x128xf32, #tpu.memory_space<vmem>>, vector<16x128xf32>,
    %c1_i32 = arith.constant 1 : i32
    return
  }
  func.func @transform_0(%arg0: i32) -> i32 {
    %c0_i32 = arith.constant 0 : i32
    %c0_i32_0 = arith.constant 0 : i32
    return %c0_i32 : i32
  }
  func.func @transform_1(%arg0: i32) -> (i32, i32, i32) {
    %c0_i32 = arith.constant 0 : i32
    %c0_i32_0 = arith.constant 0 : i32
    %c0_i32_1 = arith.constant 0 : i32
    return %c0_i32, %arg0, %c0_i32_0 : i32, i32, i32
  }
  func.func @transform_2(%arg0: i32) -> (i32, i32) {
    %c0_i32 = arith.constant 0 : i32
    %c0_i32_0 = arith.constant 0 : i32
    return %arg0, %c0_i32 : i32, i32
  }
}

</mosaic_0001>

<bundles_post_ra>
// kernel: tpu_custom_call.1
= control target key start
LH: loop header
LB: loop body
LE: loop exit
PB: predicated region body
PF: predicated region fallthrough
CT: control target
= control target key end

     0   :  { %7 = vsyncpa [#allocation5], 0  ;;  %s3274_s0 = inlined_call_operand.hbm [shape: f32[256], index: 0, kind: input, shape index: {}]   ;;  %s3275_s1 = inlined_call_operand.hbm [shape: f32[2,16,128], index: 1, kind: input, shape index: {}]   ;;  %s3276_s2 = inlined_call_operand.hbm [shape: f32[16,128], index: 2, kind: output, shape index: {}]  }
   0x1   :  { %8 = vsyncpa [#allocation3], 0 }
   0x2   :  { %9 = vsyncpa [#allocation4], 0  ;;  %s1659_s11 = scalar_lea.hbm %s3274_s0, 32 }
   0x3   :  { %p1660_p0 = scmp.ne.s32.totalorder %s3274_s0, %s1659_s11  ;;  %p1663_p1 = scmp.lt.u32.totalorder %s1659_s11, %s3274_s0 }
   0x5   :  { %p1665_p2 = pnand %p1663_p1, %p1660_p0 }
   0x7   :  { %1668 = shalt.err (!%p1665_p2)
}
   0x8   :  { %s1719_s16 = smov [#allocation2]   ;;  %s1720_s19 = smov [#allocation6]  }
   0x9   :  { %17 = dma.hbm_to_smem %s3274_s0, 32, %s1719_s16, [#allocation5]  }
   0xa   :  { %s23_s20 = sshll.u32 %s1720_s19, 4  ;;  %s1669_s23 = scalar_lea.hbm %s3275_s1, 512  ;;  %s24_s20 = int_to_ptr.vmem [resolvable:$true] %s23_s20 }
   0xb   :  { %p1670_p3 = scmp.ne.s32.totalorder %s3275_s1, %s1669_s23  ;;  %p1673_p4 = scmp.lt.u32.totalorder %s1669_s23, %s3275_s1 }
   0xd   :  { %p1675_p5 = pnand %p1673_p4, %p1670_p3 }
   0xf   :  { %1678 = shalt.err (!%p1675_p5)
}
  0x10   :  { %s1679_s28 = scalar_lea.vmem %s24_s20, 512  ;;  %p1684_p7 = scmp.lt.s32.totalorder %s24_s20, %s24_s20 }
  0x11   :  { %p1680_p6 = scmp.ne.s32.totalorder %s24_s20, %s1679_s28  ;;  %p1685_p8 = scmp.lt.s32.totalorder %s1679_s28, %s1679_s28 }
  0x13   :  { %p1686_p9 = por %p1685_p8, %p1684_p7 }
  0x15   :  { %p1687_p10 = pnand %p1686_p9, %p1680_p6 }
  0x17   :  { %1690 = shalt.err (!%p1687_p10)
}
  0x18   :  { %s1721_s0 = smov 128   ;;  %s1722_s29 = smov 8  }
  0x19   :  { %29 = dma.hbm_to_vmem [thread:$0]  %s3275_s1, 512, %s24_s20, [#allocation3], %s1721_s0, %s1721_s0, %s1722_s29  }
  0x1a   :  { %1713 = dma.done.wait [#allocation5], 32  }
  0x1b   :  { %1714 = vsyncadd [#allocation5], 4294967264 }
  0x1c   :  { %1715 = dma.done.wait [#allocation3], 512  }
  0x1d   :  { %1716 = vsyncadd [#allocation3], 4294966784 }
  0x1e   :  { %36 = sfence }
  0x1f   :  { %s1766_s4 = sld [smem:[#allocation2 + $0xb0]]  ;;  %s1768_s5 = sld [smem:[#allocation2 + $0xb1]]  ;;  %v1792_v0 = vld [vmem:[#allocation6] sm:$0xff]  ;;  %v1794_v1 = vld [vmem:[#allocation6 + $0x8] sm:$0xff]  ;;  %v1800_v2 = vld [vmem:[#allocation6 + $0x10] sm:$0xff] }
  0x20   :  { %s1770_s6 = sld [smem:[#allocation2 + $0xb2]]  ;;  %s1772_s7 = sld [smem:[#allocation2 + $0xb3]]  ;;  %v1802_v3 = vld [vmem:[#allocation6 + $0x18] sm:$0xff] }
  0x21   :  { %s1774_s8 = sld [smem:[#allocation2 + $0xb4]]  ;;  %s1776_s9 = sld [smem:[#allocation2 + $0xb5]] }
  0x22   :  { %s1778_s10 = sld [smem:[#allocation2 + $0xb6]]  ;;  %s1780_s1 = sld [smem:[#allocation2 + $0xb7]] }
  0x23   :  { %s59_s11 = sld [smem:[#allocation2]]  ;;  %s1418_s12 = sld [smem:[#allocation2 + $0x1]] }
  0x24   :  { %s1782_s13 = sld [smem:[#allocation2 + $0x20]]  ;;  %s1811_s22 = sld [smem:[#allocation2 + $0x2]] }
  0x25   :  { %s1784_s14 = sld [smem:[#allocation2 + $0x30]]  ;;  %v44_v4 = vstv %s1766_s4  ;;  %v46_v5 = vstv %s1768_s5  ;;  %s1813_s23 = sld [smem:[#allocation2 + $0x3]] }
  0x26   :  { %s1786_s15 = sld [smem:[#allocation2 + $0x40]]  ;;  %v48_v6 = vstv %s1770_s6  ;;  %v50_v8 = vstv %s1772_s7  ;;  %s1818_s24 = sld [smem:[#allocation2 + $0x21]] }
  0x27   :  { %s1788_s16 = sld [smem:[#allocation2 + $0x50]]  ;;  %s1820_s25 = sld [smem:[#allocation2 + $0x31]]  ;;  %v52_v12 = vstv %s1774_s8  ;;  %v54_v13 = vstv %s1776_s9 }
  0x28   :  { %s1790_s17 = sld [smem:[#allocation2 + $0x60]]  ;;  %s1826_s26 = sld [smem:[#allocation2 + $0x41]]  ;;  %v56_v16 = vstv %s1778_s10  ;;  %v58_v17 = vstv %s1780_s1 }
  0x29   :  { %s1796_s18 = sld [smem:[#allocation2 + $0x70]]  ;;  %v60_v7 = vstv %s59_s11  ;;  %v64_v11 = vstv %s1418_s12  ;;  %s1832_s27 = sld [smem:[#allocation2 + $0x51]] }
  0x2a   :  { %s1798_s19 = sld [smem:[#allocation2 + $0x80]]  ;;  %v61_v9 = vmul.f32 %v60_v7, %v1792_v0  ;;  %v62_v10 = vmul.f32 %v60_v7, %v1794_v1  ;;  %v65_v14 = vmul.f32 %v64_v11, %v1800_v2  ;;  %v66_v15 = vmul.f32 %v64_v11, %v1802_v3  ;;  %s1850_s28 = sld [smem:[#allocation2 + $0x61]] }
  0x2b   :  { %s1804_s20 = sld [smem:[#allocation2 + $0x90]]  ;;  %v70_v18 = vstv %s1782_s13  ;;  %v76_v19 = vstv %s1784_s14  ;;  %v124_v30 = vstv %s1811_s22  ;;  %v128_v31 = vstv %s1813_s23  ;;  %s1852_s30 = sld [smem:[#allocation2 + $0x71]] }
  0x2c   :  { %s1806_s21 = sld [smem:[#allocation2 + $0xa0]]  ;;  %v67_v20 = vadd.f32 %v65_v14, %v61_v9  ;;  %v68_v21 = vadd.f32 %v66_v15, %v62_v10  ;;  %v82_v22 = vstv %s1786_s15  ;;  %v125_v32 = vmul.f32 %v124_v30, %v1792_v0  ;;  %s1854_s3 = sld [smem:[#allocation2 + $0x81]] }
  0x2d   :  { %v88_v23 = vstv %s1788_s16  ;;  %v126_v33 = vmul.f32 %v124_v30, %v1794_v1  ;;  %v129_v34 = vmul.f32 %v128_v31, %v1800_v2  ;;  %v130_v35 = vmul.f32 %v128_v31, %v1802_v3  ;;  %s1857_s4 = sld [smem:[#allocation2 + $0x91]]  ;;  %s1859_s11 = sld [smem:[#allocation2 + $0x4]] }
  0x2e   :  { %v94_v24 = vstv %s1790_s17  ;;  %v71_v28 = vadd.f32 %v70_v18, %v67_v20  ;;  %v72_v29 = vadd.f32 %v70_v18, %v68_v21  ;;  %v134_v39 = vstv %s1818_s24  ;;  %s1863_s12 = sld [smem:[#allocation2 + $0xa1]]  ;;  %s1865_s13 = sld [smem:[#allocation2 + $0x5]] }
  0x2f   :  { %v100_v25 = vstv %s1796_s18  ;;  %v131_v40 = vadd.f32 %v129_v34, %v125_v32  ;;  %v132_v41 = vadd.f32 %v130_v35, %v126_v33  ;;  %v140_v42 = vstv %s1820_s25  ;;  %s1875_s14 = sld [smem:[#allocation2 + $0x22]]  ;;  %s1933_s1 = sld [smem:[#allocation2 + $0x6]] }
  0x30   :  { %v106_v26 = vstv %s1798_s19  ;;  %v73_v36 = vmax.f32 %v71_v28, 0.0  ;;  %v74_v37 = vmax.f32 %v72_v29, 0.0  ;;  %v146_v43 = vstv %s1826_s26  ;;  %s1877_s15 = sld [smem:[#allocation2 + $0x32]]  ;;  %s1935_s16 = sld [smem:[#allocation2 + $0x7]] }
  0x31   :  { %v112_v27 = vstv %s1804_s20  ;;  %v152_v51 = vstv %s1832_s27  ;;  %s1879_s5 = sld [smem:[#allocation2 + $0x42]]  ;;  %v135_v21 = vadd.f32 %v134_v39, %v131_v40  ;;  %s1947_s18 = sld [smem:[#allocation2 + $0x23]] }
  0x32   :  { %v118_v38 = vstv %s1806_s21  ;;  %v77_v44 = vmul.f32 %v76_v19, %v73_v36  ;;  %v78_v45 = vmul.f32 %v76_v19, %v74_v37  ;;  %v83_v46 = vmul.f32 %v82_v22, %v73_v36  ;;  %s1912_s6 = sld [smem:[#allocation2 + $0x52]]  ;;  %s1949_s19 = sld [smem:[#allocation2 + $0x33]] }
  0x33   :  { %v84_v47 = vmul.f32 %v82_v22, %v74_v37  ;;  %v89_v48 = vmul.f32 %v88_v23, %v73_v36  ;;  %v90_v49 = vmul.f32 %v88_v23, %v74_v37  ;;  %v95_v50 = vmul.f32 %v94_v24, %v73_v36  ;;  %s1918_s7 = sld [smem:[#allocation2 + $0x62]]  ;;  %s1951_s20 = sld [smem:[#allocation2 + $0x43]] }
  0x34   :  { %v79_v52 = vadd.f32 %v77_v44, %v44_v4  ;;  %v80_v53 = vadd.f32 %v78_v45, %v44_v4  ;;  %v85_v54 = vadd.f32 %v83_v46, %v46_v5  ;;  %v96_v55 = vmul.f32 %v94_v24, %v74_v37  ;;  %s1920_s8 = sld [smem:[#allocation2 + $0x72]]  ;;  %s1961_s21 = sld [smem:[#allocation2 + $0x53]] }
  0x35   :  { %v86_v56 = vadd.f32 %v84_v47, %v46_v5  ;;  %v91_v57 = vadd.f32 %v89_v48, %v48_v6  ;;  %v92_v58 = vadd.f32 %v90_v49, %v48_v6  ;;  %v97_v59 = vadd.f32 %v95_v50, %v50_v8  ;;  %s1923_s9 = sld [smem:[#allocation2 + $0x82]]  ;;  %s1963_s22 = sld [smem:[#allocation2 + $0x63]] }
  0x36   :  { %v101_v60 = vmul.f32 %v100_v25, %v73_v36  ;;  %v102_v61 = vmul.f32 %v100_v25, %v74_v37  ;;  %v107_v62 = vmul.f32 %v106_v26, %v73_v36  ;;  %v108_v63 = vmul.f32 %v106_v26, %v74_v37  ;;  %s1925_s10 = sld [smem:[#allocation2 + $0x92]]  ;;  %s1973_s23 = sld [smem:[#allocation2 + $0x73]] }
  0x37   :  { %v113_v4 = vmul.f32 %v112_v27, %v73_v36  ;;  %v114_v5 = vmul.f32 %v112_v27, %v74_v37  ;;  %v119_v6 = vmul.f32 %v118_v38, %v73_v36  ;;  %v120_v7 = vmul.f32 %v118_v38, %v74_v37  ;;  %s1945_s17 = sld [smem:[#allocation2 + $0xa2]]  ;;  %s1975_s24 = sld [smem:[#allocation2 + $0x83]] }
  0x38   :  { %v98_v9 = vadd.f32 %v96_v55, %v50_v8  ;;  %v103_v10 = vadd.f32 %v101_v60, %v52_v12  ;;  %v104_v11 = vadd.f32 %v102_v61, %v52_v12  ;;  %v109_v14 = vadd.f32 %v107_v62, %v54_v13  ;;  %s1987_s25 = sld [smem:[#allocation2 + $0x93]]  ;;  %s2015_s26 = sld [smem:[#allocation2 + $0x8]] }
  0x39   :  { %v110_v15 = vadd.f32 %v108_v63, %v54_v13  ;;  %v115_v18 = vadd.f32 %v113_v4, %v56_v16  ;;  %v116_v19 = vadd.f32 %v114_v5, %v56_v16  ;;  %v121_v20 = vadd.f32 %v119_v6, %v58_v17  ;;  %s2018_s27 = sld [smem:[#allocation2 + $0xa3]] }
  0x3a   :  { %v1899_v8 = vadd.f32 %v120_v7, %v58_v17  ;;  %v136_v22 = vadd.f32 %v134_v39, %v132_v41  ;;  %v158_v12 = vstv %s1850_s28  ;;  %v164_v23 = vstv %s1852_s30  ;;  %s2020_s28 = sld [smem:[#allocation2 + $0x9]]  ;;  %s2029_s30 = sld [smem:[#allocation2 + $0x24]] }
  0x3b   :  { %v170_v24 = vstv %s1854_s3  ;;  %v176_v13 = vstv %s1857_s4  ;;  %v188_v25 = vstv %s1859_s11  ;;  %v137_v26 = vmax.f32 %v135_v21, 0.0  ;;  %s2041_s3 = sld [smem:[#allocation2 + $0x34]] }
  0x3c   :  { %v138_v27 = vmax.f32 %v136_v22, 0.0  ;;  %v182_v28 = vstv %s1863_s12  ;;  %v189_v16 = vmul.f32 %v188_v25, %v1792_v0  ;;  %v190_v29 = vmul.f32 %v188_v25, %v1794_v1  ;;  %s2047_s4 = sld [smem:[#allocation2 + $0x44]] }
  0x3d   :  { %v192_v30 = vstv %s1865_s13  ;;  %v198_v17 = vstv %s1875_s14  ;;  %v204_v31 = vstv %s1877_s15  ;;  %v141_v32 = vmul.f32 %v140_v42, %v137_v26  ;;  %s2049_s11 = sld [smem:[#allocation2 + $0x54]] }
  0x3e   :  { %v142_v33 = vmul.f32 %v140_v42, %v138_v27  ;;  %v147_v34 = vmul.f32 %v146_v43, %v137_v26  ;;  %v148_v35 = vmul.f32 %v146_v43, %v138_v27  ;;  %v153_v36 = vmul.f32 %v152_v51, %v137_v26  ;;  %s2051_s12 = sld [smem:[#allocation2 + $0x64]] }
  0x3f   :  { %v154_v37 = vmul.f32 %v152_v51, %v138_v27  ;;  %v159_v38 = vmul.f32 %v158_v12, %v137_v26  ;;  %v210_v39 = vstv %s1879_s5  ;;  %v1927_v40 = vadd.f32 %v141_v32, %v79_v52  ;;  %s2053_s13 = sld [smem:[#allocation2 + $0x74]] }
  0x40   :  { %v1929_v41 = vadd.f32 %v142_v33, %v80_v53  ;;  %v1931_v42 = vadd.f32 %v147_v34, %v85_v54  ;;  %v160_v44 = vmul.f32 %v158_v12, %v138_v27  ;;  %v1937_v43 = vadd.f32 %v148_v35, %v86_v56  ;;  %s2058_s14 = sld [smem:[#allocation2 + $0x84]] }
  0x41   :  { %v1939_v45 = vadd.f32 %v153_v36, %v91_v57  ;;  %v1941_v46 = vadd.f32 %v154_v37, %v92_v58  ;;  %v1943_v47 = vadd.f32 %v159_v38, %v97_v59  ;;  %v165_v48 = vmul.f32 %v164_v23, %v137_v26  ;;  %s2060_s15 = sld [smem:[#allocation2 + $0x94]] }
  0x42   :  { %v166_v49 = vmul.f32 %v164_v23, %v138_v27  ;;  %v171_v50 = vmul.f32 %v170_v24, %v137_v26  ;;  %v172_v51 = vmul.f32 %v170_v24, %v138_v27  ;;  %v177_v52 = vmul.f32 %v176_v13, %v137_v26  ;;  %s2070_s5 = sld [smem:[#allocation2 + $0xa4]] }
  0x43   :  { %v178_v53 = vmul.f32 %v176_v13, %v138_v27  ;;  %v183_v54 = vmul.f32 %v182_v28, %v137_v26  ;;  %v184_v55 = vmul.f32 %v182_v28, %v138_v27  ;;  %v1953_v56 = vadd.f32 %v160_v44, %v98_v9 }
  0x44   :  { %v1955_v57 = vadd.f32 %v165_v48, %v103_v10  ;;  %v1957_v58 = vadd.f32 %v166_v49, %v104_v11  ;;  %v1959_v59 = vadd.f32 %v171_v50, %v109_v14  ;;  %v1965_v60 = vadd.f32 %v172_v51, %v110_v15 }
  0x45   :  { %v1967_v61 = vadd.f32 %v177_v52, %v115_v18  ;;  %v1969_v62 = vadd.f32 %v178_v53, %v116_v19  ;;  %v1971_v63 = vadd.f32 %v183_v54, %v121_v20  ;;  %v1978_v4 = vadd.f32 %v184_v55, %v1899_v8 }
  0x46   :  { %v193_v5 = vmul.f32 %v192_v30, %v1800_v2  ;;  %v194_v6 = vmul.f32 %v192_v30, %v1802_v3  ;;  %v216_v7 = vstv %s1912_s6  ;;  %v222_v9 = vstv %s1918_s7  ;;  %s2072_s6 = sld [smem:[#allocation2 + $0xa]]  ;;  %s2082_s7 = sld [smem:[#allocation2 + $0xb]] }
  0x47   :  { %v228_v10 = vstv %s1920_s8  ;;  %v234_v11 = vstv %s1923_s9  ;;  %v240_v14 = vstv %s1925_s10  ;;  %v252_v19 = vstv %s1933_s1  ;;  %s2084_s8 = sld [smem:[#allocation2 + $0x25]] }
  0x48   :  { %v195_v15 = vadd.f32 %v193_v5, %v189_v16  ;;  %v196_v18 = vadd.f32 %v194_v6, %v190_v29  ;;  %v256_v20 = vstv %s1935_s16  ;;  %v253_v8 = vmul.f32 %v252_v19, %v1792_v0  ;;  %s2098_s9 = sld [smem:[#allocation2 + $0x35]] }
  0x49   :  { %v254_v21 = vmul.f32 %v252_v19, %v1794_v1  ;;  %v257_v22 = vmul.f32 %v256_v20, %v1800_v2  ;;  %v258_v12 = vmul.f32 %v256_v20, %v1802_v3  ;;  %v246_v13 = vstv %s1945_s17  ;;  %s2100_s10 = sld [smem:[#allocation2 + $0x45]] }
  0x4a   :  { %v199_v23 = vadd.f32 %v198_v17, %v195_v15  ;;  %v200_v24 = vadd.f32 %v198_v17, %v196_v18  ;;  %v262_v25 = vstv %s1947_s18  ;;  %v268_v28 = vstv %s1949_s19  ;;  %s2110_s1 = sld [smem:[#allocation2 + $0x55]] }
  0x4b   :  { %v259_v26 = vadd.f32 %v257_v22, %v253_v8  ;;  %v260_v27 = vadd.f32 %v258_v12, %v254_v21  ;;  %v274_v16 = vstv %s1951_s20  ;;  %v280_v32 = vstv %s1961_s21  ;;  %s2112_s16 = sld [smem:[#allocation2 + $0x65]]  ;;  %s2153_s20 = sld [smem:[#allocation2 + $0xc]] }
  0x4c   :  { %v201_v29 = vmax.f32 %v199_v23, 0.0  ;;  %v202_v30 = vmax.f32 %v200_v24, 0.0  ;;  %v286_v33 = vstv %s1963_s22  ;;  %v292_v36 = vstv %s1973_s23  ;;  %s2122_s17 = sld [smem:[#allocation2 + $0x75]]  ;;  %s2163_s23 = sld [smem:[#allocation2 + $0x26]] }
  0x4d   :  { %v263_v34 = vadd.f32 %v262_v25, %v259_v26  ;;  %v264_v35 = vadd.f32 %v262_v25, %v260_v27  ;;  %v298_v37 = vstv %s1975_s24  ;;  %v304_v52 = vstv %s1987_s25  ;;  %s2124_s18 = sld [smem:[#allocation2 + $0x85]]  ;;  %s2165_s24 = sld [smem:[#allocation2 + $0x36]] }
  0x4e   :  { %v205_v17 = vmul.f32 %v204_v31, %v201_v29  ;;  %v206_v38 = vmul.f32 %v204_v31, %v202_v30  ;;  %v211_v44 = vmul.f32 %v210_v39, %v201_v29  ;;  %v212_v48 = vmul.f32 %v210_v39, %v202_v30  ;;  %s2135_s19 = sld [smem:[#allocation2 + $0x95]]  ;;  %s2171_s25 = sld [smem:[#allocation2 + $0x46]] }
  0x4f   :  { %v217_v49 = vmul.f32 %v216_v7, %v201_v29  ;;  %v218_v50 = vmul.f32 %v216_v7, %v202_v30  ;;  %v223_v51 = vmul.f32 %v222_v9, %v201_v29  ;;  %v224_v55 = vmul.f32 %v222_v9, %v202_v30  ;;  %s2156_s21 = sld [smem:[#allocation2 + $0xa5]] }
  0x50   :  { %v207_v53 = vadd.f32 %v205_v17, %v1927_v40  ;;  %v208_v54 = vadd.f32 %v206_v38, %v1929_v41  ;;  %v213_v31 = vadd.f32 %v211_v44, %v1931_v42  ;;  %v214_v5 = vadd.f32 %v212_v48, %v1937_v43  ;;  %s2158_s22 = sld [smem:[#allocation2 + $0xd]] }
  0x51   :  { %v219_v39 = vadd.f32 %v217_v49, %v1939_v45  ;;  %v220_v6 = vadd.f32 %v218_v50, %v1941_v46  ;;  %v225_v7 = vadd.f32 %v223_v51, %v1943_v47  ;;  %v229_v15 = vmul.f32 %v228_v10, %v201_v29 }
  0x52   :  { %v230_v18 = vmul.f32 %v228_v10, %v202_v30  ;;  %v235_v19 = vmul.f32 %v234_v11, %v201_v29  ;;  %v236_v20 = vmul.f32 %v234_v11, %v202_v30  ;;  %v241_v40 = vmul.f32 %v240_v14, %v201_v29 }
  0x53   :  { %v242_v41 = vmul.f32 %v240_v14, %v202_v30  ;;  %v247_v42 = vmul.f32 %v246_v13, %v201_v29  ;;  %v248_v9 = vmul.f32 %v246_v13, %v202_v30  ;;  %v226_v43 = vadd.f32 %v224_v55, %v1953_v56 }
  0x54   :  { %v231_v45 = vadd.f32 %v229_v15, %v1955_v57  ;;  %v232_v46 = vadd.f32 %v230_v18, %v1957_v58  ;;  %v237_v47 = vadd.f32 %v235_v19, %v1959_v59  ;;  %v238_v8 = vadd.f32 %v236_v20, %v1965_v60 }
  0x55   :  { %v243_v10 = vadd.f32 %v241_v40, %v1967_v61  ;;  %v244_v11 = vadd.f32 %v242_v41, %v1969_v62  ;;  %v249_v14 = vadd.f32 %v247_v42, %v1971_v63  ;;  %v250_v21 = vadd.f32 %v248_v9, %v1978_v4 }
  0x56   :  { %v265_v22 = vmax.f32 %v263_v34, 0.0  ;;  %v266_v12 = vmax.f32 %v264_v35, 0.0  ;;  %v316_v56 = vstv %s2015_s26  ;;  %v310_v57 = vstv %s2018_s27  ;;  %s2173_s26 = sld [smem:[#allocation2 + $0x56]] }
  0x57   :  { %v317_v58 = vmul.f32 %v316_v56, %v1792_v0  ;;  %v318_v59 = vmul.f32 %v316_v56, %v1794_v1  ;;  %v320_v60 = vstv %s2020_s28  ;;  %v326_v25 = vstv %s2029_s30  ;;  %s2175_s27 = sld [smem:[#allocation2 + $0x66]] }
  0x58   :  { %v269_v61 = vmul.f32 %v268_v28, %v265_v22  ;;  %v270_v62 = vmul.f32 %v268_v28, %v266_v12  ;;  %v275_v63 = vmul.f32 %v274_v16, %v265_v22  ;;  %v276_v4 = vmul.f32 %v274_v16, %v266_v12  ;;  %s2197_s28 = sld [smem:[#allocation2 + $0x76]] }
  0x59   :  { %v281_v23 = vmul.f32 %v280_v32, %v265_v22  ;;  %v282_v24 = vmul.f32 %v280_v32, %v266_v12  ;;  %v287_v13 = vmul.f32 %v286_v33, %v265_v22  ;;  %v288_v16 = vmul.f32 %v286_v33, %v266_v12  ;;  %s2207_s30 = sld [smem:[#allocation2 + $0x86]] }
  0x5a   :  { %v2062_v26 = vadd.f32 %v269_v61, %v207_v53  ;;  %v2064_v27 = vadd.f32 %v270_v62, %v208_v54  ;;  %v2066_v28 = vadd.f32 %v275_v63, %v213_v31  ;;  %v2074_v29 = vadd.f32 %v276_v4, %v214_v5 }
  0x5b   :  { %v2076_v30 = vadd.f32 %v281_v23, %v219_v39  ;;  %v2078_v32 = vadd.f32 %v282_v24, %v220_v6  ;;  %v2080_v34 = vadd.f32 %v287_v13, %v225_v7  ;;  %v293_v35 = vmul.f32 %v292_v36, %v265_v22 }
  0x5c   :  { %v294_v33 = vmul.f32 %v292_v36, %v266_v12  ;;  %v299_v17 = vmul.f32 %v298_v37, %v265_v22  ;;  %v300_v38 = vmul.f32 %v298_v37, %v266_v12  ;;  %v305_v44 = vmul.f32 %v304_v52, %v265_v22 }
  0x5d   :  { %v306_v48 = vmul.f32 %v304_v52, %v266_v12  ;;  %v311_v49 = vmul.f32 %v310_v57, %v265_v22  ;;  %v312_v50 = vmul.f32 %v310_v57, %v266_v12  ;;  %v2102_v51 = vadd.f32 %v288_v16, %v226_v43 }
  0x5e   :  { %v2104_v53 = vadd.f32 %v293_v35, %v231_v45  ;;  %v2106_v36 = vadd.f32 %v294_v33, %v232_v46  ;;  %v2108_v37 = vadd.f32 %v299_v17, %v237_v47  ;;  %v2114_v52 = vadd.f32 %v300_v38, %v238_v8 }
  0x5f   :  { %v2116_v54 = vadd.f32 %v305_v44, %v243_v10  ;;  %v2118_v31 = vadd.f32 %v306_v48, %v244_v11  ;;  %v2120_v55 = vadd.f32 %v311_v49, %v249_v14  ;;  %v2126_v5 = vadd.f32 %v312_v50, %v250_v21 }
  0x60   :  { %v321_v39 = vmul.f32 %v320_v60, %v1800_v2  ;;  %v322_v6 = vmul.f32 %v320_v60, %v1802_v3  ;;  %v332_v7 = vstv %s2041_s3  ;;  %v338_v15 = vstv %s2047_s4  ;;  %s2209_s3 = sld [smem:[#allocation2 + $0x96]] }
  0x61   :  { %v344_v18 = vstv %s2049_s11  ;;  %v350_v19 = vstv %s2051_s12  ;;  %v356_v20 = vstv %s2053_s13  ;;  %v362_v42 = vstv %s2058_s14  ;;  %s2218_s4 = sld [smem:[#allocation2 + $0xe]]  ;;  %s2220_s11 = sld [smem:[#allocation2 + $0xf]] }
  0x62   :  { %v323_v40 = vadd.f32 %v321_v39, %v317_v58  ;;  %v324_v41 = vadd.f32 %v322_v6, %v318_v59  ;;  %v368_v9 = vstv %s2060_s15  ;;  %v374_v43 = vstv %s2070_s5  ;;  %s2238_s12 = sld [smem:[#allocation2 + $0xa6]]  ;;  %s2240_s13 = sld [smem:[#allocation2 + $0x27]] }
  0x63   :  { %v380_v45 = vstv %s2072_s6  ;;  %v384_v46 = vstv %s2082_s7  ;;  %v390_v47 = vstv %s2084_s8  ;;  %v396_v12 = vstv %s2098_s9  ;;  %s2250_s14 = sld [smem:[#allocation2 + $0x37]] }
  0x64   :  { %v327_v8 = vadd.f32 %v326_v25, %v323_v40  ;;  %v328_v10 = vadd.f32 %v326_v25, %v324_v41  ;;  %v381_v11 = vmul.f32 %v380_v45, %v1792_v0  ;;  %v382_v14 = vmul.f32 %v380_v45, %v1794_v1  ;;  %s2252_s15 = sld [smem:[#allocation2 + $0x47]] }
  0x65   :  { %v385_v21 = vmul.f32 %v384_v46, %v1800_v2  ;;  %v386_v22 = vmul.f32 %v384_v46, %v1802_v3  ;;  %v402_v56 = vstv %s2100_s10  ;;  %v408_v59 = vstv %s2110_s1  ;;  %s2258_s5 = sld [smem:[#allocation2 + $0x57]]  ;;  %s2318_s1 = sld [smem:[#allocation2 + $0x10]] }
  0x66   :  { %v329_v57 = vmax.f32 %v327_v8, 0.0  ;;  %v330_v58 = vmax.f32 %v328_v10, 0.0  ;;  %v414_v60 = vstv %s2112_s16  ;;  %v420_v63 = vstv %s2122_s17  ;;  %s2260_s6 = sld [smem:[#allocation2 + $0x67]]  ;;  %s2320_s16 = sld [smem:[#allocation2 + $0x11]] }
  0x67   :  { %v387_v61 = vadd.f32 %v385_v21, %v381_v11  ;;  %v388_v62 = vadd.f32 %v386_v22, %v382_v14  ;;  %v426_v4 = vstv %s2124_s18  ;;  %v432_v17 = vstv %s2135_s19  ;;  %s2278_s7 = sld [smem:[#allocation2 + $0x77]]  ;;  %s2327_s17 = sld [smem:[#allocation2 + $0x28]] }
  0x68   :  { %v333_v23 = vmul.f32 %v332_v7, %v329_v57  ;;  %v334_v24 = vmul.f32 %v332_v7, %v330_v58  ;;  %v339_v13 = vmul.f32 %v338_v15, %v329_v57  ;;  %v340_v25 = vmul.f32 %v338_v15, %v330_v58  ;;  %s2297_s8 = sld [smem:[#allocation2 + $0x87]]  ;;  %s2333_s18 = sld [smem:[#allocation2 + $0x38]] }
  0x69   :  { %v345_v16 = vmul.f32 %v344_v18, %v329_v57  ;;  %v346_v35 = vmul.f32 %v344_v18, %v330_v58  ;;  %v351_v33 = vmul.f32 %v350_v19, %v329_v57  ;;  %v352_v49 = vmul.f32 %v350_v19, %v330_v58  ;;  %s2307_s9 = sld [smem:[#allocation2 + $0x97]]  ;;  %s2335_s19 = sld [smem:[#allocation2 + $0x48]] }
  0x6a   :  { %v335_v38 = vadd.f32 %v333_v23, %v2062_v26  ;;  %v336_v44 = vadd.f32 %v334_v24, %v2064_v27  ;;  %v341_v48 = vadd.f32 %v339_v13, %v2066_v28  ;;  %v342_v50 = vadd.f32 %v340_v25, %v2074_v29  ;;  %s2309_s10 = sld [smem:[#allocation2 + $0xa7]] }
  0x6b   :  { %v347_v39 = vadd.f32 %v345_v16, %v2076_v30  ;;  %v348_v6 = vadd.f32 %v346_v35, %v2078_v32  ;;  %v353_v7 = vadd.f32 %v351_v33, %v2080_v34  ;;  %v357_v26 = vmul.f32 %v356_v20, %v329_v57 }
  0x6c   :  { %v358_v27 = vmul.f32 %v356_v20, %v330_v58  ;;  %v363_v28 = vmul.f32 %v362_v42, %v329_v57  ;;  %v364_v15 = vmul.f32 %v362_v42, %v330_v58  ;;  %v369_v18 = vmul.f32 %v368_v9, %v329_v57 }
  0x6d   :  { %v370_v19 = vmul.f32 %v368_v9, %v330_v58  ;;  %v375_v40 = vmul.f32 %v374_v43, %v329_v57  ;;  %v376_v29 = vmul.f32 %v374_v43, %v330_v58  ;;  %v354_v30 = vadd.f32 %v352_v49, %v2102_v51 }
  0x6e   :  { %v359_v32 = vadd.f32 %v357_v26, %v2104_v53  ;;  %v360_v34 = vadd.f32 %v358_v27, %v2106_v36  ;;  %v365_v41 = vadd.f32 %v363_v28, %v2108_v37  ;;  %v366_v20 = vadd.f32 %v364_v15, %v2114_v52 }
  0x6f   :  { %v371_v42 = vadd.f32 %v369_v18, %v2116_v54  ;;  %v372_v9 = vadd.f32 %v370_v19, %v2118_v31  ;;  %v377_v43 = vadd.f32 %v375_v40, %v2120_v55  ;;  %v378_v51 = vadd.f32 %v376_v29, %v2126_v5 }
  0x70   :  { %v391_v45 = vadd.f32 %v390_v47, %v387_v61  ;;  %v392_v53 = vadd.f32 %v390_v47, %v388_v62  ;;  %v444_v36 = vstv %s2153_s20  ;;  %v438_v37 = vstv %s2156_s21  ;;  %s2357_s20 = sld [smem:[#allocation2 + $0x58]] }
  0x71   :  { %v445_v52 = vmul.f32 %v444_v36, %v1792_v0  ;;  %v446_v54 = vmul.f32 %v444_v36, %v1794_v1  ;;  %v448_v46 = vstv %s2158_s22  ;;  %v454_v8 = vstv %s2163_s23  ;;  %s2367_s21 = sld [smem:[#allocation2 + $0x68]] }
  0x72   :  { %v393_v31 = vmax.f32 %v391_v45, 0.0  ;;  %v394_v55 = vmax.f32 %v392_v53, 0.0  ;;  %v449_v5 = vmul.f32 %v448_v46, %v1800_v2  ;;  %v450_v47 = vmul.f32 %v448_v46, %v1802_v3  ;;  %s2369_s22 = sld [smem:[#allocation2 + $0x78]] }
  0x73   :  { %v460_v10 = vstv %s2165_s24  ;;  %v466_v11 = vstv %s2171_s25  ;;  %v472_v14 = vstv %s2173_s26  ;;  %v478_v24 = vstv %s2175_s27  ;;  %s2378_s23 = sld [smem:[#allocation2 + $0x88]]  ;;  %s2390_s25 = sld [smem:[#allocation2 + $0x12]] }
  0x74   :  { %v397_v21 = vmul.f32 %v396_v12, %v393_v31  ;;  %v398_v22 = vmul.f32 %v396_v12, %v394_v55  ;;  %v403_v57 = vmul.f32 %v402_v56, %v393_v31  ;;  %v404_v58 = vmul.f32 %v402_v56, %v394_v55  ;;  %s2380_s24 = sld [smem:[#allocation2 + $0x98]]  ;;  %s2392_s26 = sld [smem:[#allocation2 + $0x13]] }
  0x75   :  { %v409_v61 = vmul.f32 %v408_v59, %v393_v31  ;;  %v410_v62 = vmul.f32 %v408_v59, %v394_v55  ;;  %v415_v23 = vmul.f32 %v414_v60, %v393_v31  ;;  %v416_v59 = vmul.f32 %v414_v60, %v394_v55  ;;  %s2406_s27 = sld [smem:[#allocation2 + $0xa8]] }
  0x76   :  { %v2222_v12 = vadd.f32 %v397_v21, %v335_v38  ;;  %v2224_v56 = vadd.f32 %v398_v22, %v336_v44  ;;  %v2226_v13 = vadd.f32 %v403_v57, %v341_v48  ;;  %v2230_v25 = vadd.f32 %v404_v58, %v342_v50 }
  0x77   :  { %v2232_v16 = vadd.f32 %v409_v61, %v347_v39  ;;  %v2234_v35 = vadd.f32 %v410_v62, %v348_v6  ;;  %v2236_v33 = vadd.f32 %v415_v23, %v353_v7  ;;  %v421_v38 = vmul.f32 %v420_v63, %v393_v31 }
  0x78   :  { %v422_v44 = vmul.f32 %v420_v63, %v394_v55  ;;  %v427_v48 = vmul.f32 %v426_v4, %v393_v31  ;;  %v428_v60 = vmul.f32 %v426_v4, %v394_v55  ;;  %v433_v49 = vmul.f32 %v432_v17, %v393_v31 }
  0x79   :  { %v434_v50 = vmul.f32 %v432_v17, %v394_v55  ;;  %v439_v39 = vmul.f32 %v438_v37, %v393_v31  ;;  %v440_v6 = vmul.f32 %v438_v37, %v394_v55  ;;  %v2262_v63 = vadd.f32 %v416_v59, %v354_v30 }
  0x7a   :  { %v2264_v4 = vadd.f32 %v421_v38, %v359_v32  ;;  %v2266_v7 = vadd.f32 %v422_v44, %v360_v34  ;;  %v2268_v26 = vadd.f32 %v427_v48, %v365_v41  ;;  %v2270_v17 = vadd.f32 %v428_v60, %v366_v20 }
  0x7b   :  { %v2272_v27 = vadd.f32 %v433_v49, %v371_v42  ;;  %v2274_v28 = vadd.f32 %v434_v50, %v372_v9  ;;  %v2276_v15 = vadd.f32 %v439_v39, %v377_v43  ;;  %v2280_v18 = vadd.f32 %v440_v6, %v378_v51 }
  0x7c   :  { %v451_v19 = vadd.f32 %v449_v5, %v445_v52  ;;  %v452_v40 = vadd.f32 %v450_v47, %v446_v54  ;;  %v484_v29 = vstv %s2197_s28  ;;  %v490_v30 = vstv %s2207_s30  ;;  %s2408_s28 = sld [smem:[#allocation2 + $0x29]] }
  0x7d   :  { %v496_v32 = vstv %s2209_s3  ;;  %v508_v34 = vstv %s2218_s4  ;;  %v512_v41 = vstv %s2220_s11  ;;  %v502_v51 = vstv %s2238_s12  ;;  %s2410_s30 = sld [smem:[#allocation2 + $0x39]] }
  0x7e   :  { %v455_v20 = vadd.f32 %v454_v8, %v451_v19  ;;  %v456_v42 = vadd.f32 %v454_v8, %v452_v40  ;;  %v509_v9 = vmul.f32 %v508_v34, %v1792_v0  ;;  %v510_v43 = vmul.f32 %v508_v34, %v1794_v1  ;;  %s2412_s3 = sld [smem:[#allocation2 + $0x49]] }
  0x7f   :  { %v513_v45 = vmul.f32 %v512_v41, %v1800_v2  ;;  %v514_v53 = vmul.f32 %v512_v41, %v1802_v3  ;;  %v518_v36 = vstv %s2240_s13  ;;  %v524_v54 = vstv %s2250_s14  ;;  %s2430_s4 = sld [smem:[#allocation2 + $0x59]] }
  0x80   :  { %v457_v37 = vmax.f32 %v455_v20, 0.0  ;;  %v458_v52 = vmax.f32 %v456_v42, 0.0  ;;  %v530_v46 = vstv %s2252_s15  ;;  %v536_v5 = vstv %s2258_s5  ;;  %s2457_s11 = sld [smem:[#allocation2 + $0x69]]  ;;  %s2474_s15 = sld [smem:[#allocation2 + $0x14]] }
  0x81   :  { %v515_v31 = vadd.f32 %v513_v45, %v509_v9  ;;  %v516_v55 = vadd.f32 %v514_v53, %v510_v43  ;;  %v542_v8 = vstv %s2260_s6  ;;  %v548_v23 = vstv %s2278_s7  ;;  %s2467_s12 = sld [smem:[#allocation2 + $0x79]]  ;;  %s2481_s6 = sld [smem:[#allocation2 + $0x15]] }
  0x82   :  { %v461_v47 = vmul.f32 %v460_v10, %v457_v37  ;;  %v462_v21 = vmul.f32 %v460_v10, %v458_v52  ;;  %v467_v22 = vmul.f32 %v466_v11, %v457_v37  ;;  %v468_v57 = vmul.f32 %v466_v11, %v458_v52  ;;  %s2469_s13 = sld [smem:[#allocation2 + $0x89]]  ;;  %s2487_s7 = sld [smem:[#allocation2 + $0x2a]] }
  0x83   :  { %v473_v58 = vmul.f32 %v472_v14, %v457_v37  ;;  %v474_v61 = vmul.f32 %v472_v14, %v458_v52  ;;  %v479_v62 = vmul.f32 %v478_v24, %v457_v37  ;;  %v480_v38 = vmul.f32 %v478_v24, %v458_v52  ;;  %s2472_s14 = sld [smem:[#allocation2 + $0x99]] }
  0x84   :  { %v463_v10 = vadd.f32 %v461_v47, %v2222_v12  ;;  %v464_v59 = vadd.f32 %v462_v21, %v2224_v56  ;;  %v469_v11 = vadd.f32 %v467_v22, %v2226_v13  ;;  %v470_v44 = vadd.f32 %v468_v57, %v2230_v25  ;;  %s2479_s5 = sld [smem:[#allocation2 + $0xa9]] }
  0x85   :  { %v475_v14 = vadd.f32 %v473_v58, %v2232_v16  ;;  %v476_v48 = vadd.f32 %v474_v61, %v2234_v35  ;;  %v481_v60 = vadd.f32 %v479_v62, %v2236_v33  ;;  %v485_v49 = vmul.f32 %v484_v29, %v457_v37 }
  0x86   :  { %v486_v12 = vmul.f32 %v484_v29, %v458_v52  ;;  %v491_v50 = vmul.f32 %v490_v30, %v457_v37  ;;  %v492_v56 = vmul.f32 %v490_v30, %v458_v52  ;;  %v497_v39 = vmul.f32 %v496_v32, %v457_v37 }
  0x87   :  { %v498_v13 = vmul.f32 %v496_v32, %v458_v52  ;;  %v503_v24 = vmul.f32 %v502_v51, %v457_v37  ;;  %v504_v6 = vmul.f32 %v502_v51, %v458_v52  ;;  %v482_v25 = vadd.f32 %v480_v38, %v2262_v63 }
  0x88   :  { %v487_v16 = vadd.f32 %v485_v49, %v2264_v4  ;;  %v488_v35 = vadd.f32 %v486_v12, %v2266_v7  ;;  %v493_v33 = vadd.f32 %v491_v50, %v2268_v26  ;;  %v494_v19 = vadd.f32 %v492_v56, %v2270_v17 }
  0x89   :  { %v499_v40 = vadd.f32 %v497_v39, %v2272_v27  ;;  %v500_v29 = vadd.f32 %v498_v13, %v2274_v28  ;;  %v505_v30 = vadd.f32 %v503_v24, %v2276_v15  ;;  %v506_v32 = vadd.f32 %v504_v6, %v2280_v18 }
  0x8a   :  { %v519_v34 = vadd.f32 %v518_v36, %v515_v31  ;;  %v520_v63 = vadd.f32 %v518_v36, %v516_v55  ;;  %v554_v4 = vstv %s2297_s8  ;;  %v560_v7 = vstv %s2307_s9  ;;  %s2489_s8 = sld [smem:[#allocation2 + $0x3a]] }
  0x8b   :  { %v566_v26 = vstv %s2309_s10  ;;  %v572_v41 = vstv %s2318_s1  ;;  %v576_v17 = vstv %s2320_s16  ;;  %v582_v18 = vstv %s2327_s17  ;;  %s2491_s9 = sld [smem:[#allocation2 + $0x4a]] }
  0x8c   :  { %v521_v27 = vmax.f32 %v519_v34, 0.0  ;;  %v522_v28 = vmax.f32 %v520_v63, 0.0  ;;  %v573_v15 = vmul.f32 %v572_v41, %v1792_v0  ;;  %v574_v20 = vmul.f32 %v572_v41, %v1794_v1  ;;  %v2450_v63 = vld [vmem:[#allocation6 + $0x18] sm:$0xff]  ;;  %s2515_s10 = sld [smem:[#allocation2 + $0x5a]] }
  0x8d   :  { %v577_v42 = vmul.f32 %v576_v17, %v1800_v2  ;;  %v578_v9 = vmul.f32 %v576_v17, %v1802_v3  ;;  %v588_v43 = vstv %s2333_s18  ;;  %v594_v36 = vstv %s2335_s19  ;;  %s2521_s1 = sld [smem:[#allocation2 + $0x6a]]  ;;  %s2536_s19 = sld [smem:[#allocation2 + $0x16]] }
  0x8e   :  { %v525_v51 = vmul.f32 %v524_v54, %v521_v27  ;;  %v526_v45 = vmul.f32 %v524_v54, %v522_v28  ;;  %v531_v53 = vmul.f32 %v530_v46, %v521_v27  ;;  %v532_v0 = vmul.f32 %v530_v46, %v522_v28  ;;  %s2523_s16 = sld [smem:[#allocation2 + $0x7a]] }
  0x8f   :  { %v537_v1 = vmul.f32 %v536_v5, %v521_v27  ;;  %v538_v2 = vmul.f32 %v536_v5, %v522_v28  ;;  %v543_v3 = vmul.f32 %v542_v8, %v521_v27  ;;  %v544_v46 = vmul.f32 %v542_v8, %v522_v28  ;;  %s2526_s17 = sld [smem:[#allocation2 + $0x8a]] }
  0x90   :  { %v2382_v37 = vadd.f32 %v525_v51, %v463_v10  ;;  %v2384_v52 = vadd.f32 %v526_v45, %v464_v59  ;;  %v2386_v54 = vadd.f32 %v531_v53, %v469_v11  ;;  %v2394_v31 = vadd.f32 %v532_v0, %v470_v44  ;;  %s2528_s18 = sld [smem:[#allocation2 + $0x9a]] }
  0x91   :  { %v2396_v55 = vadd.f32 %v537_v1, %v475_v14  ;;  %v2398_v5 = vadd.f32 %v538_v2, %v476_v48  ;;  %v2400_v47 = vadd.f32 %v543_v3, %v481_v60  ;;  %v549_v21 = vmul.f32 %v548_v23, %v521_v27 }
  0x92   :  { %v550_v22 = vmul.f32 %v548_v23, %v522_v28  ;;  %v555_v57 = vmul.f32 %v554_v4, %v521_v27  ;;  %v556_v58 = vmul.f32 %v554_v4, %v522_v28  ;;  %v561_v8 = vmul.f32 %v560_v7, %v521_v27 }
  0x93   :  { %v562_v61 = vmul.f32 %v560_v7, %v522_v28  ;;  %v567_v62 = vmul.f32 %v566_v26, %v521_v27  ;;  %v568_v10 = vmul.f32 %v566_v26, %v522_v28  ;;  %v2414_v59 = vadd.f32 %v544_v46, %v482_v25 }
  0x94   :  { %v2416_v23 = vadd.f32 %v549_v21, %v487_v16  ;;  %v2418_v11 = vadd.f32 %v550_v22, %v488_v35  ;;  %v2420_v38 = vadd.f32 %v555_v57, %v493_v33  ;;  %v2422_v44 = vadd.f32 %v556_v58, %v494_v19  ;;  %v2441_v19 = vld [vmem:[#allocation6] sm:$0xff] }
  0x95   :  { %v2424_v14 = vadd.f32 %v561_v8, %v499_v40  ;;  %v2426_v48 = vadd.f32 %v562_v61, %v500_v29  ;;  %v2428_v60 = vadd.f32 %v567_v62, %v505_v30  ;;  %v2432_v49 = vadd.f32 %v568_v10, %v506_v32  ;;  %v2444_v29 = vld [vmem:[#allocation6 + $0x8] sm:$0xff]  ;;  %v2447_v32 = vld [vmem:[#allocation6 + $0x10] sm:$0xff] }
  0x96   :  { %v579_v12 = vadd.f32 %v577_v42, %v573_v15  ;;  %v580_v50 = vadd.f32 %v578_v9, %v574_v20  ;;  %v600_v56 = vstv %s2357_s20  ;;  %v606_v39 = vstv %s2367_s21  ;;  %s2538_s20 = sld [smem:[#allocation2 + $0x17]]  ;;  %s2548_s21 = sld [smem:[#allocation2 + $0xaa]] }
  0x97   :  { %v612_v13 = vstv %s2369_s22  ;;  %v618_v24 = vstv %s2378_s23  ;;  %v624_v6 = vstv %s2380_s24  ;;  %v636_v35 = vstv %s2390_s25  ;;  %s2550_s22 = sld [smem:[#allocation2 + $0x2b]] }
  0x98   :  { %v583_v25 = vadd.f32 %v582_v18, %v579_v12  ;;  %v584_v16 = vadd.f32 %v582_v18, %v580_v50  ;;  %v640_v33 = vstv %s2392_s26  ;;  %v637_v40 = vmul.f32 %v2441_v19, %v636_v35  ;;  %s2552_s23 = sld [smem:[#allocation2 + $0x3b]] }
  0x99   :  { %v638_v30 = vmul.f32 %v2444_v29, %v636_v35  ;;  %v641_v34 = vmul.f32 %v2447_v32, %v640_v33  ;;  %v642_v4 = vmul.f32 %v2450_v63, %v640_v33  ;;  %v630_v41 = vstv %s2406_s27  ;;  %s2554_s24 = sld [smem:[#allocation2 + $0x4b]] }
  0x9a   :  { %v585_v7 = vmax.f32 %v583_v25, 0.0  ;;  %v586_v26 = vmax.f32 %v584_v16, 0.0  ;;  %v646_v17 = vstv %s2408_s28  ;;  %v652_v15 = vstv %s2410_s30  ;;  %s2564_s25 = sld [smem:[#allocation2 + $0x5b]] }
  0x9b   :  { %v643_v27 = vadd.f32 %v641_v34, %v637_v40  ;;  %v644_v28 = vadd.f32 %v642_v4, %v638_v30  ;;  %v658_v18 = vstv %s2412_s3  ;;  %v664_v1 = vstv %s2430_s4  ;;  %s2566_s26 = sld [smem:[#allocation2 + $0x6b]]  ;;  %s2618_s3 = sld [smem:[#allocation2 + $0x18]] }
  0x9c   :  { %v589_v20 = vmul.f32 %v588_v43, %v585_v7  ;;  %v590_v42 = vmul.f32 %v588_v43, %v586_v26  ;;  %v595_v9 = vmul.f32 %v594_v36, %v585_v7  ;;  %v596_v51 = vmul.f32 %v594_v36, %v586_v26  ;;  %s2576_s27 = sld [smem:[#allocation2 + $0x7b]] }
  0x9d   :  { %v601_v45 = vmul.f32 %v600_v56, %v585_v7  ;;  %v602_v53 = vmul.f32 %v600_v56, %v586_v26  ;;  %v607_v0 = vmul.f32 %v606_v39, %v585_v7  ;;  %v608_v46 = vmul.f32 %v606_v39, %v586_v26  ;;  %s2578_s28 = sld [smem:[#allocation2 + $0x8b]] }
  0x9e   :  { %v591_v2 = vadd.f32 %v589_v20, %v2382_v37  ;;  %v592_v43 = vadd.f32 %v590_v42, %v2384_v52  ;;  %v597_v3 = vadd.f32 %v595_v9, %v2386_v54  ;;  %v598_v36 = vadd.f32 %v596_v51, %v2394_v31  ;;  %s2590_s30 = sld [smem:[#allocation2 + $0x9b]] }
  0x9f   :  { %v603_v21 = vadd.f32 %v601_v45, %v2396_v55  ;;  %v604_v22 = vadd.f32 %v602_v53, %v2398_v5  ;;  %v609_v57 = vadd.f32 %v607_v0, %v2400_v47  ;;  %v613_v37 = vmul.f32 %v612_v13, %v585_v7  ;;  %s2621_s4 = sld [smem:[#allocation2 + $0xab]] }
  0xa0   :  { %v614_v52 = vmul.f32 %v612_v13, %v586_v26  ;;  %v619_v54 = vmul.f32 %v618_v24, %v585_v7  ;;  %v620_v58 = vmul.f32 %v618_v24, %v586_v26  ;;  %v625_v8 = vmul.f32 %v624_v6, %v585_v7 }
  0xa1   :  { %v626_v61 = vmul.f32 %v624_v6, %v586_v26  ;;  %v631_v62 = vmul.f32 %v630_v41, %v585_v7  ;;  %v632_v31 = vmul.f32 %v630_v41, %v586_v26  ;;  %v610_v55 = vadd.f32 %v608_v46, %v2414_v59 }
  0xa2   :  { %v615_v5 = vadd.f32 %v613_v37, %v2416_v23  ;;  %v616_v47 = vadd.f32 %v614_v52, %v2418_v11  ;;  %v621_v10 = vadd.f32 %v619_v54, %v2420_v38  ;;  %v622_v12 = vadd.f32 %v620_v58, %v2422_v44 }
  0xa3   :  { %v627_v50 = vadd.f32 %v625_v8, %v2424_v14  ;;  %v628_v56 = vadd.f32 %v626_v61, %v2426_v48  ;;  %v633_v39 = vadd.f32 %v631_v62, %v2428_v60  ;;  %v2502_v59 = vadd.f32 %v632_v31, %v2432_v49 }
  0xa4   :  { %v647_v23 = vadd.f32 %v646_v17, %v643_v27  ;;  %v648_v13 = vadd.f32 %v646_v17, %v644_v28  ;;  %v670_v11 = vstv %s2457_s11  ;;  %v676_v24 = vstv %s2467_s12  ;;  %s2623_s11 = sld [smem:[#allocation2 + $0x19]]  ;;  %s2632_s12 = sld [smem:[#allocation2 + $0x2c]] }
  0xa5   :  { %v682_v38 = vstv %s2469_s13  ;;  %v688_v44 = vstv %s2472_s14  ;;  %v700_v6 = vstv %s2474_s15  ;;  %v694_v16 = vstv %s2479_s5  ;;  %s2644_s13 = sld [smem:[#allocation2 + $0x3c]] }
  0xa6   :  { %v649_v14 = vmax.f32 %v647_v23, 0.0  ;;  %v650_v25 = vmax.f32 %v648_v13, 0.0  ;;  %v701_v48 = vmul.f32 %v2441_v19, %v700_v6  ;;  %v702_v60 = vmul.f32 %v2444_v29, %v700_v6  ;;  %s2650_s14 = sld [smem:[#allocation2 + $0x4c]] }
  0xa7   :  { %v704_v35 = vstv %s2481_s6  ;;  %v710_v49 = vstv %s2487_s7  ;;  %v716_v33 = vstv %s2489_s8  ;;  %v722_v17 = vstv %s2491_s9  ;;  %s2652_s15 = sld [smem:[#allocation2 + $0x5c]] }
  0xa8   :  { %v653_v40 = vmul.f32 %v652_v15, %v649_v14  ;;  %v654_v30 = vmul.f32 %v652_v15, %v650_v25  ;;  %v659_v34 = vmul.f32 %v658_v18, %v649_v14  ;;  %v660_v4 = vmul.f32 %v658_v18, %v650_v25  ;;  %s2654_s5 = sld [smem:[#allocation2 + $0x6c]] }
  0xa9   :  { %v665_v7 = vmul.f32 %v664_v1, %v649_v14  ;;  %v666_v26 = vmul.f32 %v664_v1, %v650_v25  ;;  %v671_v41 = vmul.f32 %v670_v11, %v649_v14  ;;  %v672_v20 = vmul.f32 %v670_v11, %v650_v25  ;;  %s2656_s6 = sld [smem:[#allocation2 + $0x7c]] }
  0xaa   :  { %v2530_v27 = vadd.f32 %v653_v40, %v591_v2  ;;  %v2532_v28 = vadd.f32 %v654_v30, %v592_v43  ;;  %v2534_v15 = vadd.f32 %v659_v34, %v597_v3  ;;  %v2540_v18 = vadd.f32 %v660_v4, %v598_v36  ;;  %s2661_s7 = sld [smem:[#allocation2 + $0x8c]] }
  0xab   :  { %v2542_v42 = vadd.f32 %v665_v7, %v603_v21  ;;  %v2544_v9 = vadd.f32 %v666_v26, %v604_v22  ;;  %v2546_v51 = vadd.f32 %v671_v41, %v609_v57  ;;  %v677_v45 = vmul.f32 %v676_v24, %v649_v14  ;;  %s2663_s8 = sld [smem:[#allocation2 + $0x9c]] }
  0xac   :  { %v678_v53 = vmul.f32 %v676_v24, %v650_v25  ;;  %v683_v0 = vmul.f32 %v682_v38, %v649_v14  ;;  %v684_v1 = vmul.f32 %v682_v38, %v650_v25  ;;  %v689_v2 = vmul.f32 %v688_v44, %v649_v14  ;;  %s2673_s9 = sld [smem:[#allocation2 + $0xac]] }
  0xad   :  { %v690_v43 = vmul.f32 %v688_v44, %v650_v25  ;;  %v695_v3 = vmul.f32 %v694_v16, %v649_v14  ;;  %v696_v46 = vmul.f32 %v694_v16, %v650_v25  ;;  %v2556_v36 = vadd.f32 %v672_v20, %v610_v55 }
  0xae   :  { %v2558_v21 = vadd.f32 %v677_v45, %v615_v5  ;;  %v2560_v22 = vadd.f32 %v678_v53, %v616_v47  ;;  %v2562_v57 = vadd.f32 %v683_v0, %v621_v10  ;;  %v2568_v37 = vadd.f32 %v684_v1, %v622_v12 }
  0xaf   :  { %v2570_v52 = vadd.f32 %v689_v2, %v627_v50  ;;  %v2572_v54 = vadd.f32 %v690_v43, %v628_v56  ;;  %v2574_v58 = vadd.f32 %v695_v3, %v633_v39  ;;  %v2581_v8 = vadd.f32 %v696_v46, %v2502_v59 }
  0xb0   :  { %v705_v61 = vmul.f32 %v2447_v32, %v704_v35  ;;  %v706_v62 = vmul.f32 %v2450_v63, %v704_v35  ;;  %v728_v31 = vstv %s2515_s10  ;;  %v734_v55 = vstv %s2521_s1  ;;  %s2675_s10 = sld [smem:[#allocation2 + $0x1a]]  ;;  %s2685_s1 = sld [smem:[#allocation2 + $0x1b]] }
  0xb1   :  { %v740_v5 = vstv %s2523_s16  ;;  %v746_v47 = vstv %s2526_s17  ;;  %v752_v10 = vstv %s2528_s18  ;;  %v764_v56 = vstv %s2536_s19  ;;  %s2687_s16 = sld [smem:[#allocation2 + $0x2d]] }
  0xb2   :  { %v707_v12 = vadd.f32 %v705_v61, %v701_v48  ;;  %v708_v50 = vadd.f32 %v706_v62, %v702_v60  ;;  %v768_v39 = vstv %s2538_s20  ;;  %v765_v59 = vmul.f32 %v2441_v19, %v764_v56  ;;  %s2701_s17 = sld [smem:[#allocation2 + $0x3d]] }
  0xb3   :  { %v766_v23 = vmul.f32 %v2444_v29, %v764_v56  ;;  %v769_v13 = vmul.f32 %v2447_v32, %v768_v39  ;;  %v770_v11 = vmul.f32 %v2450_v63, %v768_v39  ;;  %v758_v44 = vstv %s2548_s21  ;;  %s2703_s18 = sld [smem:[#allocation2 + $0x4d]] }
  0xb4   :  { %v711_v24 = vadd.f32 %v710_v49, %v707_v12  ;;  %v712_v38 = vadd.f32 %v710_v49, %v708_v50  ;;  %v774_v6 = vstv %s2550_s22  ;;  %v780_v16 = vstv %s2552_s23  ;;  %s2713_s19 = sld [smem:[#allocation2 + $0x5d]] }
  0xb5   :  { %v771_v14 = vadd.f32 %v769_v13, %v765_v59  ;;  %v772_v25 = vadd.f32 %v770_v11, %v766_v23  ;;  %v786_v48 = vstv %s2554_s24  ;;  %v792_v40 = vstv %s2564_s25  ;;  %s2715_s20 = sld [smem:[#allocation2 + $0x6d]]  ;;  %s2756_s24 = sld [smem:[#allocation2 + $0x1c]] }
  0xb6   :  { %v713_v60 = vmax.f32 %v711_v24, 0.0  ;;  %v714_v35 = vmax.f32 %v712_v38, 0.0  ;;  %v798_v30 = vstv %s2566_s26  ;;  %v804_v7 = vstv %s2576_s27  ;;  %s2725_s21 = sld [smem:[#allocation2 + $0x7d]]  ;;  %s2766_s27 = sld [smem:[#allocation2 + $0x2e]] }
  0xb7   :  { %v775_v34 = vadd.f32 %v774_v6, %v771_v14  ;;  %v776_v4 = vadd.f32 %v774_v6, %v772_v25  ;;  %v810_v26 = vstv %s2578_s28  ;;  %v816_v2 = vstv %s2590_s30  ;;  %s2727_s22 = sld [smem:[#allocation2 + $0x8d]]  ;;  %s2768_s28 = sld [smem:[#allocation2 + $0x3e]] }
  0xb8   :  { %v717_v49 = vmul.f32 %v716_v33, %v713_v60  ;;  %v718_v41 = vmul.f32 %v716_v33, %v714_v35  ;;  %v723_v20 = vmul.f32 %v722_v17, %v713_v60  ;;  %v724_v45 = vmul.f32 %v722_v17, %v714_v35  ;;  %s2738_s23 = sld [smem:[#allocation2 + $0x9d]]  ;;  %s2774_s30 = sld [smem:[#allocation2 + $0x4e]] }
  0xb9   :  { %v729_v53 = vmul.f32 %v728_v31, %v713_v60  ;;  %v730_v0 = vmul.f32 %v728_v31, %v714_v35  ;;  %v735_v1 = vmul.f32 %v734_v55, %v713_v60  ;;  %v736_v46 = vmul.f32 %v734_v55, %v714_v35  ;;  %s2759_s25 = sld [smem:[#allocation2 + $0xad]] }
  0xba   :  { %v719_v43 = vadd.f32 %v717_v49, %v2530_v27  ;;  %v720_v3 = vadd.f32 %v718_v41, %v2532_v28  ;;  %v725_v33 = vadd.f32 %v723_v20, %v2534_v15  ;;  %v726_v61 = vadd.f32 %v724_v45, %v2540_v18  ;;  %s2761_s26 = sld [smem:[#allocation2 + $0x1d]] }
  0xbb   :  { %v731_v17 = vadd.f32 %v729_v53, %v2542_v42  ;;  %v732_v62 = vadd.f32 %v730_v0, %v2544_v9  ;;  %v737_v31 = vadd.f32 %v735_v1, %v2546_v51  ;;  %v741_v12 = vmul.f32 %v740_v5, %v713_v60 }
  0xbc   :  { %v742_v50 = vmul.f32 %v740_v5, %v714_v35  ;;  %v747_v56 = vmul.f32 %v746_v47, %v713_v60  ;;  %v748_v39 = vmul.f32 %v746_v47, %v714_v35  ;;  %v753_v27 = vmul.f32 %v752_v10, %v713_v60 }
  0xbd   :  { %v754_v28 = vmul.f32 %v752_v10, %v714_v35  ;;  %v759_v15 = vmul.f32 %v758_v44, %v713_v60  ;;  %v760_v55 = vmul.f32 %v758_v44, %v714_v35  ;;  %v738_v18 = vadd.f32 %v736_v46, %v2556_v36 }
  0xbe   :  { %v743_v42 = vadd.f32 %v741_v12, %v2558_v21  ;;  %v744_v9 = vadd.f32 %v742_v50, %v2560_v22  ;;  %v749_v51 = vadd.f32 %v747_v56, %v2562_v57  ;;  %v750_v59 = vadd.f32 %v748_v39, %v2568_v37 }
  0xbf   :  { %v755_v5 = vadd.f32 %v753_v27, %v2570_v52  ;;  %v756_v47 = vadd.f32 %v754_v28, %v2572_v54  ;;  %v761_v10 = vadd.f32 %v759_v15, %v2574_v58  ;;  %v762_v23 = vadd.f32 %v760_v55, %v2581_v8 }
  0xc0   :  { %v777_v13 = vmax.f32 %v775_v34, 0.0  ;;  %v778_v11 = vmax.f32 %v776_v4, 0.0  ;;  %v828_v36 = vstv %s2618_s3  ;;  %v822_v21 = vstv %s2621_s4  ;;  %s2776_s3 = sld [smem:[#allocation2 + $0x5e]] }
  0xc1   :  { %v829_v22 = vmul.f32 %v2441_v19, %v828_v36  ;;  %v830_v57 = vmul.f32 %v2444_v29, %v828_v36  ;;  %v832_v37 = vstv %s2623_s11  ;;  %v838_v6 = vstv %s2632_s12  ;;  %s2778_s4 = sld [smem:[#allocation2 + $0x6e]] }
  0xc2   :  { %v781_v52 = vmul.f32 %v780_v16, %v777_v13  ;;  %v782_v54 = vmul.f32 %v780_v16, %v778_v11  ;;  %v787_v58 = vmul.f32 %v786_v48, %v777_v13  ;;  %v788_v8 = vmul.f32 %v786_v48, %v778_v11  ;;  %s2800_s11 = sld [smem:[#allocation2 + $0x7e]] }
  0xc3   :  { %v793_v24 = vmul.f32 %v792_v40, %v777_v13  ;;  %v794_v38 = vmul.f32 %v792_v40, %v778_v11  ;;  %v799_v44 = vmul.f32 %v798_v30, %v777_v13  ;;  %v800_v48 = vmul.f32 %v798_v30, %v778_v11  ;;  %s2810_s12 = sld [smem:[#allocation2 + $0x8e]] }
  0xc4   :  { %v2665_v14 = vadd.f32 %v781_v52, %v719_v43  ;;  %v2667_v25 = vadd.f32 %v782_v54, %v720_v3  ;;  %v2669_v16 = vadd.f32 %v787_v58, %v725_v33  ;;  %v2677_v60 = vadd.f32 %v788_v8, %v726_v61 }
  0xc5   :  { %v2679_v35 = vadd.f32 %v793_v24, %v731_v17  ;;  %v2681_v40 = vadd.f32 %v794_v38, %v732_v62  ;;  %v2683_v34 = vadd.f32 %v799_v44, %v737_v31  ;;  %v805_v4 = vmul.f32 %v804_v7, %v777_v13 }
  0xc6   :  { %v806_v30 = vmul.f32 %v804_v7, %v778_v11  ;;  %v811_v49 = vmul.f32 %v810_v26, %v777_v13  ;;  %v812_v41 = vmul.f32 %v810_v26, %v778_v11  ;;  %v817_v20 = vmul.f32 %v816_v2, %v777_v13 }
  0xc7   :  { %v818_v45 = vmul.f32 %v816_v2, %v778_v11  ;;  %v823_v53 = vmul.f32 %v822_v21, %v777_v13  ;;  %v824_v0 = vmul.f32 %v822_v21, %v778_v11  ;;  %v2705_v1 = vadd.f32 %v800_v48, %v738_v18 }
  0xc8   :  { %v2707_v43 = vadd.f32 %v805_v4, %v743_v42  ;;  %v2709_v7 = vadd.f32 %v806_v30, %v744_v9  ;;  %v2711_v26 = vadd.f32 %v811_v49, %v749_v51  ;;  %v2717_v2 = vadd.f32 %v812_v41, %v750_v59 }
  0xc9   :  { %v2719_v3 = vadd.f32 %v817_v20, %v755_v5  ;;  %v2721_v33 = vadd.f32 %v818_v45, %v756_v47  ;;  %v2723_v46 = vadd.f32 %v823_v53, %v761_v10  ;;  %v2729_v61 = vadd.f32 %v824_v0, %v762_v23 }
  0xca   :  { %v833_v17 = vmul.f32 %v2447_v32, %v832_v37  ;;  %v834_v62 = vmul.f32 %v2450_v63, %v832_v37  ;;  %v844_v31 = vstv %s2644_s13  ;;  %v850_v12 = vstv %s2650_s14  ;;  %s2812_s13 = sld [smem:[#allocation2 + $0x9e]] }
  0xcb   :  { %v856_v50 = vstv %s2652_s15  ;;  %v862_v56 = vstv %s2654_s5  ;;  %v868_v39 = vstv %s2656_s6  ;;  %v874_v15 = vstv %s2661_s7  ;;  %s2821_s14 = sld [smem:[#allocation2 + $0x1e]]  ;;  %s2823_s15 = sld [smem:[#allocation2 + $0x1f]] }
  0xcc   :  { %v835_v27 = vadd.f32 %v833_v17, %v829_v22  ;;  %v836_v28 = vadd.f32 %v834_v62, %v830_v57  ;;  %v880_v55 = vstv %s2663_s8  ;;  %v886_v18 = vstv %s2673_s9  ;;  %s2841_s5 = sld [smem:[#allocation2 + $0xae]]  ;;  %s2843_s6 = sld [smem:[#allocation2 + $0x2f]] }
  0xcd   :  { %v892_v42 = vstv %s2675_s10  ;;  %v896_v9 = vstv %s2685_s1  ;;  %v902_v51 = vstv %s2687_s16  ;;  %v908_v11 = vstv %s2701_s17  ;;  %s2853_s7 = sld [smem:[#allocation2 + $0x3f]] }
  0xce   :  { %v839_v59 = vadd.f32 %v838_v6, %v835_v27  ;;  %v840_v5 = vadd.f32 %v838_v6, %v836_v28  ;;  %v893_v47 = vmul.f32 %v2441_v19, %v892_v42  ;;  %v894_v10 = vmul.f32 %v2444_v29, %v892_v42  ;;  %s2855_s8 = sld [smem:[#allocation2 + $0x4f]] }
  0xcf   :  { %v897_v23 = vmul.f32 %v2447_v32, %v896_v9  ;;  %v898_v13 = vmul.f32 %v2450_v63, %v896_v9  ;;  %v914_v36 = vstv %s2703_s18  ;;  %v920_v57 = vstv %s2713_s19  ;;  %s2861_s9 = sld [smem:[#allocation2 + $0x5f]]  ;;  %s2904_s18 = sld [smem:[#allocation2 + $0xb8]] }
  0xd0   :  { %v841_v21 = vmax.f32 %v839_v59, 0.0  ;;  %v842_v22 = vmax.f32 %v840_v5, 0.0  ;;  %v926_v37 = vstv %s2715_s20  ;;  %v932_v58 = vstv %s2725_s21  ;;  %s2863_s10 = sld [smem:[#allocation2 + $0x6f]]  ;;  %s2916_s20 = sld [smem:[#allocation2 + $0xb9]] }
  0xd1   :  { %v899_v52 = vadd.f32 %v897_v23, %v893_v47  ;;  %v900_v54 = vadd.f32 %v898_v13, %v894_v10  ;;  %v938_v8 = vstv %s2727_s22  ;;  %v944_v49 = vstv %s2738_s23  ;;  %s2881_s1 = sld [smem:[#allocation2 + $0x7f]]  ;;  %s2925_s21 = sld [smem:[#allocation2 + $0xba]] }
  0xd2   :  { %v845_v24 = vmul.f32 %v844_v31, %v841_v21  ;;  %v846_v38 = vmul.f32 %v844_v31, %v842_v22  ;;  %v851_v44 = vmul.f32 %v850_v12, %v841_v21  ;;  %v852_v6 = vmul.f32 %v850_v12, %v842_v22  ;;  %s2898_s16 = sld [smem:[#allocation2 + $0x8f]]  ;;  %s2927_s22 = sld [smem:[#allocation2 + $0xbb]] }
  0xd3   :  { %v857_v48 = vmul.f32 %v856_v50, %v841_v21  ;;  %v858_v4 = vmul.f32 %v856_v50, %v842_v22  ;;  %v863_v30 = vmul.f32 %v862_v56, %v841_v21  ;;  %v864_v53 = vmul.f32 %v862_v56, %v842_v22  ;;  %s2902_s17 = sld [smem:[#allocation2 + $0x9f]]  ;;  %s2934_s23 = sld [smem:[#allocation2 + $0xbc]] }
  0xd4   :  { %v847_v41 = vadd.f32 %v845_v24, %v2665_v14  ;;  %v848_v20 = vadd.f32 %v846_v38, %v2667_v25  ;;  %v853_v45 = vadd.f32 %v851_v44, %v2669_v16  ;;  %v854_v0 = vadd.f32 %v852_v6, %v2677_v60  ;;  %s2914_s19 = sld [smem:[#allocation2 + $0xaf]] }
  0xd5   :  { %v859_v17 = vadd.f32 %v857_v48, %v2679_v35  ;;  %v860_v62 = vadd.f32 %v858_v4, %v2681_v40  ;;  %v865_v31 = vadd.f32 %v863_v30, %v2683_v34  ;;  %v869_v14 = vmul.f32 %v868_v39, %v841_v21 }
  0xd6   :  { %v870_v25 = vmul.f32 %v868_v39, %v842_v22  ;;  %v875_v16 = vmul.f32 %v874_v15, %v841_v21  ;;  %v876_v12 = vmul.f32 %v874_v15, %v842_v22  ;;  %v881_v50 = vmul.f32 %v880_v55, %v841_v21 }
  0xd7   :  { %v882_v56 = vmul.f32 %v880_v55, %v842_v22  ;;  %v887_v27 = vmul.f32 %v886_v18, %v841_v21  ;;  %v888_v60 = vmul.f32 %v886_v18, %v842_v22  ;;  %v866_v35 = vadd.f32 %v864_v53, %v2705_v1 }
  0xd8   :  { %v871_v40 = vadd.f32 %v869_v14, %v2707_v43  ;;  %v872_v34 = vadd.f32 %v870_v25, %v2709_v7  ;;  %v877_v28 = vadd.f32 %v875_v16, %v2711_v26  ;;  %v878_v39 = vadd.f32 %v876_v12, %v2717_v2 }
  0xd9   :  { %v883_v15 = vadd.f32 %v881_v50, %v2719_v3  ;;  %v884_v55 = vadd.f32 %v882_v56, %v2721_v33  ;;  %v889_v18 = vadd.f32 %v887_v27, %v2723_v46  ;;  %v890_v1 = vadd.f32 %v888_v60, %v2729_v61 }
  0xda   :  { %v903_v42 = vadd.f32 %v902_v51, %v899_v52  ;;  %v904_v43 = vadd.f32 %v902_v51, %v900_v54  ;;  %v956_v7 = vstv %s2756_s24  ;;  %v950_v26 = vstv %s2759_s25  ;;  %s2936_s24 = sld [smem:[#allocation2 + $0xbd]]  ;;  %s2942_s25 = sld [smem:[#allocation2 + $0xbe]] }
  0xdb   :  { %v957_v2 = vmul.f32 %v2441_v19, %v956_v7  ;;  %v958_v3 = vmul.f32 %v2444_v29, %v956_v7  ;;  %v960_v9 = vstv %s2761_s26  ;;  %v966_v59 = vstv %s2766_s27  ;;  %s2944_s26 = sld [smem:[#allocation2 + $0xbf]]  ;;  %s2946_s27 = sld [smem:[#allocation2 + $0xd8]] }
  0xdc   :  { %v905_v33 = vmax.f32 %v903_v42, 0.0  ;;  %v906_v46 = vmax.f32 %v904_v43, 0.0  ;;  %v961_v61 = vmul.f32 %v2447_v32, %v960_v9  ;;  %v962_v51 = vmul.f32 %v2450_v63, %v960_v9 }
  0xdd   :  { %v972_v5 = vstv %s2768_s28  ;;  %v978_v47 = vstv %s2774_s30  ;;  %v984_v10 = vstv %s2776_s3  ;;  %v990_v38 = vstv %s2778_s4  ;;  %s2989_s28 = sld [smem:[#allocation2 + $0xc0]]  ;;  %s2991_s30 = sld [smem:[#allocation2 + $0xc1]] }
  0xde   :  { %v909_v23 = vmul.f32 %v908_v11, %v905_v33  ;;  %v910_v13 = vmul.f32 %v908_v11, %v906_v46  ;;  %v915_v21 = vmul.f32 %v914_v36, %v905_v33  ;;  %v916_v22 = vmul.f32 %v914_v36, %v906_v46  ;;  %s3001_s3 = sld [smem:[#allocation2 + $0xc2]]  ;;  %s3009_s4 = sld [smem:[#allocation2 + $0xc3]] }
  0xdf   :  { %v921_v52 = vmul.f32 %v920_v57, %v905_v33  ;;  %v922_v54 = vmul.f32 %v920_v57, %v906_v46  ;;  %v927_v24 = vmul.f32 %v926_v37, %v905_v33  ;;  %v928_v57 = vmul.f32 %v926_v37, %v906_v46 }
  0xe0   :  { %v2825_v11 = vadd.f32 %v909_v23, %v847_v41  ;;  %v2827_v36 = vadd.f32 %v910_v13, %v848_v20  ;;  %v2829_v44 = vadd.f32 %v915_v21, %v853_v45  ;;  %v2833_v6 = vadd.f32 %v916_v22, %v854_v0 }
  0xe1   :  { %v2835_v48 = vadd.f32 %v921_v52, %v859_v17  ;;  %v2837_v4 = vadd.f32 %v922_v54, %v860_v62  ;;  %v2839_v30 = vadd.f32 %v927_v24, %v865_v31  ;;  %v933_v41 = vmul.f32 %v932_v58, %v905_v33 }
  0xe2   :  { %v934_v20 = vmul.f32 %v932_v58, %v906_v46  ;;  %v939_v45 = vmul.f32 %v938_v8, %v905_v33  ;;  %v940_v37 = vmul.f32 %v938_v8, %v906_v46  ;;  %v945_v53 = vmul.f32 %v944_v49, %v905_v33 }
  0xe3   :  { %v946_v0 = vmul.f32 %v944_v49, %v906_v46  ;;  %v951_v17 = vmul.f32 %v950_v26, %v905_v33  ;;  %v952_v62 = vmul.f32 %v950_v26, %v906_v46  ;;  %v2865_v58 = vadd.f32 %v928_v57, %v866_v35 }
  0xe4   :  { %v2867_v8 = vadd.f32 %v933_v41, %v871_v40  ;;  %v2869_v31 = vadd.f32 %v934_v20, %v872_v34  ;;  %v2871_v14 = vadd.f32 %v939_v45, %v877_v28  ;;  %v2873_v49 = vadd.f32 %v940_v37, %v878_v39 }
  0xe5   :  { %v2875_v25 = vadd.f32 %v945_v53, %v883_v15  ;;  %v2877_v16 = vadd.f32 %v946_v0, %v884_v55  ;;  %v2879_v12 = vadd.f32 %v951_v17, %v889_v18  ;;  %v2883_v50 = vadd.f32 %v952_v62, %v890_v1 }
  0xe6   :  { %v963_v56 = vadd.f32 %v961_v61, %v957_v2  ;;  %v964_v27 = vadd.f32 %v962_v51, %v958_v3  ;;  %v996_v60 = vstv %s2800_s11  ;;  %v1002_v35 = vstv %s2810_s12  ;;  %s3050_s11 = sld [smem:[#allocation2 + $0xc4]]  ;;  %s3052_s12 = sld [smem:[#allocation2 + $0xc5]] }
  0xe7   :  { %v1008_v40 = vstv %s2812_s13  ;;  %v1020_v34 = vstv %s2821_s14  ;;  %v1024_v28 = vstv %s2823_s15  ;;  %v1014_v1 = vstv %s2841_s5  ;;  %s3078_s13 = sld [smem:[#allocation2 + $0xc6]]  ;;  %s3080_s14 = sld [smem:[#allocation2 + $0xc7]] }
  0xe8   :  { %v967_v39 = vadd.f32 %v966_v59, %v963_v56  ;;  %v968_v15 = vadd.f32 %v966_v59, %v964_v27  ;;  %v1021_v55 = vmul.f32 %v2441_v19, %v1020_v34  ;;  %v1022_v18 = vmul.f32 %v2444_v29, %v1020_v34  ;;  %s3092_s15 = sld [smem:[#allocation2 + $0xc8]]  ;;  %s3096_s5 = sld [smem:[#allocation2 + $0xd9]] }
  0xe9   :  { %v1025_v42 = vmul.f32 %v2447_v32, %v1024_v28  ;;  %v1026_v43 = vmul.f32 %v2450_v63, %v1024_v28  ;;  %v1030_v7 = vstv %s2843_s6  ;;  %v1036_v3 = vstv %s2853_s7  ;;  %s3100_s6 = sld [smem:[#allocation2 + $0xc9]]  ;;  %s3102_s7 = sld [smem:[#allocation2 + $0xca]] }
  0xea   :  { %v969_v26 = vmax.f32 %v967_v39, 0.0  ;;  %v970_v2 = vmax.f32 %v968_v15, 0.0  ;;  %v1042_v9 = vstv %s2855_s8  ;;  %v1048_v33 = vstv %s2861_s9  ;;  %s3112_s8 = sld [smem:[#allocation2 + $0xcb]]  ;;  %s3114_s9 = sld [smem:[#allocation2 + $0xcc]] }
  0xeb   :  { %v1027_v19 = vadd.f32 %v1025_v42, %v1021_v55  ;;  %v1028_v29 = vadd.f32 %v1026_v43, %v1022_v18  ;;  %v1054_v46 = vstv %s2863_s10  ;;  %v1060_v21 = vstv %s2881_s1  ;;  %s3122_s10 = sld [smem:[#allocation2 + $0xcd]]  ;;  %s3124_s1 = sld [smem:[#allocation2 + $0xce]] }
  0xec   :  { %v973_v32 = vmul.f32 %v972_v5, %v969_v26  ;;  %v974_v63 = vmul.f32 %v972_v5, %v970_v2  ;;  %v979_v61 = vmul.f32 %v978_v47, %v969_v26  ;;  %v980_v59 = vmul.f32 %v978_v47, %v970_v2 }
  0xed   :  { %v985_v51 = vmul.f32 %v984_v10, %v969_v26  ;;  %v986_v23 = vmul.f32 %v984_v10, %v970_v2  ;;  %v991_v13 = vmul.f32 %v990_v38, %v969_v26  ;;  %v992_v52 = vmul.f32 %v990_v38, %v970_v2 }
  0xee   :  { %v975_v5 = vadd.f32 %v973_v32, %v2825_v11  ;;  %v976_v22 = vadd.f32 %v974_v63, %v2827_v36  ;;  %v981_v47 = vadd.f32 %v979_v61, %v2829_v44  ;;  %v982_v10 = vadd.f32 %v980_v59, %v2833_v6 }
  0xef   :  { %v987_v54 = vadd.f32 %v985_v51, %v2835_v48  ;;  %v988_v24 = vadd.f32 %v986_v23, %v2837_v4  ;;  %v993_v57 = vadd.f32 %v991_v13, %v2839_v30  ;;  %v997_v11 = vmul.f32 %v996_v60, %v969_v26 }
  0xf0   :  { %v998_v36 = vmul.f32 %v996_v60, %v970_v2  ;;  %v1003_v44 = vmul.f32 %v1002_v35, %v969_v26  ;;  %v1004_v38 = vmul.f32 %v1002_v35, %v970_v2  ;;  %v1009_v41 = vmul.f32 %v1008_v40, %v969_v26 }
  0xf1   :  { %v1010_v20 = vmul.f32 %v1008_v40, %v970_v2  ;;  %v1015_v45 = vmul.f32 %v1014_v1, %v969_v26  ;;  %v1016_v6 = vmul.f32 %v1014_v1, %v970_v2  ;;  %v994_v48 = vadd.f32 %v992_v52, %v2865_v58 }
  0xf2   :  { %v999_v4 = vadd.f32 %v997_v11, %v2867_v8  ;;  %v1000_v30 = vadd.f32 %v998_v36, %v2869_v31  ;;  %v1005_v37 = vadd.f32 %v1003_v44, %v2871_v14  ;;  %v1006_v53 = vadd.f32 %v1004_v38, %v2873_v49 }
  0xf3   :  { %v1011_v0 = vadd.f32 %v1009_v41, %v2875_v25  ;;  %v1012_v17 = vadd.f32 %v1010_v20, %v2877_v16  ;;  %v1017_v62 = vadd.f32 %v1015_v45, %v2879_v12  ;;  %v1018_v58 = vadd.f32 %v1016_v6, %v2883_v50 }
  0xf4   :  { %v1031_v8 = vadd.f32 %v1030_v7, %v1027_v19  ;;  %v1032_v31 = vadd.f32 %v1030_v7, %v1028_v29  ;;  %v1066_v14 = vstv %s2898_s16  ;;  %v1072_v49 = vstv %s2902_s17  ;;  %s3142_s16 = sld [smem:[#allocation2 + $0xcf]]  ;;  %s3144_s17 = sld [smem:[#allocation2 + $0xda]] }
  0xf5   :  { %v1078_v56 = vstv %s2914_s19  ;;  %v1100_v25 = vstv %s2904_s18  ;;  %v1104_v16 = vstv %s2916_s20  ;;  %v1110_v60 = vstv %s2925_s21  ;;  %s3148_s18 = sld [smem:[#allocation2 + $0xd0]]  ;;  %s3150_s19 = sld [smem:[#allocation2 + $0xd1]] }
  0xf6   :  { %v1033_v27 = vmax.f32 %v1031_v8, 0.0  ;;  %v1034_v12 = vmax.f32 %v1032_v31, 0.0  ;;  %v1116_v35 = vstv %s2927_s22  ;;  %v1122_v50 = vstv %s2934_s23  ;;  %s3156_s20 = sld [smem:[#allocation2 + $0xd2]]  ;;  %s3158_s21 = sld [smem:[#allocation2 + $0xd3]] }
  0xf7   :  { %v1128_v40 = vstv %s2936_s24  ;;  %v1134_v34 = vstv %s2942_s25  ;;  %v1140_v28 = vstv %s2944_s26  ;;  %v1146_v7 = vstv %s2946_s27  ;;  %s3169_s22 = sld [smem:[#allocation2 + $0xd4]]  ;;  %s3171_s23 = sld [smem:[#allocation2 + $0xd5]] }
  0xf8   :  { %v1037_v39 = vmul.f32 %v1036_v3, %v1033_v27  ;;  %v1038_v15 = vmul.f32 %v1036_v3, %v1034_v12  ;;  %v1043_v55 = vmul.f32 %v1042_v9, %v1033_v27  ;;  %v1044_v18 = vmul.f32 %v1042_v9, %v1034_v12  ;;  %s3184_s24 = sld [smem:[#allocation2 + $0xd6]]  ;;  %s3186_s25 = sld [smem:[#allocation2 + $0xd7]] }
  0xf9   :  { %v1049_v1 = vmul.f32 %v1048_v33, %v1033_v27  ;;  %v1050_v42 = vmul.f32 %v1048_v33, %v1034_v12  ;;  %v1055_v43 = vmul.f32 %v1054_v46, %v1033_v27  ;;  %v1056_v29 = vmul.f32 %v1054_v46, %v1034_v12  ;;  %s3194_s26 = sld [smem:[#allocation2 + $0xdc]]  ;;  %s3198_s27 = sld [smem:[#allocation2 + $0xdd]] }
  0xfa   :  { %v1039_v26 = vadd.f32 %v1037_v39, %v975_v5  ;;  %v1040_v2 = vadd.f32 %v1038_v15, %v976_v22  ;;  %v1045_v19 = vadd.f32 %v1043_v55, %v981_v47  ;;  %v1046_v32 = vadd.f32 %v1044_v18, %v982_v10 }
  0xfb   :  { %v1051_v63 = vadd.f32 %v1049_v1, %v987_v54  ;;  %v1052_v3 = vadd.f32 %v1050_v42, %v988_v24  ;;  %v1057_v61 = vadd.f32 %v1055_v43, %v993_v57  ;;  %v1061_v59 = vmul.f32 %v1060_v21, %v1033_v27 }
  0xfc   :  { %v1062_v9 = vmul.f32 %v1060_v21, %v1034_v12  ;;  %v1067_v51 = vmul.f32 %v1066_v14, %v1033_v27  ;;  %v1068_v23 = vmul.f32 %v1066_v14, %v1034_v12  ;;  %v1073_v13 = vmul.f32 %v1072_v49, %v1033_v27 }
  0xfd   :  { %v1074_v33 = vmul.f32 %v1072_v49, %v1034_v12  ;;  %v1079_v52 = vmul.f32 %v1078_v56, %v1033_v27  ;;  %v1080_v11 = vmul.f32 %v1078_v56, %v1034_v12  ;;  %v1058_v36 = vadd.f32 %v1056_v29, %v994_v48 }
  0xfe   :  { %v1063_v5 = vadd.f32 %v1061_v59, %v999_v4  ;;  %v1064_v22 = vadd.f32 %v1062_v9, %v1000_v30  ;;  %v1069_v47 = vadd.f32 %v1067_v51, %v1005_v37  ;;  %v1070_v44 = vadd.f32 %v1068_v23, %v1006_v53 }
  0xff   :  { %v1075_v46 = vadd.f32 %v1073_v13, %v1011_v0  ;;  %v1076_v10 = vadd.f32 %v1074_v33, %v1012_v17  ;;  %v1081_v54 = vadd.f32 %v1079_v52, %v1017_v62  ;;  %v2993_v24 = vmax.f32 %v1039_v26, 0.0 }
 0x100   :  { %v2995_v21 = vmax.f32 %v1040_v2, 0.0  ;;  %v2997_v57 = vmax.f32 %v1045_v19, 0.0  ;;  %v2999_v38 = vmax.f32 %v1046_v32, 0.0  ;;  %v1082_v41 = vadd.f32 %v1080_v11, %v1018_v58 }
 0x101   :  { %v3003_v20 = vmax.f32 %v1051_v63, 0.0  ;;  %v3005_v45 = vmax.f32 %v1052_v3, 0.0  ;;  %v3007_v6 = vmax.f32 %v1057_v61, 0.0  ;;  %v3011_v48 = vmax.f32 %v1058_v36, 0.0 }
 0x102   :  { %v3013_v4 = vmax.f32 %v1063_v5, 0.0  ;;  %v3015_v30 = vmax.f32 %v1064_v22, 0.0  ;;  %v3017_v37 = vmax.f32 %v1069_v47, 0.0  ;;  %v3019_v53 = vmax.f32 %v1070_v44, 0.0 }
 0x103   :  { %v3021_v0 = vmax.f32 %v1075_v46, 0.0  ;;  %v3023_v17 = vmax.f32 %v1076_v10, 0.0  ;;  %v3025_v62 = vmax.f32 %v1081_v54, 0.0  ;;  %v1101_v58 = vmul.f32 %v1100_v25, %v2993_v24 }
 0x104   :  { %v1102_v8 = vmul.f32 %v1100_v25, %v2995_v21  ;;  %v1105_v31 = vmul.f32 %v1104_v16, %v2997_v57  ;;  %v1106_v14 = vmul.f32 %v1104_v16, %v2999_v38  ;;  %v3039_v49 = vmax.f32 %v1082_v41, 0.0 }
 0x105   :  { %v1111_v56 = vmul.f32 %v1110_v60, %v3003_v20  ;;  %v1112_v27 = vmul.f32 %v1110_v60, %v3005_v45  ;;  %v1117_v25 = vmul.f32 %v1116_v35, %v3007_v6  ;;  %v1118_v39 = vmul.f32 %v1116_v35, %v3011_v48 }
 0x106   :  { %v1107_v16 = vadd.f32 %v1105_v31, %v1101_v58  ;;  %v1108_v12 = vadd.f32 %v1106_v14, %v1102_v8  ;;  %v1123_v15 = vmul.f32 %v1122_v50, %v3013_v4  ;;  %v1124_v60 = vmul.f32 %v1122_v50, %v3015_v30 }
 0x107   :  { %v1129_v55 = vmul.f32 %v1128_v40, %v3017_v37  ;;  %v1130_v18 = vmul.f32 %v1128_v40, %v3019_v53  ;;  %v1135_v1 = vmul.f32 %v1134_v34, %v3021_v0  ;;  %v1136_v35 = vmul.f32 %v1134_v34, %v3023_v17 }
 0x108   :  { %v1113_v42 = vadd.f32 %v1111_v56, %v1107_v16  ;;  %v1114_v43 = vadd.f32 %v1112_v27, %v1108_v12  ;;  %v1141_v26 = vmul.f32 %v1140_v28, %v3025_v62  ;;  %v1152_v50 = vstv %s2989_s28  ;;  %s3200_s28 = sld [smem:[#allocation2 + $0xde]] }
 0x109   :  { %v1156_v2 = vstv %s2991_s30  ;;  %v1162_v19 = vstv %s3001_s3  ;;  %v1168_v29 = vstv %s3009_s4  ;;  %v1153_v63 = vmul.f32 %v1152_v50, %v2993_v24  ;;  %s3206_s30 = sld [smem:[#allocation2 + $0xdb]]  ;;  %s3212_s3 = sld [smem:[#allocation2 + $0xe0]] }
 0x10a   :  { %v1119_v40 = vadd.f32 %v1117_v25, %v1113_v42  ;;  %v1120_v32 = vadd.f32 %v1118_v39, %v1114_v43  ;;  %v1154_v3 = vmul.f32 %v1152_v50, %v2995_v21  ;;  %v1157_v34 = vmul.f32 %v1156_v2, %v2997_v57  ;;  %s3214_s4 = sld [smem:[#allocation2 + $0xe1]] }
 0x10b   :  { %v1158_v61 = vmul.f32 %v1156_v2, %v2999_v38  ;;  %v1163_v59 = vmul.f32 %v1162_v19, %v3003_v20  ;;  %v1164_v9 = vmul.f32 %v1162_v19, %v3005_v45  ;;  %v1169_v13 = vmul.f32 %v1168_v29, %v3007_v6 }
 0x10c   :  { %v1125_v51 = vadd.f32 %v1123_v15, %v1119_v40  ;;  %v1126_v23 = vadd.f32 %v1124_v60, %v1120_v32  ;;  %v1170_v33 = vmul.f32 %v1168_v29, %v3011_v48  ;;  %v1159_v52 = vadd.f32 %v1157_v34, %v1153_v63 }
 0x10d   :  { %v1160_v11 = vadd.f32 %v1158_v61, %v1154_v3  ;;  %v1174_v36 = vstv %s3050_s11  ;;  %v1180_v5 = vstv %s3052_s12  ;;  %v1142_v44 = vmul.f32 %v1140_v28, %v3039_v49  ;;  %s3220_s11 = sld [smem:[#allocation2 + $0xdf]]  ;;  %s3224_s12 = sld [smem:[#allocation2 + $0xe2]] }
 0x10e   :  { %v1131_v22 = vadd.f32 %v1129_v55, %v1125_v51  ;;  %v1132_v47 = vadd.f32 %v1130_v18, %v1126_v23  ;;  %v1175_v46 = vmul.f32 %v1174_v36, %v3013_v4  ;;  %v1165_v10 = vadd.f32 %v1163_v59, %v1159_v52 }
 0x10f   :  { %v1166_v54 = vadd.f32 %v1164_v9, %v1160_v11  ;;  %v1176_v41 = vmul.f32 %v1174_v36, %v3015_v30  ;;  %v1181_v58 = vmul.f32 %v1180_v5, %v3017_v37  ;;  %v1186_v14 = vstv %s3078_s13  ;;  %s3226_s13 = sld [smem:[#allocation2 + $0xe3]] }
 0x110   :  { %v1137_v8 = vadd.f32 %v1135_v1, %v1131_v22  ;;  %v1138_v31 = vadd.f32 %v1136_v35, %v1132_v47  ;;  %v1192_v56 = vstv %s3080_s14  ;;  %v1171_v28 = vadd.f32 %v1169_v13, %v1165_v10  ;;  %s3239_s14 = sld [smem:[#allocation2 + $0xe4]] }
 0x111   :  { %v1172_v27 = vadd.f32 %v1170_v33, %v1166_v54  ;;  %v1182_v25 = vmul.f32 %v1180_v5, %v3019_v53  ;;  %v1187_v16 = vmul.f32 %v1186_v14, %v3021_v0  ;;  %v1188_v15 = vmul.f32 %v1186_v14, %v3023_v17 }
 0x112   :  { %v1143_v12 = vadd.f32 %v1141_v26, %v1137_v8  ;;  %v1144_v39 = vadd.f32 %v1142_v44, %v1138_v31  ;;  %v1193_v60 = vmul.f32 %v1192_v56, %v3025_v62  ;;  %v1177_v55 = vadd.f32 %v1175_v46, %v1171_v28 }
 0x113   :  { %v1178_v18 = vadd.f32 %v1176_v41, %v1172_v27  ;;  %v1194_v1 = vmul.f32 %v1192_v56, %v3039_v49  ;;  %v1204_v42 = vstv %s3092_s15  ;;  %v1198_v35 = vstv %s3096_s5  ;;  %s3243_s15 = sld [smem:[#allocation2 + $0xe5]]  ;;  %s1639_s5 = sld [smem:[#allocation2 + $0xe6]] }
 0x114   :  { %v3128_v43 = vadd.f32 %v1146_v7, %v1143_v12  ;;  %v1205_v26 = vmul.f32 %v1204_v42, %v2993_v24  ;;  %v1206_v50 = vmul.f32 %v1204_v42, %v2995_v21  ;;  %v1183_v2 = vadd.f32 %v1181_v58, %v1177_v55 }
 0x115   :  { %v1184_v19 = vadd.f32 %v1182_v25, %v1178_v18  ;;  %v1208_v29 = vstv %s3100_s6  ;;  %v1214_v40 = vstv %s3102_s7  ;;  %v3137_v32 = vadd.f32 %v1146_v7, %v1144_v39  ;;  %s3254_s6 = sld [smem:[#allocation2 + $0xe7]]  ;;  %s1641_s7 = sld [smem:[#allocation2 + $0xe8]] }
 0x116   :  { %v1149_v63 = vmax.f32 %v3128_v43, 0.0  ;;  %v1209_v3 = vmul.f32 %v1208_v29, %v2997_v57  ;;  %v1210_v34 = vmul.f32 %v1208_v29, %v2999_v38  ;;  %v1189_v61 = vadd.f32 %v1187_v16, %v1183_v2 }
 0x117   :  { %v1190_v59 = vadd.f32 %v1188_v15, %v1184_v19  ;;  %v1215_v9 = vmul.f32 %v1214_v40, %v3003_v20  ;;  %v1216_v51 = vmul.f32 %v1214_v40, %v3005_v45  ;;  %v1220_v13 = vstv %s3112_s8  ;;  %s1723_s8 = smov [#allocation7]  }
 0x118   :  { %v1211_v7 = vadd.f32 %v1209_v3, %v1205_v26  ;;  %v1212_v23 = vadd.f32 %v1210_v34, %v1206_v50  ;;  %v1226_v33 = vstv %s3114_s9  ;;  %v1195_v52 = vadd.f32 %v1193_v60, %v1189_v61  ;;  %s1396_s9 = sshll.u32 %s1723_s8, 4  ;;  %s1397_s9 = int_to_ptr.vmem [resolvable:$true] %s1396_s9 }
 0x119   :  { %v1196_v11 = vadd.f32 %v1194_v1, %v1190_v59  ;;  %v1221_v36 = vmul.f32 %v1220_v13, %v3007_v6  ;;  %v1222_v5 = vmul.f32 %v1220_v13, %v3011_v48  ;;  %v1227_v44 = vmul.f32 %v1226_v33, %v3013_v4  ;;  %p1696_p12 = scmp.lt.s32.totalorder %s1397_s9, %s1397_s9 }
 0x11a   :  { %v1217_v22 = vadd.f32 %v1215_v9, %v1211_v7  ;;  %v1218_v47 = vadd.f32 %v1216_v51, %v1212_v23  ;;  %v1228_v46 = vmul.f32 %v1226_v33, %v3015_v30  ;;  %v1150_v10 = vmax.f32 %v3137_v32, 0.0 }
 0x11b   :  { %v3163_v54 = vadd.f32 %v1198_v35, %v1195_v52  ;;  %v1232_v41 = vstv %s3122_s10  ;;  %v1238_v58 = vstv %s3124_s1  ;;  %v3173_v28 = vadd.f32 %v1198_v35, %v1196_v11  ;;  %s1691_s10 = scalar_lea.vmem %s1397_s9, 256 }
 0x11c   :  { %v1223_v8 = vadd.f32 %v1221_v36, %v1217_v22  ;;  %v1224_v31 = vadd.f32 %v1222_v5, %v1218_v47  ;;  %v1233_v14 = vmul.f32 %v1232_v41, %v3017_v37  ;;  %v1234_v56 = vmul.f32 %v1232_v41, %v3019_v53  ;;  %p1692_p11 = scmp.ne.s32.totalorder %s1397_s9, %s1691_s10  ;;  %p1697_p13 = scmp.lt.s32.totalorder %s1691_s10, %s1691_s10 }
 0x11d   :  { %v1201_v27 = vmax.f32 %v3163_v54, 0.0  ;;  %v1239_v25 = vmul.f32 %v1238_v58, %v3021_v0  ;;  %v1240_v16 = vmul.f32 %v1238_v58, %v3023_v17  ;;  %v1244_v15 = vstv %s3142_s16 }
 0x11e   :  { %v1229_v12 = vadd.f32 %v1227_v44, %v1223_v8  ;;  %v1230_v39 = vadd.f32 %v1228_v46, %v1224_v31  ;;  %v1250_v60 = vstv %s3144_s17  ;;  %v1245_v55 = vmul.f32 %v1244_v15, %v3025_v62  ;;  %p1698_p0 = por %p1697_p13, %p1696_p12 }
 0x11f   :  { %v1246_v18 = vmul.f32 %v1244_v15, %v3039_v49  ;;  %v1256_v1 = vstv %s3148_s18  ;;  %v1260_v42 = vstv %s3150_s19  ;;  %v1266_v40 = vstv %s3156_s20 }
 0x120   :  { %v1235_v35 = vadd.f32 %v1233_v14, %v1229_v12  ;;  %v1236_v26 = vadd.f32 %v1234_v56, %v1230_v39  ;;  %v1257_v50 = vmul.f32 %v1256_v1, %v2993_v24  ;;  %v1258_v2 = vmul.f32 %v1256_v1, %v2995_v21  ;;  %p1699_p1 = pnand %p1698_p0, %p1692_p11 }
 0x121   :  { %v1261_v19 = vmul.f32 %v1260_v42, %v2997_v57  ;;  %v1262_v29 = vmul.f32 %v1260_v42, %v2999_v38  ;;  %v1272_v3 = vstv %s3158_s21  ;;  %v1267_v59 = vmul.f32 %v1266_v40, %v3003_v20 }
 0x122   :  { %v1241_v34 = vadd.f32 %v1239_v25, %v1235_v35  ;;  %v1242_v61 = vadd.f32 %v1240_v16, %v1236_v26  ;;  %v1268_v9 = vmul.f32 %v1266_v40, %v3005_v45  ;;  %v1273_v57 = vmul.f32 %v1272_v3, %v3007_v6 }
 0x123   :  { %v1263_v24 = vadd.f32 %v1261_v19, %v1257_v50  ;;  %v1264_v21 = vadd.f32 %v1262_v29, %v1258_v2  ;;  %v1274_v38 = vmul.f32 %v1272_v3, %v3011_v48  ;;  %v1278_v23 = vstv %s3169_s22 }
 0x124   :  { %v1247_v51 = vadd.f32 %v1245_v55, %v1241_v34  ;;  %v1248_v7 = vadd.f32 %v1246_v18, %v1242_v61  ;;  %v1284_v13 = vstv %s3171_s23  ;;  %v1279_v33 = vmul.f32 %v1278_v23, %v3013_v4 }
 0x125   :  { %v1269_v20 = vadd.f32 %v1267_v59, %v1263_v24  ;;  %v1270_v45 = vadd.f32 %v1268_v9, %v1264_v21  ;;  %v1280_v52 = vmul.f32 %v1278_v23, %v3015_v30  ;;  %v1285_v6 = vmul.f32 %v1284_v13, %v3017_v37 }
 0x126   :  { %v1251_v11 = vadd.f32 %v1250_v60, %v1247_v51  ;;  %v1252_v36 = vadd.f32 %v1250_v60, %v1248_v7  ;;  %v1286_v48 = vmul.f32 %v1284_v13, %v3019_v53  ;;  %v1290_v47 = vstv %s3184_s24 }
 0x127   :  { %v1275_v5 = vadd.f32 %v1273_v57, %v1269_v20  ;;  %v1276_v22 = vadd.f32 %v1274_v38, %v1270_v45  ;;  %v1296_v44 = vstv %s3186_s25  ;;  %v1202_v4 = vmax.f32 %v3173_v28, 0.0 }
 0x128   :  { %v1253_v30 = vmax.f32 %v1251_v11, 0.0  ;;  %v1254_v46 = vmax.f32 %v1252_v36, 0.0  ;;  %v1291_v41 = vmul.f32 %v1290_v47, %v3021_v0  ;;  %v1292_v58 = vmul.f32 %v1290_v47, %v3023_v17 }
 0x129   :  { %v1281_v37 = vadd.f32 %v1279_v33, %v1275_v5  ;;  %v1282_v53 = vadd.f32 %v1280_v52, %v1276_v22  ;;  %v1297_v8 = vmul.f32 %v1296_v44, %v3025_v62  ;;  %v1298_v31 = vmul.f32 %v1296_v44, %v3039_v49 }
 0x12a   :  { %v1308_v14 = vstv %s3194_s26  ;;  %v1312_v56 = vstv %s3198_s27  ;;  %v1318_v28 = vstv %s3200_s28  ;;  %v1302_v62 = vstv %s3206_s30 }
 0x12b   :  { %v1287_v0 = vadd.f32 %v1285_v6, %v1281_v37  ;;  %v1288_v25 = vadd.f32 %v1286_v48, %v1282_v53  ;;  %v1309_v16 = vmul.f32 %v1308_v14, %v1149_v63  ;;  %v1310_v17 = vmul.f32 %v1308_v14, %v1150_v10 }
 0x12c   :  { %v1313_v12 = vmul.f32 %v1312_v56, %v1201_v27  ;;  %v1314_v39 = vmul.f32 %v1312_v56, %v1202_v4  ;;  %v1319_v60 = vmul.f32 %v1318_v28, %v1253_v30  ;;  %v1320_v55 = vmul.f32 %v1318_v28, %v1254_v46 }
 0x12d   :  { %v1293_v49 = vadd.f32 %v1291_v41, %v1287_v0  ;;  %v1294_v15 = vadd.f32 %v1292_v58, %v1288_v25  ;;  %v1336_v42 = vstv %s3212_s3  ;;  %v1340_v35 = vstv %s3214_s4 }
 0x12e   :  { %v1315_v18 = vadd.f32 %v1313_v12, %v1309_v16  ;;  %v1316_v1 = vadd.f32 %v1314_v39, %v1310_v17  ;;  %v1337_v2 = vmul.f32 %v1336_v42, %v1149_v63  ;;  %v1338_v19 = vmul.f32 %v1336_v42, %v1150_v10 }
 0x12f   :  { %v1299_v26 = vadd.f32 %v1297_v8, %v1293_v49  ;;  %v1300_v50 = vadd.f32 %v1298_v31, %v1294_v15  ;;  %v1324_v29 = vstv %s3220_s11  ;;  %v1341_v40 = vmul.f32 %v1340_v35, %v1201_v27 }
 0x130   :  { %v1342_v3 = vmul.f32 %v1340_v35, %v1202_v4  ;;  %v1346_v59 = vstv %s3224_s12  ;;  %v1352_v9 = vstv %s3226_s13  ;;  %v1321_v63 = vadd.f32 %v1319_v60, %v1315_v18 }
 0x131   :  { %v1303_v34 = vadd.f32 %v1302_v62, %v1299_v26  ;;  %v1304_v61 = vadd.f32 %v1302_v62, %v1300_v50  ;;  %v1343_v24 = vadd.f32 %v1341_v40, %v1337_v2  ;;  %v1347_v57 = vmul.f32 %v1346_v59, %v1253_v30 }
 0x132   :  { %v1344_v21 = vadd.f32 %v1342_v3, %v1338_v19  ;;  %v1348_v38 = vmul.f32 %v1346_v59, %v1254_v46  ;;  %v1322_v10 = vadd.f32 %v1320_v55, %v1316_v1  ;;  %v1330_v20 = vstv %s3239_s14 }
 0x133   :  { %v1305_v43 = vmax.f32 %v1303_v34, 0.0  ;;  %v1306_v32 = vmax.f32 %v1304_v61, 0.0  ;;  %v1349_v54 = vadd.f32 %v1347_v57, %v1343_v24  ;;  %v1358_v45 = vstv %s3243_s15 }
 0x134   :  { %v1350_v27 = vadd.f32 %v1348_v38, %v1344_v21  ;;  %v1364_v47 = vstv %s1639_s5  ;;  %v1368_v44 = vstv %s3254_s6  ;;  %v1374_v31 = vstv %s1641_s7 }
 0x135   :  { %v1325_v51 = vmul.f32 %v1324_v29, %v1305_v43  ;;  %v1326_v7 = vmul.f32 %v1324_v29, %v1306_v32  ;;  %v1353_v23 = vmul.f32 %v1352_v9, %v1305_v43  ;;  %v1354_v13 = vmul.f32 %v1352_v9, %v1306_v32 }
 0x137   :  { %v1327_v33 = vadd.f32 %v1325_v51, %v1321_v63  ;;  %v1328_v52 = vadd.f32 %v1326_v7, %v1322_v10  ;;  %v1355_v11 = vadd.f32 %v1353_v23, %v1349_v54  ;;  %v1356_v36 = vadd.f32 %v1354_v13, %v1350_v27 }
 0x139   :  { %v1331_v6 = vadd.f32 %v1330_v20, %v1327_v33  ;;  %v1332_v48 = vadd.f32 %v1330_v20, %v1328_v52  ;;  %v1359_v5 = vadd.f32 %v1358_v45, %v1355_v11  ;;  %v1360_v22 = vadd.f32 %v1358_v45, %v1356_v36 }
 0x13b   :  { %v1333_v4 = vmax.f32 %v1331_v6, 0.0  ;;  %v1334_v30 = vmax.f32 %v1332_v48, 0.0  ;;  %v1361_v46 = vmax.f32 %v1359_v5, 0.0  ;;  %v1362_v41 = vmax.f32 %v1360_v22, 0.0 }
 0x13d   :  { %v1365_v37 = vmul.f32 %v1364_v47, %v1333_v4  ;;  %v1366_v53 = vmul.f32 %v1364_v47, %v1334_v30  ;;  %v1369_v58 = vmul.f32 %v1368_v44, %v1361_v46  ;;  %v1370_v8 = vmul.f32 %v1368_v44, %v1362_v41 }
 0x13f   :  { %v1371_v14 = vadd.f32 %v1369_v58, %v1365_v37  ;;  %v1372_v56 = vadd.f32 %v1370_v8, %v1366_v53 }
 0x141   :  { %v1375_v28 = vadd.f32 %v1374_v31, %v1371_v14  ;;  %v1376_v0 = vadd.f32 %v1374_v31, %v1372_v56 }
 0x143   :  { %v1377_v25 = vsub.f32 0.0, %v1375_v28  ;;  %v1378_v16 = vsub.f32 0.0, %v1376_v0 }
 0x145   :  { %v1379_v17 = vmul.f32 1.442695, %v1377_v25  ;;  %v1381_v62 = vmul.f32 1.442695, %v1378_v16 }
 0x147   :  { %1647 = vpow2.f32 %v1379_v17 }
 0x148   :  { %1649 = vpow2.f32 %v1381_v62 }
 0x151   :  { %v1648_v12 = vpop.eup %1647 }
 0x152   :  { %v1650_v39 = vpop.eup %1649  ;;  %v1383_v49 = vadd.f32 1.0, %v1648_v12 }
 0x153   :  { %v1384_v15 = vadd.f32 1.0, %v1650_v39 }
 0x154   :  { %1651 = vrcp.f32 %v1383_v49 }
 0x155   :  { %1653 = vrcp.f32 %v1384_v15 }
 0x15e   :  { %v1652_v60 = vpop.eup %1651 }
 0x15f   :  { %v1654_v55 = vpop.eup %1653  ;;  %1389 = vst [vmem:[#allocation7] sm:$0xff] %v1652_v60 }
 0x160   :  { %1390 = vst [vmem:[#allocation7 + $0x8] sm:$0xff] %v1654_v55 }
 0x161   :  { %1702 = shalt.err (!%p1699_p1)
}
 0x162   :  { %s1703_s17 = scalar_lea.hbm %s3276_s2, 256 }
 0x163   :  { %p1704_p2 = scmp.ne.s32.totalorder %s3276_s2, %s1703_s17  ;;  %p1707_p3 = scmp.lt.u32.totalorder %s1703_s17, %s3276_s2 }
 0x165   :  { %p1709_p4 = pnand %p1707_p3, %p1704_p2 }
 0x167   :  { %1712 = shalt.err (!%p1709_p4)
}
 0x168   :  { %1402 = dma.vmem_to_hbm [thread:$0]  %s1397_s9, 256, %s3276_s2, [#allocation4], %s1721_s0, %s1721_s0, %s1722_s29  }
 0x169   :  { %1717 = dma.done.wait [#allocation4], 256  }
 0x16a   :  { %1718 = vsyncadd [#allocation4], 4294967040 }
 0x16b   :  { %1406 = vsyncpa [#allocation3], 1 }
 0x16c   :  { %1407 = vsyncpa [#allocation4], 1 }
 0x16d   :  { %1408 = vsyncpa [#allocation5], 1 }

</bundles_post_ra>
